<compile_context>
chip_gen: v7x
topology: tpu7x:2x2x1
jax: 0.10.0
libtpu: 0.0.40
codegen_flags: <defaults>
</compile_context>

<pallas_src>
import functools

import jax
import jax.numpy as jnp
from jax.experimental import pallas as pl
from jax.experimental.pallas import tpu as pltpu


def _pick_row_tile(Ho, Wo, Cin):
    """Output-row tile TH: divides Ho, keeps the (TH*Wo, 9*Cin) im2col patch modest,
    and keeps the output block's second-minor dim (TH*Wo) 8-aligned or full."""
    cap = max(1, 65536 // max(9 * Cin * Wo, 1))
    if Ho <= cap:
        return Ho
    best = 1 if (Wo % 8 == 0) else Ho
    for th in range(1, min(cap, Ho) + 1):
        if Ho % th == 0 and (th * Wo) % 8 == 0:
            best = th
    return best


def _conv3x3_relu_kernel(x_ref, w_ref, b_ref, o_ref, *, TH, Wo, stride, Cin):
    """Direct strided 3x3 conv + bias + ReLU for one (batch, row-tile) grid step.

    x_ref: (Hg, s, Wg, s*Cin)  f32  padded input of one image, stride-phase grouped
    w_ref: (9*Cin, Cout)       bf16 im2col-folded weights (tap-major: dh, dw, cin)
    b_ref: (1, Cout)           f32  bias
    o_ref: (TH*Wo, Cout)       f32  output row tile, rows = (i*Wo + j)
    """
    s = stride
    r0 = pl.multiple_of(pl.program_id(1) * TH, TH)

    taps = []
    for dh in range(3):
        hg0 = r0 + dh // s          # H group start for this tap (dynamic + const)
        hs = dh % s                 # H sub-phase (static)
        for dw in range(3):
            wg0 = dw // s           # W group offset (static)
            ws = dw % s             # W sub-phase -> channel-block offset (static)
            t = x_ref[pl.ds(hg0, TH), hs:hs + 1, wg0:wg0 + Wo,
                      ws * Cin:(ws + 1) * Cin]            # (TH, 1, Wo, Cin)
            taps.append(t)

    patch = jnp.concatenate(taps, axis=-1)                 # (TH, 1, Wo, 9*Cin) f32
    patch = patch.reshape(TH * Wo, 9 * Cin).astype(jnp.bfloat16)
    acc = jnp.dot(patch, w_ref[...],
                  preferred_element_type=jnp.float32)      # (TH*Wo, Cout) f32
    acc = jnp.maximum(acc + b_ref[...], 0.0)
    o_ref[...] = acc.astype(o_ref.dtype)


def conv3x3_relu(x_nhwc, w, b, *, stride):
    """3x3 conv (pad=1, stride s) + bias + ReLU == torch.nn.Conv2d(...,3,s,1) + ReLU."""
    B, H, W, Cin = x_nhwc.shape
    KH, KW, _, Cout = w.shape
    assert (KH, KW) == (3, 3)
    s = int(stride)
    Ho = (H + 2 - 3) // s + 1
    Wo = (W + 2 - 3) // s + 1

    # Spatial zero-pad of 1; extra trailing pad only so (H+2)/(W+2) divide the
    # stride (those rows/cols are never read by any tap).
    Hp, Wp = H + 2, W + 2
    eh, ew = (-Hp) % s, (-Wp) % s
    xp = jnp.pad(x_nhwc.astype(jnp.float32), ((0, 0), (1, 1 + eh), (1, 1 + ew), (0, 0)))
    Hp, Wp = Hp + eh, Wp + ew
    Hg, Wg = Hp // s, Wp // s
    # Group stride phases into trailing dims so in-kernel taps are contiguous:
    #   xg[b, hg, hs, wg, ws*Cin + c] == xp[b, hg*s + hs, wg*s + ws, c]
    xg = xp.reshape(B, Hg, s, Wg, s * Cin)

    # im2col-folded weights: row index = (dh*3 + dw)*Cin + cin  (matches tap concat)
    w_flat = w.reshape(9 * Cin, Cout).astype(jnp.bfloat16)
    b2 = b.reshape(1, Cout).astype(jnp.float32)

    TH = _pick_row_tile(Ho, Wo, Cin)
    n_rt = Ho // TH
    kernel = functools.partial(_conv3x3_relu_kernel, TH=TH, Wo=Wo, stride=s, Cin=Cin)

    # Advisory cost hint for the XLA scheduler around the custom call.
    cost = pl.CostEstimate(
        flops=2 * B * Ho * Wo * 9 * Cin * Cout,
        transcendentals=0,
        bytes_accessed=(xg.size * 4 + w_flat.size * 2 + b2.size * 4
                        + B * Ho * Wo * Cout * 4),
    )

    out = pl.pallas_call(
        kernel,
        out_shape=jax.ShapeDtypeStruct((B, Ho * Wo, Cout), jnp.float32),
        grid=(B, n_rt),
        in_specs=[
            # full padded image of one batch element; block index depends only on b,
            # so it is fetched once per image and revisited across row tiles.
            pl.BlockSpec((None, Hg, s, Wg, s * Cin),
                         lambda bb, r: (bb, 0, 0, 0, 0)),
            pl.BlockSpec((9 * Cin, Cout), lambda bb, r: (0, 0)),
            pl.BlockSpec((1, Cout), lambda bb, r: (0, 0)),
        ],
        out_specs=pl.BlockSpec((None, TH * Wo, Cout), lambda bb, r: (bb, r, 0)),
        compiler_params=pltpu.CompilerParams(
            dimension_semantics=("parallel", "parallel"),
            vmem_limit_bytes=32 * 1024 * 1024),
        cost_estimate=cost,
    )(xg, w_flat, b2)

    return out.reshape(B, Ho, Wo, Cout)   # free layout plumbing back to NHWC


class LastLayerToExtractReachedException(Exception):
    # Kept for fidelity with the PyTorch module; the early exit is implemented
    # statically below (layers past the last requested one are never traced).
    pass


class SimpleConvBackbone:
    """Tiny synthetic conv backbone (stand-in for a torchvision model).

    layer1: 3x3 conv C_in -> 8,  stride 1, pad 1, ReLU
    layer2: 3x3 conv 8   -> 16, stride 2, pad 1, ReLU
    layer3: 3x3 conv 16  -> 32, stride 2, pad 1, ReLU
    """

    def __init__(self, in_channels, key):
        self.layer_order = ["layer1", "layer2", "layer3"]
        cfg = {"layer1": (in_channels, 8, 1),
               "layer2": (8, 16, 2),
               "layer3": (16, 32, 2)}
        self.strides = {name: cfg[name][2] for name in self.layer_order}
        self.params = {}
        for i, name in enumerate(self.layer_order):
            cin, cout, _stride = cfg[name]
            kw, kb = jax.random.split(jax.random.fold_in(key, i))
            w = jax.random.normal(kw, (3, 3, cin, cout), jnp.float32) / jnp.sqrt(9.0 * cin)
            b = 0.01 * jax.random.normal(kb, (cout,), jnp.float32)
            self.params[name] = (w, b)


class NetworkFeatureAggregator:
    """JAX/Pallas re-implementation of the PyTorch NetworkFeatureAggregator.

    Instead of torch forward hooks, the backbone is run layer by layer inside a
    single jitted forward; the output of each layer named in
    `layers_to_extract_from` is recorded (in PyTorch NCHW convention, as a hook
    would see it), and layers after the last requested one are never executed —
    mirroring the LastLayerToExtractReachedException early exit.
    """

    def __init__(self, backbone, layers_to_extract_from):
        self.backbone = backbone
        self.layers_to_extract_from = list(layers_to_extract_from)
        self.outputs = {}
        # Static early-exit: truncate the layer schedule at the last requested layer.
        last = self.layers_to_extract_from[-1]
        order = backbone.layer_order
        self._layers_to_run = order[: order.index(last) + 1]
        # One jitted function for the whole (truncated) forward: all layout
        # plumbing + pallas_calls compile into a single XLA program.
        self._forward_jit = jax.jit(self._forward_impl)

    def _forward_impl(self, images_nchw, params):
        x = jnp.transpose(images_nchw, (0, 2, 3, 1))  # NCHW -> NHWC for the kernel
        outs = {}
        for name in self._layers_to_run:
            w, b = params[name]
            x = conv3x3_relu(x, w, b, stride=self.backbone.strides[name])
            if name in self.layers_to_extract_from:
                # hooks capture raw module outputs (NCHW in torch)
                outs[name] = jnp.transpose(x, (0, 3, 1, 2))
        return outs

    def __call__(self, images_nchw):
        return self.forward(images_nchw)

    def forward(self, images_nchw):
        self.outputs = dict(self._forward_jit(images_nchw, self.backbone.params))
        return self.outputs

    def feature_dimensions(self, input_shape):
        _input = jnp.ones([1] + list(input_shape), jnp.float32)
        _output = self.forward(_input)
        return [_output[layer].shape[1] for layer in self.layers_to_extract_from]


if __name__ == "__main__":
    key = jax.random.PRNGKey(0)
    k_x, k_p = jax.random.split(key)

    B, C, H, W = 2, 4, 16, 16
    x = jax.random.normal(k_x, (B, C, H, W), jnp.float32)   # PyTorch-style NCHW input

    backbone = SimpleConvBackbone(in_channels=C, key=k_p)
    aggregator = NetworkFeatureAggregator(
        backbone, layers_to_extract_from=["layer2", "layer3"])

    outputs = aggregator(x)
    outputs = jax.tree_util.tree_map(jax.block_until_ready, outputs)

    assert set(outputs.keys()) == {"layer2", "layer3"}
    assert outputs["layer2"].shape == (B, 16, H // 2, W // 2)
    assert outputs["layer3"].shape == (B, 32, H // 4, W // 4)
    assert aggregator.feature_dimensions((C, H, W)) == [16, 32]

    # Numerical sanity vs. a pure-JAX f32 reference (kernel uses bf16 MXU inputs).
    def ref_forward(x_nchw):
        xr = jnp.transpose(x_nchw, (0, 2, 3, 1))
        feats = {}
        for name in backbone.layer_order:
            w, b = backbone.params[name]
            stride = backbone.strides[name]
            xr = jax.lax.conv_general_dilated(
                xr, w, window_strides=(stride, stride), padding=((1, 1), (1, 1)),
                dimension_numbers=("NHWC", "HWIO", "NHWC"))
            xr = jnp.maximum(xr + b, 0.0)
            feats[name] = jnp.transpose(xr, (0, 3, 1, 2))
        return feats

    ref = ref_forward(x)
    for name in ("layer2", "layer3"):
        err = float(jnp.max(jnp.abs(outputs[name] - ref[name])))
        assert err < 0.2, f"{name}: max abs err {err}"

    print("KERNEL_OK")
</pallas_src>

<mosaic_0001>
module attributes {stable_mosaic.version = 11 : i64} {
  func.func @_conv3x3_relu_kernel(%arg0: i32, %arg1: i32, %arg2: memref<1x18x1x18x4xf32, #tpu.memory_space<vmem>>, %arg3: memref<36x8xbf16, #tpu.memory_space<vmem>>, %arg4: memref<1x8xf32, #tpu.memory_space<vmem>>, %arg5: memref<1x256x8xf32, #tpu.memory_space<vmem>>) attributes {dimension_semantics = [#tpu.dimension_semantics<parallel>, #tpu.dimension_semantics<parallel>], iteration_bounds = array<i64: 2, 1>, scalar_prefetch = 0 : i64, scratch_operands = 0 : i64, tpu.core_type = #tpu.core_type<tc>, window_params = [{transform_indices = @transform_0, window_bounds = array<i64: 1, 18, 1, 18, 4>}, {pipeline_mode = #tpu.pipeline_mode<synchronous>, transform_indices = @transform_1, window_bounds = array<i64: 36, 8>}, {pipeline_mode = #tpu.pipeline_mode<synchronous>, transform_indices = @transform_2, window_bounds = array<i64: 1, 8>}, {transform_indices = @transform_3, window_bounds = array<i64: 1, 256, 8>}]} {
    %c16_i32 = arith.constant 16 : i32
    %0 = arith.muli %arg1, %c16_i32 : i32
    %1 = tpu.assume_multiple %0, 16 : i32
    %c0_i32 = arith.constant 0 : i32
    %2 = arith.addi %1, %c0_i32 : i32
    %c0 = arith.constant 0 : index
    %3 = arith.index_cast %2 : i32 to index
    %c0_0 = arith.constant 0 : index
    %c0_1 = arith.constant 0 : index
    %c0_2 = arith.constant 0 : index
    %4 = vector.load %arg2[%c0, %3, %c0_0, %c0_1, %c0_2] : memref<1x18x1x18x4xf32, #tpu.memory_space<vmem>>, vector<1x16x1x16x4xf32>
    %5 = vector.shape_cast %4 : vector<1x16x1x16x4xf32> to vector<16x1x16x4xf32>
    %c0_3 = arith.constant 0 : index
    %6 = arith.index_cast %2 : i32 to index
    %c0_4 = arith.constant 0 : index
    %c1 = arith.constant 1 : index
    %c0_5 = arith.constant 0 : index
    %7 = vector.load %arg2[%c0_3, %6, %c0_4, %c1, %c0_5] : memref<1x18x1x18x4xf32, #tpu.memory_space<vmem>>, vector<1x16x1x16x4xf32>
    %8 = vector.shape_cast %7 : vector<1x16x1x16x4xf32> to vector<16x1x16x4xf32>
    %c0_6 = arith.constant 0 : index
    %9 = arith.index_cast %2 : i32 to index
    %c0_7 = arith.constant 0 : index
    %c2 = arith.constant 2 : index
    %c0_8 = arith.constant 0 : index
    %10 = vector.load %arg2[%c0_6, %9, %c0_7, %c2, %c0_8] : memref<1x18x1x18x4xf32, #tpu.memory_space<vmem>>, vector<1x16x1x16x4xf32>
    %11 = vector.shape_cast %10 : vector<1x16x1x16x4xf32> to vector<16x1x16x4xf32>
    %c1_i32 = arith.constant 1 : i32
    %12 = arith.addi %1, %c1_i32 : i32
    %c0_9 = arith.constant 0 : index
    %13 = arith.index_cast %12 : i32 to index
    %c0_10 = arith.constant 0 : index
    %c0_11 = arith.constant 0 : index
    %c0_12 = arith.constant 0 : index
    %14 = vector.load %arg2[%c0_9, %13, %c0_10, %c0_11, %c0_12] : memref<1x18x1x18x4xf32, #tpu.memory_space<vmem>>, vector<1x16x1x16x4xf32>
    %15 = vector.shape_cast %14 : vector<1x16x1x16x4xf32> to vector<16x1x16x4xf32>
    %c0_13 = arith.constant 0 : index
    %16 = arith.index_cast %12 : i32 to index
    %c0_14 = arith.constant 0 : index
    %c1_15 = arith.constant 1 : index
    %c0_16 = arith.constant 0 : index
    %17 = vector.load %arg2[%c0_13, %16, %c0_14, %c1_15, %c0_16] : memref<1x18x1x18x4xf32, #tpu.memory_space<vmem>>, vector<1x16x1x16x4xf32>
    %18 = vector.shape_cast %17 : vector<1x16x1x16x4xf32> to vector<16x1x16x4xf32>
    %c0_17 = arith.constant 0 : index
    %19 = arith.index_cast %12 : i32 to index
    %c0_18 = arith.constant 0 : index
    %c2_19 = arith.constant 2 : index
    %c0_20 = arith.constant 0 : index
    %20 = vector.load %arg2[%c0_17, %19, %c0_18, %c2_19, %c0_20] : memref<1x18x1x18x4xf32, #tpu.memory_space<vmem>>, vector<1x16x1x16x4xf32>
    %21 = vector.shape_cast %20 : vector<1x16x1x16x4xf32> to vector<16x1x16x4xf32>
    %c2_i32 = arith.constant 2 : i32
    %22 = arith.addi %1, %c2_i32 : i32
    %c0_21 = arith.constant 0 : index
    %23 = arith.index_cast %22 : i32 to index
    %c0_22 = arith.constant 0 : index
    %c0_23 = arith.constant 0 : index
    %c0_24 = arith.constant 0 : index
    %24 = vector.load %arg2[%c0_21, %23, %c0_22, %c0_23, %c0_24] : memref<1x18x1x18x4xf32, #tpu.memory_space<vmem>>, vector<1x16x1x16x4xf32>
    %25 = vector.shape_cast %24 : vector<1x16x1x16x4xf32> to vector<16x1x16x4xf32>
    %c0_25 = arith.constant 0 : index
    %26 = arith.index_cast %22 : i32 to index
    %c0_26 = arith.constant 0 : index
    %c1_27 = arith.constant 1 : index
    %c0_28 = arith.constant 0 : index
    %27 = vector.load %arg2[%c0_25, %26, %c0_26, %c1_27, %c0_28] : memref<1x18x1x18x4xf32, #tpu.memory_space<vmem>>, vector<1x16x1x16x4xf32>
    %28 = vector.shape_cast %27 : vector<1x16x1x16x4xf32> to vector<16x1x16x4xf32>
    %c0_29 = arith.constant 0 : index
    %29 = arith.index_cast %22 : i32 to index
    %c0_30 = arith.constant 0 : index
    %c2_31 = arith.constant 2 : index
    %c0_32 = arith.constant 0 : index
    %30 = vector.load %arg2[%c0_29, %29, %c0_30, %c2_31, %c0_32] : memref<1x18x1x18x4xf32, #tpu.memory_space<vmem>>, vector<1x16x1x16x4xf32>
    %31 = vector.shape_cast %30 : vector<1x16x1x16x4xf32> to vector<16x1x16x4xf32>
    %32 = tpu.concatenate %5, %8, %11, %15, %18, %21, %25, %28, %31 in 3 : vector<16x1x16x4xf32>, vector<16x1x16x4xf32>, vector<16x1x16x4xf32>, vector<16x1x16x4xf32>, vector<16x1x16x4xf32>, vector<16x1x16x4xf32>, vector<16x1x16x4xf32>, vector<16x1x16x4xf32>, vector<16x1x16x4xf32> -> vector<16x1x16x36xf32>
    %33 = vector.shape_cast %32 : vector<16x1x16x36xf32> to vector<256x36xf32>
    %34 = arith.truncf %33 : vector<256x36xf32> to vector<256x36xbf16>
    %c0_33 = arith.constant 0 : index
    %c0_34 = arith.constant 0 : index
    %35 = vector.load %arg3[%c0_33, %c0_34] : memref<36x8xbf16, #tpu.memory_space<vmem>>, vector<36x8xbf16>
    %cst = arith.constant dense<0.000000e+00> : vector<256x8xf32>
    %36 = tpu.matmul %34, %35, %cst {dimension_numbers = #tpu.dot_dimension_numbers<[1], [0], [0], [1], [0, 0, 1, 1], [], []>} : vector<256x36xbf16>, vector<36x8xbf16>, vector<256x8xf32> -> vector<256x8xf32>
    %c0_35 = arith.constant 0 : index
    %c0_36 = arith.constant 0 : index
    %37 = vector.load %arg4[%c0_35, %c0_36] : memref<1x8xf32, #tpu.memory_space<vmem>>, vector<1x8xf32>
    %38 = vector.broadcast %37 : vector<1x8xf32> to vector<256x8xf32>
    %39 = arith.addf %36, %38 : vector<256x8xf32>
    %cst_37 = arith.constant 0.000000e+00 : f32
    %40 = vector.broadcast %cst_37 : f32 to vector<256x8xf32>
    %41 = arith.maximumf %39, %40 : vector<256x8xf32>
    %c0_38 = arith.constant 0 : index
    %c0_39 = arith.constant 0 : index
    %c0_40 = arith.constant 0 : index
    %42 = vector.load %arg5[%c0_38, %c0_39, %c0_40] : memref<1x256x8xf32, #tpu.memory_space<vmem>>, vector<1x256x8xf32>
    %43 = vector.shape_cast %42 : vector<1x256x8xf32> to vector<256x8xf32>
    %44 = vector.shape_cast %41 : vector<256x8xf32> to vector<1x256x8xf32>
    tpu.vector_store %arg5[%c0_38, %c0_39, %c0_40], %44 {strides = array<i32>} : memref<1x256x8xf32, #tpu.memory_space<vmem>>, vector<1x256x8xf32>,
    return
  }
  func.func @transform_0(%arg0: i32, %arg1: i32) -> (i32, i32, i32, i32, i32) {
    %c0_i32 = arith.constant 0 : i32
    %c0_i32_0 = arith.constant 0 : i32
    %c0_i32_1 = arith.constant 0 : i32
    %c0_i32_2 = arith.constant 0 : i32
    %c0_i32_3 = arith.constant 0 : i32
    return %arg0, %c0_i32, %c0_i32_0, %c0_i32_1, %c0_i32_2 : i32, i32, i32, i32, i32
  }
  func.func @transform_1(%arg0: i32, %arg1: i32) -> (i32, i32) {
    %c0_i32 = arith.constant 0 : i32
    %c0_i32_0 = arith.constant 0 : i32
    %c0_i32_1 = arith.constant 0 : i32
    return %c0_i32, %c0_i32_0 : i32, i32
  }
  func.func @transform_2(%arg0: i32, %arg1: i32) -> (i32, i32) {
    %c0_i32 = arith.constant 0 : i32
    %c0_i32_0 = arith.constant 0 : i32
    %c0_i32_1 = arith.constant 0 : i32
    return %c0_i32, %c0_i32_0 : i32, i32
  }
  func.func @transform_3(%arg0: i32, %arg1: i32) -> (i32, i32, i32) {
    %c0_i32 = arith.constant 0 : i32
    %c0_i32_0 = arith.constant 0 : i32
    return %arg0, %arg1, %c0_i32 : i32, i32, i32
  }
}

module attributes {stable_mosaic.version = 11 : i64} {
  func.func @_conv3x3_relu_kernel(%arg0: i32, %arg1: i32, %arg2: memref<1x9x2x9x16xf32, #tpu.memory_space<vmem>>, %arg3: memref<72x16xbf16, #tpu.memory_space<vmem>>, %arg4: memref<1x16xf32, #tpu.memory_space<vmem>>, %arg5: memref<1x64x16xf32, #tpu.memory_space<vmem>>) attributes {dimension_semantics = [#tpu.dimension_semantics<parallel>, #tpu.dimension_semantics<parallel>], iteration_bounds = array<i64: 2, 1>, scalar_prefetch = 0 : i64, scratch_operands = 0 : i64, tpu.core_type = #tpu.core_type<tc>, window_params = [{transform_indices = @transform_0, window_bounds = array<i64: 1, 9, 2, 9, 16>}, {pipeline_mode = #tpu.pipeline_mode<synchronous>, transform_indices = @transform_1, window_bounds = array<i64: 72, 16>}, {pipeline_mode = #tpu.pipeline_mode<synchronous>, transform_indices = @transform_2, window_bounds = array<i64: 1, 16>}, {transform_indices = @transform_3, window_bounds = array<i64: 1, 64, 16>}]} {
    %c8_i32 = arith.constant 8 : i32
    %0 = arith.muli %arg1, %c8_i32 : i32
    %1 = tpu.assume_multiple %0, 8 : i32
    %c0_i32 = arith.constant 0 : i32
    %2 = arith.addi %1, %c0_i32 : i32
    %c0 = arith.constant 0 : index
    %3 = arith.index_cast %2 : i32 to index
    %c0_0 = arith.constant 0 : index
    %c0_1 = arith.constant 0 : index
    %c0_2 = arith.constant 0 : index
    %4 = vector.load %arg2[%c0, %3, %c0_0, %c0_1, %c0_2] : memref<1x9x2x9x16xf32, #tpu.memory_space<vmem>>, vector<1x8x1x8x8xf32>
    %5 = vector.shape_cast %4 : vector<1x8x1x8x8xf32> to vector<8x1x8x8xf32>
    %c0_3 = arith.constant 0 : index
    %6 = arith.index_cast %2 : i32 to index
    %c0_4 = arith.constant 0 : index
    %c0_5 = arith.constant 0 : index
    %c8 = arith.constant 8 : index
    %7 = vector.load %arg2[%c0_3, %6, %c0_4, %c0_5, %c8] : memref<1x9x2x9x16xf32, #tpu.memory_space<vmem>>, vector<1x8x1x8x8xf32>
    %8 = vector.shape_cast %7 : vector<1x8x1x8x8xf32> to vector<8x1x8x8xf32>
    %c0_6 = arith.constant 0 : index
    %9 = arith.index_cast %2 : i32 to index
    %c0_7 = arith.constant 0 : index
    %c1 = arith.constant 1 : index
    %c0_8 = arith.constant 0 : index
    %10 = vector.load %arg2[%c0_6, %9, %c0_7, %c1, %c0_8] : memref<1x9x2x9x16xf32, #tpu.memory_space<vmem>>, vector<1x8x1x8x8xf32>
    %11 = vector.shape_cast %10 : vector<1x8x1x8x8xf32> to vector<8x1x8x8xf32>
    %c0_i32_9 = arith.constant 0 : i32
    %12 = arith.addi %1, %c0_i32_9 : i32
    %c0_10 = arith.constant 0 : index
    %13 = arith.index_cast %12 : i32 to index
    %c1_11 = arith.constant 1 : index
    %c0_12 = arith.constant 0 : index
    %c0_13 = arith.constant 0 : index
    %14 = vector.load %arg2[%c0_10, %13, %c1_11, %c0_12, %c0_13] : memref<1x9x2x9x16xf32, #tpu.memory_space<vmem>>, vector<1x8x1x8x8xf32>
    %15 = vector.shape_cast %14 : vector<1x8x1x8x8xf32> to vector<8x1x8x8xf32>
    %c0_14 = arith.constant 0 : index
    %16 = arith.index_cast %12 : i32 to index
    %c1_15 = arith.constant 1 : index
    %c0_16 = arith.constant 0 : index
    %c8_17 = arith.constant 8 : index
    %17 = vector.load %arg2[%c0_14, %16, %c1_15, %c0_16, %c8_17] : memref<1x9x2x9x16xf32, #tpu.memory_space<vmem>>, vector<1x8x1x8x8xf32>
    %18 = vector.shape_cast %17 : vector<1x8x1x8x8xf32> to vector<8x1x8x8xf32>
    %c0_18 = arith.constant 0 : index
    %19 = arith.index_cast %12 : i32 to index
    %c1_19 = arith.constant 1 : index
    %c1_20 = arith.constant 1 : index
    %c0_21 = arith.constant 0 : index
    %20 = vector.load %arg2[%c0_18, %19, %c1_19, %c1_20, %c0_21] : memref<1x9x2x9x16xf32, #tpu.memory_space<vmem>>, vector<1x8x1x8x8xf32>
    %21 = vector.shape_cast %20 : vector<1x8x1x8x8xf32> to vector<8x1x8x8xf32>
    %c1_i32 = arith.constant 1 : i32
    %22 = arith.addi %1, %c1_i32 : i32
    %c0_22 = arith.constant 0 : index
    %23 = arith.index_cast %22 : i32 to index
    %c0_23 = arith.constant 0 : index
    %c0_24 = arith.constant 0 : index
    %c0_25 = arith.constant 0 : index
    %24 = vector.load %arg2[%c0_22, %23, %c0_23, %c0_24, %c0_25] : memref<1x9x2x9x16xf32, #tpu.memory_space<vmem>>, vector<1x8x1x8x8xf32>
    %25 = vector.shape_cast %24 : vector<1x8x1x8x8xf32> to vector<8x1x8x8xf32>
    %c0_26 = arith.constant 0 : index
    %26 = arith.index_cast %22 : i32 to index
    %c0_27 = arith.constant 0 : index
    %c0_28 = arith.constant 0 : index
    %c8_29 = arith.constant 8 : index
    %27 = vector.load %arg2[%c0_26, %26, %c0_27, %c0_28, %c8_29] : memref<1x9x2x9x16xf32, #tpu.memory_space<vmem>>, vector<1x8x1x8x8xf32>
    %28 = vector.shape_cast %27 : vector<1x8x1x8x8xf32> to vector<8x1x8x8xf32>
    %c0_30 = arith.constant 0 : index
    %29 = arith.index_cast %22 : i32 to index
    %c0_31 = arith.constant 0 : index
    %c1_32 = arith.constant 1 : index
    %c0_33 = arith.constant 0 : index
    %30 = vector.load %arg2[%c0_30, %29, %c0_31, %c1_32, %c0_33] : memref<1x9x2x9x16xf32, #tpu.memory_space<vmem>>, vector<1x8x1x8x8xf32>
    %31 = vector.shape_cast %30 : vector<1x8x1x8x8xf32> to vector<8x1x8x8xf32>
    %32 = tpu.concatenate %5, %8, %11, %15, %18, %21, %25, %28, %31 in 3 : vector<8x1x8x8xf32>, vector<8x1x8x8xf32>, vector<8x1x8x8xf32>, vector<8x1x8x8xf32>, vector<8x1x8x8xf32>, vector<8x1x8x8xf32>, vector<8x1x8x8xf32>, vector<8x1x8x8xf32>, vector<8x1x8x8xf32> -> vector<8x1x8x72xf32>
    %33 = vector.shape_cast %32 : vector<8x1x8x72xf32> to vector<64x72xf32>
    %34 = arith.truncf %33 : vector<64x72xf32> to vector<64x72xbf16>
    %c0_34 = arith.constant 0 : index
    %c0_35 = arith.constant 0 : index
    %35 = vector.load %arg3[%c0_34, %c0_35] : memref<72x16xbf16, #tpu.memory_space<vmem>>, vector<72x16xbf16>
    %cst = arith.constant dense<0.000000e+00> : vector<64x16xf32>
    %36 = tpu.matmul %34, %35, %cst {dimension_numbers = #tpu.dot_dimension_numbers<[1], [0], [0], [1], [0, 0, 1, 1], [], []>} : vector<64x72xbf16>, vector<72x16xbf16>, vector<64x16xf32> -> vector<64x16xf32>
    %c0_36 = arith.constant 0 : index
    %c0_37 = arith.constant 0 : index
    %37 = vector.load %arg4[%c0_36, %c0_37] : memref<1x16xf32, #tpu.memory_space<vmem>>, vector<1x16xf32>
    %38 = vector.broadcast %37 : vector<1x16xf32> to vector<64x16xf32>
    %39 = arith.addf %36, %38 : vector<64x16xf32>
    %cst_38 = arith.constant 0.000000e+00 : f32
    %40 = vector.broadcast %cst_38 : f32 to vector<64x16xf32>
    %41 = arith.maximumf %39, %40 : vector<64x16xf32>
    %c0_39 = arith.constant 0 : index
    %c0_40 = arith.constant 0 : index
    %c0_41 = arith.constant 0 : index
    %42 = vector.load %arg5[%c0_39, %c0_40, %c0_41] : memref<1x64x16xf32, #tpu.memory_space<vmem>>, vector<1x64x16xf32>
    %43 = vector.shape_cast %42 : vector<1x64x16xf32> to vector<64x16xf32>
    %44 = vector.shape_cast %41 : vector<64x16xf32> to vector<1x64x16xf32>
    tpu.vector_store %arg5[%c0_39, %c0_40, %c0_41], %44 {strides = array<i32>} : memref<1x64x16xf32, #tpu.memory_space<vmem>>, vector<1x64x16xf32>,
    return
  }
  func.func @transform_0(%arg0: i32, %arg1: i32) -> (i32, i32, i32, i32, i32) {
    %c0_i32 = arith.constant 0 : i32
    %c0_i32_0 = arith.constant 0 : i32
    %c0_i32_1 = arith.constant 0 : i32
    %c0_i32_2 = arith.constant 0 : i32
    %c0_i32_3 = arith.constant 0 : i32
    return %arg0, %c0_i32, %c0_i32_0, %c0_i32_1, %c0_i32_2 : i32, i32, i32, i32, i32
  }
  func.func @transform_1(%arg0: i32, %arg1: i32) -> (i32, i32) {
    %c0_i32 = arith.constant 0 : i32
    %c0_i32_0 = arith.constant 0 : i32
    %c0_i32_1 = arith.constant 0 : i32
    return %c0_i32, %c0_i32_0 : i32, i32
  }
  func.func @transform_2(%arg0: i32, %arg1: i32) -> (i32, i32) {
    %c0_i32 = arith.constant 0 : i32
    %c0_i32_0 = arith.constant 0 : i32
    %c0_i32_1 = arith.constant 0 : i32
    return %c0_i32, %c0_i32_0 : i32, i32
  }
  func.func @transform_3(%arg0: i32, %arg1: i32) -> (i32, i32, i32) {
    %c0_i32 = arith.constant 0 : i32
    %c0_i32_0 = arith.constant 0 : i32
    return %arg0, %arg1, %c0_i32 : i32, i32, i32
  }
}

module attributes {stable_mosaic.version = 11 : i64} {
  func.func @_conv3x3_relu_kernel(%arg0: i32, %arg1: i32, %arg2: memref<1x5x2x5x32xf32, #tpu.memory_space<vmem>>, %arg3: memref<144x32xbf16, #tpu.memory_space<vmem>>, %arg4: memref<1x32xf32, #tpu.memory_space<vmem>>, %arg5: memref<1x16x32xf32, #tpu.memory_space<vmem>>) attributes {dimension_semantics = [#tpu.dimension_semantics<parallel>, #tpu.dimension_semantics<parallel>], iteration_bounds = array<i64: 2, 1>, scalar_prefetch = 0 : i64, scratch_operands = 0 : i64, tpu.core_type = #tpu.core_type<tc>, window_params = [{transform_indices = @transform_0, window_bounds = array<i64: 1, 5, 2, 5, 32>}, {pipeline_mode = #tpu.pipeline_mode<synchronous>, transform_indices = @transform_1, window_bounds = array<i64: 144, 32>}, {pipeline_mode = #tpu.pipeline_mode<synchronous>, transform_indices = @transform_2, window_bounds = array<i64: 1, 32>}, {transform_indices = @transform_3, window_bounds = array<i64: 1, 16, 32>}]} {
    %c4_i32 = arith.constant 4 : i32
    %0 = arith.muli %arg1, %c4_i32 : i32
    %1 = tpu.assume_multiple %0, 4 : i32
    %c0_i32 = arith.constant 0 : i32
    %2 = arith.addi %1, %c0_i32 : i32
    %c0 = arith.constant 0 : index
    %3 = arith.index_cast %2 : i32 to index
    %c0_0 = arith.constant 0 : index
    %c0_1 = arith.constant 0 : index
    %c0_2 = arith.constant 0 : index
    %4 = vector.load %arg2[%c0, %3, %c0_0, %c0_1, %c0_2] : memref<1x5x2x5x32xf32, #tpu.memory_space<vmem>>, vector<1x4x1x4x16xf32>
    %5 = vector.shape_cast %4 : vector<1x4x1x4x16xf32> to vector<4x1x4x16xf32>
    %c0_3 = arith.constant 0 : index
    %6 = arith.index_cast %2 : i32 to index
    %c0_4 = arith.constant 0 : index
    %c0_5 = arith.constant 0 : index
    %c16 = arith.constant 16 : index
    %7 = vector.load %arg2[%c0_3, %6, %c0_4, %c0_5, %c16] : memref<1x5x2x5x32xf32, #tpu.memory_space<vmem>>, vector<1x4x1x4x16xf32>
    %8 = vector.shape_cast %7 : vector<1x4x1x4x16xf32> to vector<4x1x4x16xf32>
    %c0_6 = arith.constant 0 : index
    %9 = arith.index_cast %2 : i32 to index
    %c0_7 = arith.constant 0 : index
    %c1 = arith.constant 1 : index
    %c0_8 = arith.constant 0 : index
    %10 = vector.load %arg2[%c0_6, %9, %c0_7, %c1, %c0_8] : memref<1x5x2x5x32xf32, #tpu.memory_space<vmem>>, vector<1x4x1x4x16xf32>
    %11 = vector.shape_cast %10 : vector<1x4x1x4x16xf32> to vector<4x1x4x16xf32>
    %c0_i32_9 = arith.constant 0 : i32
    %12 = arith.addi %1, %c0_i32_9 : i32
    %c0_10 = arith.constant 0 : index
    %13 = arith.index_cast %12 : i32 to index
    %c1_11 = arith.constant 1 : index
    %c0_12 = arith.constant 0 : index
    %c0_13 = arith.constant 0 : index
    %14 = vector.load %arg2[%c0_10, %13, %c1_11, %c0_12, %c0_13] : memref<1x5x2x5x32xf32, #tpu.memory_space<vmem>>, vector<1x4x1x4x16xf32>
    %15 = vector.shape_cast %14 : vector<1x4x1x4x16xf32> to vector<4x1x4x16xf32>
    %c0_14 = arith.constant 0 : index
    %16 = arith.index_cast %12 : i32 to index
    %c1_15 = arith.constant 1 : index
    %c0_16 = arith.constant 0 : index
    %c16_17 = arith.constant 16 : index
    %17 = vector.load %arg2[%c0_14, %16, %c1_15, %c0_16, %c16_17] : memref<1x5x2x5x32xf32, #tpu.memory_space<vmem>>, vector<1x4x1x4x16xf32>
    %18 = vector.shape_cast %17 : vector<1x4x1x4x16xf32> to vector<4x1x4x16xf32>
    %c0_18 = arith.constant 0 : index
    %19 = arith.index_cast %12 : i32 to index
    %c1_19 = arith.constant 1 : index
    %c1_20 = arith.constant 1 : index
    %c0_21 = arith.constant 0 : index
    %20 = vector.load %arg2[%c0_18, %19, %c1_19, %c1_20, %c0_21] : memref<1x5x2x5x32xf32, #tpu.memory_space<vmem>>, vector<1x4x1x4x16xf32>
    %21 = vector.shape_cast %20 : vector<1x4x1x4x16xf32> to vector<4x1x4x16xf32>
    %c1_i32 = arith.constant 1 : i32
    %22 = arith.addi %1, %c1_i32 : i32
    %c0_22 = arith.constant 0 : index
    %23 = arith.index_cast %22 : i32 to index
    %c0_23 = arith.constant 0 : index
    %c0_24 = arith.constant 0 : index
    %c0_25 = arith.constant 0 : index
    %24 = vector.load %arg2[%c0_22, %23, %c0_23, %c0_24, %c0_25] : memref<1x5x2x5x32xf32, #tpu.memory_space<vmem>>, vector<1x4x1x4x16xf32>
    %25 = vector.shape_cast %24 : vector<1x4x1x4x16xf32> to vector<4x1x4x16xf32>
    %c0_26 = arith.constant 0 : index
    %26 = arith.index_cast %22 : i32 to index
    %c0_27 = arith.constant 0 : index
    %c0_28 = arith.constant 0 : index
    %c16_29 = arith.constant 16 : index
    %27 = vector.load %arg2[%c0_26, %26, %c0_27, %c0_28, %c16_29] : memref<1x5x2x5x32xf32, #tpu.memory_space<vmem>>, vector<1x4x1x4x16xf32>
    %28 = vector.shape_cast %27 : vector<1x4x1x4x16xf32> to vector<4x1x4x16xf32>
    %c0_30 = arith.constant 0 : index
    %29 = arith.index_cast %22 : i32 to index
    %c0_31 = arith.constant 0 : index
    %c1_32 = arith.constant 1 : index
    %c0_33 = arith.constant 0 : index
    %30 = vector.load %arg2[%c0_30, %29, %c0_31, %c1_32, %c0_33] : memref<1x5x2x5x32xf32, #tpu.memory_space<vmem>>, vector<1x4x1x4x16xf32>
    %31 = vector.shape_cast %30 : vector<1x4x1x4x16xf32> to vector<4x1x4x16xf32>
    %32 = tpu.concatenate %5, %8, %11, %15, %18, %21, %25, %28, %31 in 3 : vector<4x1x4x16xf32>, vector<4x1x4x16xf32>, vector<4x1x4x16xf32>, vector<4x1x4x16xf32>, vector<4x1x4x16xf32>, vector<4x1x4x16xf32>, vector<4x1x4x16xf32>, vector<4x1x4x16xf32>, vector<4x1x4x16xf32> -> vector<4x1x4x144xf32>
    %33 = vector.shape_cast %32 : vector<4x1x4x144xf32> to vector<16x144xf32>
    %34 = arith.truncf %33 : vector<16x144xf32> to vector<16x144xbf16>
    %c0_34 = arith.constant 0 : index
    %c0_35 = arith.constant 0 : index
    %35 = vector.load %arg3[%c0_34, %c0_35] : memref<144x32xbf16, #tpu.memory_space<vmem>>, vector<144x32xbf16>
    %cst = arith.constant dense<0.000000e+00> : vector<16x32xf32>
    %36 = tpu.matmul %34, %35, %cst {dimension_numbers = #tpu.dot_dimension_numbers<[1], [0], [0], [1], [0, 0, 1, 1], [], []>} : vector<16x144xbf16>, vector<144x32xbf16>, vector<16x32xf32> -> vector<16x32xf32>
    %c0_36 = arith.constant 0 : index
    %c0_37 = arith.constant 0 : index
    %37 = vector.load %arg4[%c0_36, %c0_37] : memref<1x32xf32, #tpu.memory_space<vmem>>, vector<1x32xf32>
    %38 = vector.broadcast %37 : vector<1x32xf32> to vector<16x32xf32>
    %39 = arith.addf %36, %38 : vector<16x32xf32>
    %cst_38 = arith.constant 0.000000e+00 : f32
    %40 = vector.broadcast %cst_38 : f32 to vector<16x32xf32>
    %41 = arith.maximumf %39, %40 : vector<16x32xf32>
    %c0_39 = arith.constant 0 : index
    %c0_40 = arith.constant 0 : index
    %c0_41 = arith.constant 0 : index
    %42 = vector.load %arg5[%c0_39, %c0_40, %c0_41] : memref<1x16x32xf32, #tpu.memory_space<vmem>>, vector<1x16x32xf32>
    %43 = vector.shape_cast %42 : vector<1x16x32xf32> to vector<16x32xf32>
    %44 = vector.shape_cast %41 : vector<16x32xf32> to vector<1x16x32xf32>
    tpu.vector_store %arg5[%c0_39, %c0_40, %c0_41], %44 {strides = array<i32>} : memref<1x16x32xf32, #tpu.memory_space<vmem>>, vector<1x16x32xf32>,
    return
  }
  func.func @transform_0(%arg0: i32, %arg1: i32) -> (i32, i32, i32, i32, i32) {
    %c0_i32 = arith.constant 0 : i32
    %c0_i32_0 = arith.constant 0 : i32
    %c0_i32_1 = arith.constant 0 : i32
    %c0_i32_2 = arith.constant 0 : i32
    %c0_i32_3 = arith.constant 0 : i32
    return %arg0, %c0_i32, %c0_i32_0, %c0_i32_1, %c0_i32_2 : i32, i32, i32, i32, i32
  }
  func.func @transform_1(%arg0: i32, %arg1: i32) -> (i32, i32) {
    %c0_i32 = arith.constant 0 : i32
    %c0_i32_0 = arith.constant 0 : i32
    %c0_i32_1 = arith.constant 0 : i32
    return %c0_i32, %c0_i32_0 : i32, i32
  }
  func.func @transform_2(%arg0: i32, %arg1: i32) -> (i32, i32) {
    %c0_i32 = arith.constant 0 : i32
    %c0_i32_0 = arith.constant 0 : i32
    %c0_i32_1 = arith.constant 0 : i32
    return %c0_i32, %c0_i32_0 : i32, i32
  }
  func.func @transform_3(%arg0: i32, %arg1: i32) -> (i32, i32, i32) {
    %c0_i32 = arith.constant 0 : i32
    %c0_i32_0 = arith.constant 0 : i32
    return %arg0, %arg1, %c0_i32 : i32, i32, i32
  }
}

</mosaic_0001>

<bundles_post_ra>
// kernel: _forward_impl.4
= control target key start
LH: loop header
LB: loop body
LE: loop exit
PB: predicated region body
PF: predicated region fallthrough
CT: control target
= control target key end

     0   :  { %s985_s12 = smov 0   ;;  %s987_s13 = smov 0   ;;  %s1204_s0 = inlined_call_operand.vmem [shape: f32[2,9,2,9,16], index: 0, kind: input, shape index: {}]   ;;  %s1205_s1 = inlined_call_operand.vmem [shape: bf16[72,16], index: 1, kind: input, shape index: {}]   ;;  %s1206_s2 = inlined_call_operand.vmem [shape: f32[1,16], index: 2, kind: input, shape index: {}]   ;;  %s1207_s3 = inlined_call_operand.vmem [shape: f32[2,64,16], index: 3, kind: output, shape index: {}]  }
   0x1   :  { %s989_s14 = smov 0  }
   0x2 LB: > { %s25_s15 = sadd.s32 1, %s954_s13  ;;  %p713_p0 = scmp.ge.s32.totalorder %s958_s14, 1  ;;  %s958_s14 = sphi %s989_s14, %s13_s14   ;;  %s954_s13 = sphi %s987_s13, %s1209_s13   ;;  %s950_s12 = sphi %s985_s12, %s1208_s12  }
   0x3   : > { %p27_p1 = scmp.ge.s32.totalorder %s25_s15, 2  ;;  %p151_p2 = scmp.lt.s32.totalorder %s958_s14, 3 }
   0x5   : > { %s1211_s15 = smov (%p27_p1, %s25_s15), 0  ;;  %p152_p3 = pnand %p713_p0, %p151_p2 }
   0x6   : > { %p179_p4 = scmp.lt.s32.totalorder (!%p152_p3), %s950_s12, 1  ;;  %s960_s20 = smov (!%p152_p3), 16   ;;  %v931_v23 = vld [vmem:[%s1205_s1] sm:$0xff] (!%p152_p3)   ;;  %v932_v29 = vld [vmem:[%s1205_s1 + $0x8] sm:$0xff] (!%p152_p3)   ;;  %v933_v36 = vld [vmem:[%s1205_s1 + $0x10] sm:$0xff] (!%p152_p3)   ;;  %vm534_vm0 = vcmask (!%p152_p3), 1043456  }
   0x7   : > { %155 = sbr.rel (%p152_p3) target bundleno = 400 (0x190), region = 32  ;;  %s961_s21 = smov (!%p152_p3), 24   ;;  %771 = vmatprep.subr.bf16.mxu0 (!%p152_p3), %v931_v23  ;;  %789 = vmatprep.subr.bf16.mxu1 (!%p152_p3), %v931_v23  ;;  %v934_v43 = vld [vmem:[%s1205_s1 + $0x18] sm:$0xff] (!%p152_p3)   ;;  %v935_v50 = vld [vmem:[%s1205_s1 + $0x20] ss:$0 sps:$4 sm:$0xff] (!%p152_p3)   ;;  %vm411_vm1 = vcmask (!%p152_p3), 130048  }
   0x8   : > { %772 = vmatpush3.bf16.msra.mxu0 (!%p152_p3), %v931_v23  ;;  %794 = vmatpush3.bf16.msra.mxu1 (!%p152_p3), %v931_v23  ;;  %s962_s28 = smov (!%p152_p3), 40   ;;  %s963_s6 = smov (!%p152_p3), 48   ;;  %v536_v53 = vsel (!%p152_p3), %vm534_vm0, %v935_v50, 0  ;;  %vm420_vm2 = vcmask (!%p152_p3), 195584   ;;  %vm429_vm3 = vcmask (!%p152_p3), 261120   ;;  %vm438_vm4 = vcmask (!%p152_p3), 326656  }
   0x9   : > { %773 = vmatprep.subr.bf16.mxu0 (!%p152_p3), %v932_v29  ;;  %790 = vmatprep.subr.bf16.mxu1 (!%p152_p3), %v932_v29  ;;  %s964_s7 = smov (!%p152_p3), 64   ;;  %vm447_vm5 = vcmask (!%p152_p3), 392192   ;;  %vm456_vm6 = vcmask (!%p152_p3), 457728   ;;  %vm465_vm7 = vcmask (!%p152_p3), 523264   ;;  %vm521_vm8 = vcmask (!%p152_p3), 588800  }
   0xc   : > { %774 = vmatpush3.bf16.msra.mxu0 (!%p152_p3), %v932_v29  ;;  %795 = vmatpush3.bf16.msra.mxu1 (!%p152_p3), %v932_v29 }
   0xd   : > { %775 = vmatprep.subr.bf16.mxu0 (!%p152_p3), %v933_v36  ;;  %791 = vmatprep.subr.bf16.mxu1 (!%p152_p3), %v933_v36 }
   0xe   : > { %s1213_s12 = smov (!%p179_p4, %s950_s12), 1 }
   0xf   : > { %s801_s16 = smul.u32 288, %s1213_s12  ;;  %s761_s10 = sshll.u32 %s1213_s12, 6 }
  0x10   : > { %776 = vmatpush3.bf16.msra.mxu0 %v933_v36  ;;  %796 = vmatpush3.bf16.msra.mxu1 %v933_v36  ;;  %s192_s17 = scalar_lea.vmem %s1207_s3, %s761_s10 }
  0x11   : > { %s1009_s19 = scalar_lea.vmem %s1204_s0, %s801_s16  ;;  %777 = vmatprep.subr.bf16.mxu0 %v934_v43  ;;  %792 = vmatprep.subr.bf16.mxu1 %v934_v43 }
  0x12   : > { %v1012_v0 = vld [vmem:[%s1009_s19 + $0x41] sm:$0xff]  ;;  %v721_v12 = vld [vmem:[%s1009_s19 + $0x90] sm:$0xff] }
  0x13   : > { %v1015_v1 = vld [vmem:[%s1009_s19 + $0x61] sm:$0xff]  ;;  %v722_v13 = vld [vmem:[%s1009_s19 + $0xb0] sm:$0xff] }
  0x14   : > { %v206_v2 = vld [vmem:[%s1009_s19 + $0x1] sm:$0xff]  ;;  %v841_v3 = vpack.i.bf16 %v1015_v1, %v1012_v0  ;;  %v717_v14 = vld [vmem:[%s1009_s19 + $0x10] sm:$0xff]  ;;  %v856_v16 = vpack.i.bf16 %v722_v13, %v721_v12  ;;  %778 = vmatpush3.bf16.msra.mxu0 %v934_v43  ;;  %797 = vmatpush3.bf16.msra.mxu1 %v934_v43 }
  0x15   : > { %v1021_v4 = vld [vmem:[%s1009_s19 + $0x21] sm:$0xff]  ;;  %v718_v15 = vld [vmem:[%s1009_s19 + $0x30] sm:$0xff]  ;;  %799 = vmatprep.subr.msk.bf16.mxu0 %vm534_vm0, %v935_v50  ;;  %800 = vmatprep.subr.msk.bf16.mxu1 %vm534_vm0, %v935_v50 }
  0x16   : > { %v1024_v5 = vld [vmem:[%s1009_s19 + $0xc1] sm:$0xff]  ;;  %v831_v7 = vpack.i.bf16 %v1021_v4, %v206_v2  ;;  %842 = vrot.lane.b32.xlu1 %v841_v3, %s960_s20  ;;  %v851_v17 = vpack.i.bf16 %v718_v15, %v717_v14  ;;  %v723_v18 = vld [vmem:[%s1009_s19 + $0xd0] sm:$0xff]  ;;  %v911_v55 = vpack.i.bf16 %v1012_v0, %v1021_v4 }
  0x17   : > { %v1027_v6 = vld [vmem:[%s1009_s19 + $0xe1] sm:$0xff]  ;;  %v724_v19 = vld [vmem:[%s1009_s19 + $0xf0] sm:$0xff] }
  0x18   : > { %v1031_v8 = vld [vmem:[%s1009_s19 + $0x81] sm:$0xff]  ;;  %v846_v10 = vpack.i.bf16 %v1027_v6, %v1024_v5  ;;  %832 = vrot.lane.b32.xlu0 %v831_v7, %s960_s20  ;;  %v719_v20 = vld [vmem:[%s1009_s19 + $0x50] sm:$0xff]  ;;  %v866_v22 = vpack.i.bf16 %v724_v19, %v723_v18  ;;  %780 = vmatpush3.bf16.msra.mxu0 %v536_v53 }
  0x19   : > { %v1034_v9 = vld [vmem:[%s1009_s19 + $0xa1] sm:$0xff]  ;;  %v720_v21 = vld [vmem:[%s1009_s19 + $0x70] sm:$0xff]  ;;  %798 = vmatpush3.bf16.msra.mxu1 %v536_v53  ;;  %v921_v58 = vpack.i.bf16 %v1031_v8, %v1015_v1 }
  0x1a   : > { %v836_v11 = vpack.i.bf16 %v1034_v9, %v1031_v8  ;;  %847 = vrot.lane.b32.xlu1 %v846_v10, %s960_s20  ;;  %v861_v24 = vpack.i.bf16 %v720_v21, %v719_v20  ;;  %v729_v25 = vld [vmem:[%s1009_s19 + $0x91] sm:$0xff]  ;;  %v1066_v39 = vld [vmem:[%s1009_s19 + $0xa0] sm:$0xff]  ;;  %v916_v54 = vpack.i.bf16 %v1024_v5, %v1034_v9 }
  0x1b   : > { %v730_v26 = vld [vmem:[%s1009_s19 + $0xb1] sm:$0xff]  ;;  %v1069_v40 = vld [vmem:[%s1009_s19 + $0xc0] sm:$0xff] }
  0x1c   : > { %837 = vrot.lane.b32.xlu0 %v836_v11, %s960_s20  ;;  %v725_v27 = vld [vmem:[%s1009_s19 + $0x11] sm:$0xff]  ;;  %v876_v30 = vpack.i.bf16 %v730_v26, %v729_v25  ;;  %v1072_v41 = vld [vmem:[%s1009_s19 + $0x20] sm:$0xff]  ;;  %v896_v44 = vpack.i.bf16 %v1069_v40, %v1066_v39 }
  0x1d   : > { %v726_v28 = vld [vmem:[%s1009_s19 + $0x31] sm:$0xff]  ;;  %v1075_v42 = vld [vmem:[%s1009_s19 + $0x40] sm:$0xff] }
  0x1e   : > { %857 = vrot.lane.b32.xlu1 %v856_v16, %s961_s21  ;;  %v871_v31 = vpack.i.bf16 %v726_v28, %v725_v27  ;;  %v731_v32 = vld [vmem:[%s1009_s19 + $0xd1] sm:$0xff]  ;;  %v891_v45 = vpack.i.bf16 %v1075_v42, %v1072_v41  ;;  %v1085_v46 = vld [vmem:[%s1009_s19 + $0xe0] sm:$0xff] }
  0x1f   : > { %v732_v33 = vld [vmem:[%s1009_s19 + $0xf1] sm:$0xff]  ;;  %v740_v47 = vld [vmem:[%s1009_s19 + $0x100] sm:$0xff] }
  0x20   : > { %852 = vrot.lane.b32.xlu0 %v851_v17, %s961_s21  ;;  %v727_v34 = vld [vmem:[%s1009_s19 + $0x51] sm:$0xff]  ;;  %v886_v37 = vpack.i.bf16 %v732_v33, %v731_v32  ;;  %v1089_v48 = vld [vmem:[%s1009_s19 + $0x60] sm:$0xff]  ;;  %v906_v51 = vpack.i.bf16 %v740_v47, %v1085_v46 }
  0x21   : > { %v728_v35 = vld [vmem:[%s1009_s19 + $0x71] sm:$0xff]  ;;  %v736_v49 = vld [vmem:[%s1009_s19 + $0x80] sm:$0xff] }
  0x22   : > { %867 = vrot.lane.b32.xlu1 %v866_v22, %s961_s21  ;;  %v881_v38 = vpack.i.bf16 %v728_v35, %v727_v34  ;;  %v901_v52 = vpack.i.bf16 %v736_v49, %v1089_v48  ;;  %v748_v56 = vld [vmem:[%s1009_s19 + $0x101] sm:$0xff] }
  0x23   : > { %v926_v57 = vpack.i.bf16 %v748_v56, %v1027_v6  ;;  %v198_v6 = vld [vmem:[%s1009_s19] sm:$0xff] }
  0x24   : > { %862 = vrot.lane.b32.xlu0 %v861_v24, %s961_s21 }
  0x26   : > { %877 = vrot.lane.b32.xlu1 %v876_v30, %s962_s28 }
  0x28   : > { %872 = vrot.lane.b32.xlu0 %v871_v31, %s962_s28 }
  0x2a   : > { %887 = vrot.lane.b32.xlu1 %v886_v37, %s962_s28 }
  0x2c   : > { %882 = vrot.lane.b32.xlu0 %v881_v38, %s962_s28 }
  0x2e   : > { %897 = vrot.lane.b32.xlu1 %v896_v44, %s963_s6 }
  0x30   : > { %892 = vrot.lane.b32.xlu0 %v891_v45, %s963_s6 }
  0x32   : > { %907 = vrot.lane.b32.xlu1 %v906_v51, %s963_s6 }
  0x34   : > { %902 = vrot.lane.b32.xlu0 %v901_v52, %s963_s6 }
  0x36   : > { %917 = vrot.lane.b32.xlu1 %v916_v54, %s964_s7 }
  0x38   : > { %912 = vrot.lane.b32.xlu0 %v911_v55, %s964_s7 }
  0x3a   : > { %927 = vrot.lane.b32.xlu1 %v926_v57, %s964_s7 }
  0x3c   : > { %922 = vrot.lane.b32.xlu0 %v921_v58, %s964_s7 }
  0x88   : > { %v843_v59 = vpop.permute.xlu1 %842 }
  0x89   : > { %v845_v13 = vunpack.i.h.bf16 %v843_v59  ;;  %v844_v14 = vunpack.i.l.bf16 %v843_v59 }
  0x8a   : > { %v833_v60 = vpop.permute.xlu0 %832 }
  0x8b   : > { %v835_v0 = vunpack.i.h.bf16 %v833_v60  ;;  %v834_v4 = vunpack.i.l.bf16 %v833_v60  ;;  %v414_v31 = vsel %vm411_vm1, %v1075_v42, %v844_v14  ;;  %v415_v33 = vsel %vm411_vm1, %v1089_v48, %v845_v13 }
  0x8c   : > { %v848_v61 = vpop.permute.xlu1 %847 }
  0x8d   : > { %v412_v15 = vsel %vm411_vm1, %v198_v6, %v834_v4  ;;  %v413_v16 = vsel %vm411_vm1, %v1072_v41, %v835_v0  ;;  %v850_v18 = vunpack.i.h.bf16 %v848_v61  ;;  %v849_v19 = vunpack.i.l.bf16 %v848_v61 }
  0x8e   : > { %v838_v62 = vpop.permute.xlu0 %837 }
  0x8f   : > { %v840_v7 = vunpack.i.h.bf16 %v838_v62  ;;  %v839_v9 = vunpack.i.l.bf16 %v838_v62  ;;  %v418_v34 = vsel %vm411_vm1, %v1069_v40, %v849_v19  ;;  %v419_v35 = vsel %vm411_vm1, %v1085_v46, %v850_v18 }
  0x90   : > { %v858_v63 = vpop.permute.xlu1 %857 }
  0x91   : > { %v860_v10 = vunpack.i.h.bf16 %v858_v63  ;;  %v859_v1 = vunpack.i.l.bf16 %v858_v63  ;;  %v416_v20 = vsel %vm411_vm1, %v736_v49, %v839_v9  ;;  %v417_v21 = vsel %vm411_vm1, %v1066_v39, %v840_v7 }
  0x92   : > { %v853_v2 = vpop.permute.xlu0 %852 }
  0x93   : > { %v854_v8 = vunpack.i.l.bf16 %v853_v2  ;;  %v855_v11 = vunpack.i.h.bf16 %v853_v2  ;;  %v425_v22 = vsel %vm420_vm2, %v416_v20, %v859_v1  ;;  %v426_v23 = vsel %vm420_vm2, %v417_v21, %v860_v10 }
  0x94   : > { %v1105_v3 = vpop.permute.xlu1 %867  ;;  %v434_v36 = vsel %vm429_vm3, %v425_v22, %v859_v1  ;;  %v435_v37 = vsel %vm429_vm3, %v426_v23, %v860_v10 }
  0x95   : > { %v421_v24 = vsel %vm420_vm2, %v412_v15, %v854_v8  ;;  %v869_v25 = vunpack.i.l.bf16 %v1105_v3  ;;  %v422_v26 = vsel %vm420_vm2, %v413_v16, %v855_v11  ;;  %v870_v27 = vunpack.i.h.bf16 %v1105_v3 }
  0x96   : > { %v1107_v5 = vpop.permute.xlu0 %862  ;;  %v430_v38 = vsel %vm429_vm3, %v421_v24, %v854_v8  ;;  %v431_v39 = vsel %vm429_vm3, %v422_v26, %v855_v11 }
  0x97   : > { %v865_v28 = vunpack.i.h.bf16 %v1107_v5  ;;  %v864_v29 = vunpack.i.l.bf16 %v1107_v5  ;;  %v427_v41 = vsel %vm420_vm2, %v418_v34, %v869_v25  ;;  %v428_v42 = vsel %vm420_vm2, %v419_v35, %v870_v27 }
  0x98   : > { %v878_v12 = vpop.permute.xlu1 %877  ;;  %v436_v51 = vsel %vm429_vm3, %v427_v41, %v869_v25  ;;  %v437_v55 = vsel %vm429_vm3, %v428_v42, %v870_v27 }
  0x99   : > { %v423_v43 = vsel %vm420_vm2, %v414_v31, %v864_v29  ;;  %v424_v44 = vsel %vm420_vm2, %v415_v33, %v865_v28  ;;  %v879_v40 = vunpack.i.l.bf16 %v878_v12  ;;  %v880_v46 = vunpack.i.h.bf16 %v878_v12 }
  0x9a   : > { %v873_v17 = vpop.permute.xlu0 %872  ;;  %v432_v56 = vsel %vm429_vm3, %v423_v43, %v864_v29  ;;  %v433_v59 = vsel %vm429_vm3, %v424_v44, %v865_v28 }
  0x9b   : > { %v875_v47 = vunpack.i.h.bf16 %v873_v17  ;;  %v874_v48 = vunpack.i.l.bf16 %v873_v17  ;;  %v443_v60 = vsel %vm438_vm4, %v434_v36, %v879_v40  ;;  %v444_v2 = vsel %vm438_vm4, %v435_v37, %v880_v46 }
  0x9c   : > { %v888_v30 = vpop.permute.xlu1 %887 }
  0x9d   : > { %v889_v52 = vunpack.i.l.bf16 %v888_v30  ;;  %v890_v57 = vunpack.i.h.bf16 %v888_v30  ;;  %v439_v3 = vsel %vm438_vm4, %v430_v38, %v874_v48  ;;  %v440_v0 = vsel %vm438_vm4, %v431_v39, %v875_v47 }
  0x9e   : > { %v883_v32 = vpop.permute.xlu0 %882 }
  0x9f   : > { %v885_v61 = vunpack.i.h.bf16 %v883_v32  ;;  %v884_v62 = vunpack.i.l.bf16 %v883_v32  ;;  %v445_v6 = vsel %vm438_vm4, %v436_v51, %v889_v52  ;;  %v446_v1 = vsel %vm438_vm4, %v437_v55, %v890_v57  ;;  %v749_v52 = vld [vmem:[%s1206_s2] ss:$0 sm:$0xff] }
  0xa0   : > { %v898_v45 = vpop.permute.xlu1 %897 }
  0xa1   : > { %v899_v49 = vunpack.i.l.bf16 %v898_v45  ;;  %v900_v53 = vunpack.i.h.bf16 %v898_v45  ;;  %v441_v13 = vsel %vm438_vm4, %v432_v56, %v884_v62  ;;  %v442_v14 = vsel %vm438_vm4, %v433_v59, %v885_v61 }
  0xa2   : > { %v893_v50 = vpop.permute.xlu0 %892 }
  0xa3   : > { %v894_v54 = vunpack.i.l.bf16 %v893_v50  ;;  %v895_v58 = vunpack.i.h.bf16 %v893_v50  ;;  %v452_v4 = vsel %vm447_vm5, %v443_v60, %v899_v49  ;;  %v453_v7 = vsel %vm447_vm5, %v444_v2, %v900_v53 }
  0xa4   : > { %v908_v63 = vpop.permute.xlu1 %907  ;;  %v461_v17 = vsel %vm456_vm6, %v452_v4, %v899_v49  ;;  %v462_v22 = vsel %vm456_vm6, %v453_v7, %v900_v53 }
  0xa5   : > { %v448_v9 = vsel %vm447_vm5, %v439_v3, %v894_v54  ;;  %v909_v10 = vunpack.i.l.bf16 %v908_v63  ;;  %v449_v8 = vsel %vm447_vm5, %v440_v0, %v895_v58  ;;  %v910_v11 = vunpack.i.h.bf16 %v908_v63 }
  0xa6   : > { %v903_v5 = vpop.permute.xlu0 %902  ;;  %v457_v21 = vsel %vm456_vm6, %v448_v9, %v894_v54  ;;  %v458_v26 = vsel %vm456_vm6, %v449_v8, %v895_v58 }
  0xa7   : > { %v904_v12 = vunpack.i.l.bf16 %v903_v5  ;;  %v905_v15 = vunpack.i.h.bf16 %v903_v5  ;;  %v454_v23 = vsel %vm447_vm5, %v445_v6, %v909_v10  ;;  %v455_v27 = vsel %vm447_vm5, %v446_v1, %v910_v11 }
  0xa8   : > { %v918_v16 = vpop.permute.xlu1 %917  ;;  %v463_v41 = vsel %vm456_vm6, %v454_v23, %v909_v10  ;;  %v464_v42 = vsel %vm456_vm6, %v455_v27, %v910_v11 }
  0xa9   : > { %v920_v18 = vunpack.i.h.bf16 %v918_v16  ;;  %v919_v19 = vunpack.i.l.bf16 %v918_v16  ;;  %v450_v28 = vsel %vm447_vm5, %v441_v13, %v904_v12  ;;  %v451_v31 = vsel %vm447_vm5, %v442_v14, %v905_v15 }
  0xaa   : > { %v913_v20 = vpop.permute.xlu0 %912  ;;  %v459_v40 = vsel %vm456_vm6, %v450_v28, %v904_v12  ;;  %v460_v45 = vsel %vm456_vm6, %v451_v31, %v905_v15 }
  0xab   : > { %v915_v24 = vunpack.i.h.bf16 %v913_v20  ;;  %v914_v25 = vunpack.i.l.bf16 %v913_v20  ;;  %v470_v29 = vsel %vm465_vm7, %v461_v17, %v919_v19  ;;  %v471_v30 = vsel %vm465_vm7, %v462_v22, %v920_v18 }
  0xac   : > { %v928_v32 = vpop.permute.xlu1 %927  ;;  %v476_v35 = vpack.c.bf16 %v471_v30, %v470_v29 }
  0xad   : > { %v466_v33 = vsel %vm465_vm7, %v457_v21, %v914_v25  ;;  %v467_v34 = vsel %vm465_vm7, %v458_v26, %v915_v24  ;;  %v930_v36 = vunpack.i.h.bf16 %v928_v32  ;;  %v929_v37 = vunpack.i.l.bf16 %v928_v32 }
  0xae   : > { %v923_v38 = vpop.permute.xlu0 %922  ;;  %v474_v39 = vpack.c.bf16 %v467_v34, %v466_v33  ;;  %785 = vmatprep.mubr.msk.bf16.mxu1 %vm521_vm8, %v476_v35 }
  0xaf   : > { %v925_v43 = vunpack.i.h.bf16 %v923_v38  ;;  %v924_v44 = vunpack.i.l.bf16 %v923_v38  ;;  %v472_v46 = vsel %vm465_vm7, %v463_v41, %v929_v37  ;;  %v473_v47 = vsel %vm465_vm7, %v464_v42, %v930_v36 }
  0xb0   : > { %781 = vmatprep.mubr.msk.bf16.mxu0 %vm521_vm8, %v474_v39  ;;  %v477_v48 = vpack.c.bf16 %v473_v47, %v472_v46 }
  0xb1   : > { %v468_v49 = vsel %vm465_vm7, %v459_v40, %v924_v44  ;;  %v469_v50 = vsel %vm465_vm7, %v460_v45, %v925_v43 }
  0xb2   : > { %v475_v51 = vpack.c.bf16 %v469_v50, %v468_v49  ;;  %786 = vmatmul.mubr.msk.bf16.vlgmr.msra.gmra.mrb[0].mxu1 %vm521_vm8, %v477_v48 }
  0xb4   : > { %782 = vmatmul.mubr.msk.bf16.vlgmr.msra.gmra.mrb[0].mxu0 %vm521_vm8, %v475_v51 }
 0x185   : > { %v787_v53 = vpop.f32.mrb[0].mxu1 }
 0x186   : > { %v597_v55 = vadd.f32 %v787_v53, %v749_v52  ;;  %v588_v56 = vpop.f32.mrb[1].mxu1 }
 0x187   : > { %v783_v54 = vpop.f32.mrb[0].mxu0  ;;  %v589_v59 = vadd.f32 %v749_v52, %v588_v56  ;;  %v788_v60 = vpop.f32.mrb[2].mxu1 }
 0x188   : > { %v581_v57 = vadd.f32 %v783_v54, %v749_v52  ;;  %v572_v58 = vpop.f32.mrb[1].mxu0  ;;  %v609_v61 = vmax.f32 %v597_v55, 0.0  ;;  %v600_v2 = vadd.f32 %v788_v60, %v749_v52  ;;  %v591_v3 = vpop.f32.mrb[3].mxu1 }
 0x189   : > { %v573_v62 = vadd.f32 %v749_v52, %v572_v58  ;;  %v784_v63 = vpop.f32.mrb[2].mxu0  ;;  %v607_v4 = vmax.f32 %v589_v59, 0.0  ;;  %v592_v7 = vadd.f32 %v749_v52, %v591_v3 }
 0x18a   : > { %v605_v0 = vmax.f32 %v581_v57, 0.0  ;;  %v584_v5 = vadd.f32 %v784_v63, %v749_v52  ;;  %v575_v6 = vpop.f32.mrb[3].mxu0  ;;  %617 = vst.msk [vmem:[%s192_s17 + $0x30] sm:$0xff] %vm411_vm1, %v609_v61  ;;  %v610_v10 = vmax.f32 %v600_v2, 0.0 }
 0x18b   : > { %v603_v9 = vmax.f32 %v573_v62, 0.0  ;;  %v576_v1 = vadd.f32 %v749_v52, %v575_v6  ;;  %615 = vst.msk [vmem:[%s192_s17 + $0x20] sm:$0xff] %vm411_vm1, %v607_v4  ;;  %v608_v11 = vmax.f32 %v592_v7, 0.0 }
 0x18c   : > { %613 = vst.msk [vmem:[%s192_s17 + $0x10] sm:$0xff] %vm411_vm1, %v605_v0  ;;  %v606_v8 = vmax.f32 %v584_v5, 0.0  ;;  %618 = vst.msk [vmem:[%s192_s17 + $0x38] sm:$0xff] %vm411_vm1, %v610_v10 }
 0x18d   : > { %611 = vst.msk [vmem:[%s192_s17] sm:$0xff] %vm411_vm1, %v603_v9  ;;  %v604_v12 = vmax.f32 %v576_v1, 0.0  ;;  %616 = vst.msk [vmem:[%s192_s17 + $0x28] sm:$0xff] %vm411_vm1, %v608_v11 }
 0x18e   : > { %614 = vst.msk [vmem:[%s192_s17 + $0x18] sm:$0xff] %vm411_vm1, %v606_v8 }
 0x18f   : > { %612 = vst.msk [vmem:[%s192_s17 + $0x8] sm:$0xff] %vm411_vm1, %v604_v12 }
 0x190 PF: > { %s13_s14 = sadd.s32 1, %s958_s14   ;;  %s1208_s12 = smov %s954_s13 }
 0x191   : > { %p10_p5 = scmp.ge.s32.totalorder %s13_s14, 4   ;;  %s1209_s13 = smov %s1211_s15 }
 0x193   :  { %12 = sbr.rel (!%p10_p5) target bundleno = 2 (0x2), region = 65 }

// kernel: _forward_impl.5
= control target key start
LH: loop header
LB: loop body
LE: loop exit
PB: predicated region body
PF: predicated region fallthrough
CT: control target
= control target key end

     0   :  { %8 = vsyncpa [#allocation3], 0  ;;  %s976_s0 = inlined_call_operand.vmem [shape: f32[2,5,2,5,32], index: 0, kind: input, shape index: {}]   ;;  %s977_s1 = inlined_call_operand.vmem [shape: bf16[144,32], index: 1, kind: input, shape index: {}]   ;;  %s978_s2 = inlined_call_operand.vmem [shape: f32[1,32], index: 2, kind: input, shape index: {}]   ;;  %s979_s3 = inlined_call_operand.hbm [shape: f32[2,16,32], index: 3, kind: output, shape index: {}]  }
   0x1   :  { %10 = vsyncpa [#allocation3 + $0x1], 0  ;;  %s785_s12 = smov 0   ;;  %s787_s13 = smov 0  }
   0x2   :  { %s789_s14 = smov 0   ;;  %s791_s15 = smov 0  }
   0x3   :  { %s793_s16 = smov 0   ;;  %s795_s17 = smov 0  }
   0x4 LB: > { %s559_s18 = sadd.s32 4294967295, %s755_s17   ;;  %s560_s19 = sadd.s32 4294967294, %s755_s17   ;;  %s755_s17 = sphi %s795_s17, %s16_s17   ;;  %s751_s16 = sphi %s793_s16, %s986_s16   ;;  %s747_s15 = sphi %s791_s15, %s985_s15   ;;  %s743_s14 = sphi %s789_s14, %s984_s14   ;;  %s739_s13 = sphi %s787_s13, %s983_s13   ;;  %s735_s12 = sphi %s785_s12, %s982_s12  }
   0x5   : > { %s28_s20 = sadd.s32 1, %s751_s16  ;;  %s105_s21 = sadd.s32 1, %s743_s14 }
   0x6   : > { %p30_p0 = scmp.ge.s32.totalorder %s28_s20, 2  ;;  %p115_p1 = scmp.ne.s32.totalorder %s743_s14, %s739_s13 }
   0x7   : > { %p116_p2 = scmp.eq.s32.totalorder %s559_s18, 1  ;;  %p121_p3 = scmp.ne.s32.totalorder %s739_s13, %s735_s12 }
   0x8   : > { %s988_s20 = smov (%p30_p0, %s28_s20), 0  ;;  %p122_p5 = scmp.eq.s32.totalorder %s560_s19, 1 }
   0x9   : > { %p825_p4 = por %p116_p2, %p115_p1  ;;  %s100_s23 = ssub.s32 %s751_s16, %s988_s20 }
   0xa   : > { %p563_p6 = scmp.ge.s32.totalorder %s755_s17, 1  ;;  %p103_p7 = scmp.eq.s32.totalorder %s100_s23, 0 }
   0xb   : > { %p832_p8 = por %p122_p5, %p121_p3  ;;  %p154_p9 = scmp.lt.s32.totalorder %s755_s17, 3 }
   0xc   : > { %s838_s25 = scalar_select %p103_p7, %s743_s14, %s105_s21  }
   0xd   : > { %p155_p10 = pnand %p563_p6, %p154_p9 }
   0xe   : > { %p178_p11 = scmp.lt.s32.totalorder (!%p155_p10), %s747_s15, 1  ;;  %v666_v0 = vld [vmem:[%s977_s1] sm:$0xff] (!%p155_p10)   ;;  %v757_v1 = vmov (!%p155_p10), 0   ;;  %v667_v2 = vld [vmem:[%s977_s1 + $0x8] sm:$0xff] (!%p155_p10)   ;;  %v668_v3 = vld [vmem:[%s977_s1 + $0x10] sm:$0xff] (!%p155_p10)   ;;  %s758_s10 = smov (!%p155_p10), 32  }
   0xf   : > { %158 = sbr.rel (%p155_p10) target bundleno = 411 (0x19b), region = 32  ;;  %416 = vmatprep.subr.bf16.mxu0 (!%p155_p10), %v757_v1  ;;  %v669_v8 = vld [vmem:[%s977_s1 + $0x18] sm:$0xff] (!%p155_p10)   ;;  %v670_v11 = vld [vmem:[%s977_s1 + $0x20] sm:$0xff] (!%p155_p10)   ;;  %s759_s23 = smov (!%p155_p10), 48   ;;  %v671_v14 = vld [vmem:[%s977_s1 + $0x28] sm:$0xff] (!%p155_p10)   ;;  %vm281_vm0 = vcmask (!%p155_p10), 130048  }
  0x10   : > { %417 = vmatpush1.bf16.msra.mxu0 (!%p155_p10), %v666_v0  ;;  %v672_v17 = vld [vmem:[%s977_s1 + $0x30] sm:$0xff] (!%p155_p10)   ;;  %s760_s30 = smov (!%p155_p10), 80   ;;  %v673_v22 = vld [vmem:[%s977_s1 + $0x38] sm:$0xff] (!%p155_p10)   ;;  %v674_v26 = vld [vmem:[%s977_s1 + $0x40] sm:$0xff] (!%p155_p10)   ;;  %s761_s8 = smov (!%p155_p10), 96   ;;  %vm282_vm1 = vcmask (!%p155_p10), 261120  }
  0x11   : > { %418 = vmatprep.subr.bf16.mxu0 (!%p155_p10), %v757_v1  ;;  %vm287_vm2 = vcmask (!%p155_p10), 392192   ;;  %vm292_vm3 = vcmask (!%p155_p10), 523264   ;;  %vm297_vm4 = vcmask (!%p155_p10), 654336   ;;  %vm302_vm5 = vcmask (!%p155_p10), 785408  }
  0x12   : > { %vm307_vm6 = vcmask (!%p155_p10), 916480  }
  0x14   : > { %419 = vmatpush1.bf16.msra.mxu0 (!%p155_p10), %v667_v2 }
  0x15   : > { %420 = vmatprep.subr.bf16.mxu0 (!%p155_p10), %v757_v1 }
  0x16   : > { %s179_s28 = scalar_select %p178_p11, %s747_s15, 1 }
  0x18   : > { %s603_s4 = smul.u32 80, %s179_s28  ;;  %421 = vmatpush1.bf16.msra.mxu0 %v668_v3 }
  0x19   : > { %422 = vmatprep.subr.bf16.mxu0 %v757_v1 }
  0x1a   : > { %s854_s9 = scalar_lea.vmem %s976_s0, %s603_s4 }
  0x1b   : > { %v194_v4 = vld [vmem:[%s854_s9 + $0x21] sm:$0xf]  ;;  %v195_v6 = vld [vmem:[%s854_s9 + $0x31] sm:$0xf]  ;;  %v567_v9 = vld [vmem:[%s854_s9 + $0x18] sm:$0xf] }
  0x1c   : > { %v192_v5 = vld [vmem:[%s854_s9 + $0x1] sm:$0xf]  ;;  %225 = vrot.lane.b32.xlu1 %v194_v4, %s758_s10  ;;  %v193_v7 = vld [vmem:[%s854_s9 + $0x11] sm:$0xf]  ;;  %v566_v10 = vld [vmem:[%s854_s9 + $0x8] sm:$0xf]  ;;  %423 = vmatpush1.bf16.msra.mxu0 %v669_v8 }
  0x1d   : > { %221 = vrot.lane.b32.xlu0 %v192_v5, %s758_s10  ;;  %v569_v12 = vld [vmem:[%s854_s9 + $0x38] sm:$0xf]  ;;  %v568_v13 = vld [vmem:[%s854_s9 + $0x28] sm:$0xf]  ;;  %424 = vmatprep.subr.bf16.mxu0 %v757_v1  ;;  %v675_v18 = vld [vmem:[%s854_s9 + $0x11] ss:$16 sps:$4 sm:$0xff]  }
  0x1e   : > { %v571_v15 = vld [vmem:[%s854_s9 + $0x19] sm:$0xf]  ;;  %v570_v16 = vld [vmem:[%s854_s9 + $0x9] sm:$0xf]  ;;  %v676_v21 = vld [vmem:[%s854_s9 + $0x31] ss:$16 sps:$4 sm:$0xff]  }
  0x1f   : > { %v573_v19 = vld [vmem:[%s854_s9 + $0x39] sm:$0xf]  ;;  %v572_v20 = vld [vmem:[%s854_s9 + $0x29] sm:$0xf]  ;;  %v333_v23 = vpack.c.bf16 %v676_v21, %v675_v18  ;;  %v575_v24 = vld [vmem:[%s854_s9 + $0x20] sm:$0xf] }
  0x20   : > { %227 = vrot.lane.b32.xlu1 %v195_v6, %s758_s10  ;;  %425 = vmatpush1.bf16.msra.mxu0 %v670_v11  ;;  %v574_v25 = vld [vmem:[%s854_s9 + $0x10] sm:$0xf]  ;;  %v577_v27 = vld [vmem:[%s854_s9 + $0x40] sm:$0xf] }
  0x21   : > { %223 = vrot.lane.b32.xlu0 %v193_v7, %s758_s10  ;;  %426 = vmatprep.subr.bf16.mxu0 %v757_v1  ;;  %v576_v28 = vld [vmem:[%s854_s9 + $0x30] sm:$0xf]  ;;  %v188_v37 = vld [vmem:[%s854_s9] sm:$0xf] }
  0x22   : > { %596 = vmatprep.mubr.msk.bf16.mxu0 %vm281_vm0, %v333_v23  ;;  %v189_v38 = vld [vmem:[%s854_s9 + $0x10] sm:$0xf]  ;;  %v190_v43 = vld [vmem:[%s854_s9 + $0x20] sm:$0xf] }
  0x23   : > { %v191_v44 = vld [vmem:[%s854_s9 + $0x30] sm:$0xf]  ;;  %s175_s9 = sand.u32 1, %s739_s13  }
  0x24   : > { %239 = vrot.lane.b32.xlu1 %v567_v9, %s759_s23  ;;  %427 = vmatpush1.bf16.msra.mxu0 %v671_v14  ;;  %s564_s10 = sshll.u32 %s175_s9, 4 }
  0x25   : > { %237 = vrot.lane.b32.xlu0 %v566_v10, %s759_s23  ;;  %428 = vmatprep.subr.bf16.mxu0 %v757_v1  ;;  %s177_s19 = scalar_lea.vmem [#allocation2], %s564_s10 }
  0x26   : > { %s477_s21 = sshll.u32 %s177_s19, 4  ;;  %s921_s21 = int_to_ptr.vmem [resolvable:$true] %s477_s21 }
  0x27   : > { %s677_s29 = scalar_lea.vmem %s921_s21, 256 }
  0x28   : > { %243 = vrot.lane.b32.xlu1 %v569_v12, %s759_s23  ;;  %429 = vmatpush1.bf16.msra.mxu0 %v672_v17  ;;  %v586_v12 = vld [vmem:[%s978_s2] ss:$0 sm:$0xff]  ;;  %p678_p12 = scmp.ne.s32.totalorder %s921_s21, %s677_s29 }
  0x29   : > { %241 = vrot.lane.b32.xlu0 %v568_v13, %s759_s23  ;;  %430 = vmatprep.subr.bf16.mxu0 %v757_v1  ;;  %s602_s23 = sshll.u32 %s747_s15, 8  ;;  %s930_s15 = scalar_lea.sflag [#allocation3], %s175_s9 }
  0x2a   : > { %s926_s28 = scalar_lea.hbm %s979_s3, %s602_s23  ;;  %p679_p13 = pnand %p678_p12, %p825_p4 }
  0x2c   : > { %255 = vrot.lane.b32.xlu1 %v571_v15, %s760_s30  ;;  %431 = vmatpush1.bf16.msra.mxu0 %v673_v22  ;;  %p680_p0 = pneg %p679_p13 }
  0x2d   : > { %253 = vrot.lane.b32.xlu0 %v570_v16, %s760_s30  ;;  %432 = vmatprep.subr.bf16.mxu0 %v757_v1 }
  0x30   : > { %259 = vrot.lane.b32.xlu1 %v573_v19, %s760_s30  ;;  %433 = vmatpush1.bf16.msra.mxu0 %v674_v26 }
  0x31   : > { %257 = vrot.lane.b32.xlu0 %v572_v20, %s760_s30  ;;  %s762_s30 = smov [#allocation2]  }
  0x32   : > { %s681_s4 = sshll.u32 %s762_s30, 4  ;;  %s682_s4 = int_to_ptr.vmem [resolvable:$false] %s681_s4 }
  0x33   : > { %s683_s5 = scalar_lea.vmem %s682_s4, 512  ;;  %p684_p1 = scmp.lt.s32.totalorder %s921_s21, %s682_s4 }
  0x34   : > { %271 = vrot.lane.b32.xlu1 %v575_v24, %s761_s8  ;;  %p685_p2 = scmp.lt.s32.totalorder %s683_s5, %s677_s29 }
  0x35   : > { %269 = vrot.lane.b32.xlu0 %v574_v25, %s761_s8 }
  0x36   : > { %p686_p3 = por %p685_p2, %p684_p1 }
  0x38   : > { %275 = vrot.lane.b32.xlu1 %v577_v27, %s761_s8  ;;  %p687_p5 = pnand %p686_p3, %p680_p0 }
  0x39   : > { %273 = vrot.lane.b32.xlu0 %v576_v28, %s761_s8 }
  0x8e   : > { %v226_v29 = vpop.permute.xlu1 %225 }
  0x8f   : > { %v222_v30 = vpop.permute.xlu0 %221  ;;  %v285_v49 = vsel %vm282_vm1, %v190_v43, %v226_v29 }
  0x90   : > { %v283_v41 = vsel %vm282_vm1, %v188_v37, %v222_v30 }
  0x92   : > { %v228_v31 = vpop.permute.xlu1 %227 }
  0x93   : > { %v224_v32 = vpop.permute.xlu0 %223  ;;  %v286_v50 = vsel %vm282_vm1, %v191_v44, %v228_v31 }
  0x94   : > { %v284_v42 = vsel %vm282_vm1, %v189_v38, %v224_v32 }
  0x96   : > { %v240_v33 = vpop.permute.xlu1 %239 }
  0x97   : > { %v238_v34 = vpop.permute.xlu0 %237  ;;  %v289_v45 = vsel %vm287_vm2, %v284_v42, %v240_v33 }
  0x98   : > { %v288_v46 = vsel %vm287_vm2, %v283_v41, %v238_v34  ;;  %v294_v51 = vsel %vm292_vm3, %v289_v45, %v240_v33 }
  0x99   : > { %v293_v52 = vsel %vm292_vm3, %v288_v46, %v238_v34 }
  0x9a   : > { %v244_v35 = vpop.permute.xlu1 %243 }
  0x9b   : > { %v242_v36 = vpop.permute.xlu0 %241  ;;  %v291_v53 = vsel %vm287_vm2, %v286_v50, %v244_v35 }
  0x9c   : > { %v290_v54 = vsel %vm287_vm2, %v285_v49, %v242_v36  ;;  %v296_v61 = vsel %vm292_vm3, %v291_v53, %v244_v35 }
  0x9d   : > { %v295_v62 = vsel %vm292_vm3, %v290_v54, %v242_v36 }
  0x9e   : > { %v256_v39 = vpop.permute.xlu1 %255 }
  0x9f   : > { %v254_v40 = vpop.permute.xlu0 %253  ;;  %v299_v55 = vsel %vm297_vm4, %v294_v51, %v256_v39 }
  0xa0   : > { %v298_v56 = vsel %vm297_vm4, %v293_v52, %v254_v40 }
  0xa2   : > { %v260_v47 = vpop.permute.xlu1 %259 }
  0xa3   : > { %v258_v48 = vpop.permute.xlu0 %257  ;;  %v301_v63 = vsel %vm297_vm4, %v296_v61, %v260_v47 }
  0xa4   : > { %v300_v0 = vsel %vm297_vm4, %v295_v62, %v258_v48 }
  0xa6   : > { %v272_v57 = vpop.permute.xlu1 %271 }
  0xa7   : > { %v270_v58 = vpop.permute.xlu0 %269  ;;  %v304_v59 = vsel %vm302_vm5, %v299_v55, %v272_v57 }
  0xa8   : > { %v303_v60 = vsel %vm302_vm5, %v298_v56, %v270_v58  ;;  %v309_v1 = vsel %vm307_vm6, %v304_v59, %v272_v57 }
  0xa9   : > { %v308_v2 = vsel %vm307_vm6, %v303_v60, %v270_v58 }
  0xaa   : > { %v276_v3 = vpop.permute.xlu1 %275  ;;  %v582_v9 = vcombine.low %v308_v2, %v309_v1 }
  0xab   : > { %v274_v4 = vpop.permute.xlu0 %273  ;;  %v306_v5 = vsel %vm302_vm5, %v301_v63, %v276_v3 }
  0xac   : > { %v305_v6 = vsel %vm302_vm5, %v300_v0, %v274_v4  ;;  %v311_v7 = vsel %vm307_vm6, %v306_v5, %v276_v3 }
  0xad   : > { %v310_v8 = vsel %vm307_vm6, %v305_v6, %v274_v4 }
  0xae   : > { %v584_v10 = vcombine.low %v310_v8, %v311_v7 }
  0xb0   : > { %v332_v11 = vpack.c.bf16 %v584_v10, %v582_v9 }
  0xb2   : > { %449 = vmatmul.mubr.bf16.vlgmr.msra.gmra.mrb[0].mxu0 %v332_v11 }
 0x185   : > { %v450_v13 = vpop.f32.mrb[0].mxu0 }
 0x186   : > { %v451_v14 = vadd.f32 %v586_v12, %v450_v13  ;;  %v452_v15 = vpop.f32.mrb[1].mxu0 }
 0x187   : > { %v453_v16 = vpop.f32.mrb[2].mxu0 }
 0x188   : > { %v457_v17 = vmax.f32 %v451_v14, 0.0  ;;  %v454_v18 = vadd.f32 %v586_v12, %v453_v16  ;;  %v455_v19 = vpop.f32.mrb[3].mxu0 }
 0x18a   : > { %459 = vst.msk [vmem:[%s177_s19] sm:$0xff] %vm282_vm1, %v457_v17  ;;  %v458_v20 = vmax.f32 %v454_v18, 0.0 }
 0x18c   : > { %460 = vst.msk [vmem:[%s177_s19 + $0x8] sm:$0xff] %vm282_vm1, %v458_v20 }
 0x18d   : > { %690 = shalt.err (!%p687_p5)
}
 0x18e   : > { %s691_s6 = scalar_lea.hbm %s926_s28, 256  ;;  %s695_s9 = scalar_lea.hbm %s979_s3, 512 }
 0x18f   : > { %p692_p6 = scmp.ne.s32.totalorder %s926_s28, %s691_s6  ;;  %p696_p10 = scmp.lt.u32.totalorder %s926_s28, %s979_s3 }
 0x190   : > { %p697_p11 = scmp.lt.u32.totalorder %s695_s9, %s691_s6  ;;  %p699_p13 = scmp.lt.u32.totalorder %s691_s6, %s926_s28 }
 0x191   : > { %p693_p7 = pnand %p692_p6, %p825_p4 }
 0x192   : > { %p698_p12 = por %p697_p11, %p696_p10 }
 0x193   : > { %p694_p9 = pneg %p693_p7 }
 0x194   : > { %p700_p0 = por %p699_p13, %p698_p12 }
 0x196   : > { %p701_p1 = pnand %p700_p0, %p694_p9 }
 0x198   : > { %704 = shalt.err (!%p701_p1)
}
 0x199   : > { %s763_s18 = smov 128   ;;  %s764_s19 = smov 8  }
 0x19a   : > { %604 = dma.vmem_to_hbm [thread:$0]  (%p825_p4), %s921_s21, 256, %s926_s28, %s930_s15, %s763_s18, %s763_s18, %s764_s19  }
 0x19b PF: > { %p610_p2 = scmp.ge.s32.totalorder %s755_s17, 2  ;;  %s492_s23 = sand.u32 1, %s735_s12  }
 0x19c   : > { %s493_s26 = scalar_lea.sflag [#allocation3], %s492_s23 }
 0x19d   : > { %p607_p3 = pnand %p610_p2, %p832_p8 }
 0x19f   : > { %730 = dma.done.wait (!%p607_p3), %s493_s26, 256  }
 0x1a0   : > { %732 = vsyncadd (!%p607_p3), %s493_s26, 4294967040  ;;  %s16_s17 = sadd.s32 1, %s755_s17   ;;  %s982_s12 = smov %s739_s13 }
 0x1a1   : > { %p13_p5 = scmp.ge.s32.totalorder %s16_s17, 4   ;;  %s983_s13 = smov %s743_s14 }
 0x1a2   : > { %s984_s14 = smov %s838_s25  ;;  %s985_s15 = smov %s751_s16 }
 0x1a3   : > { %s986_s16 = smov %s988_s20  ;;  %15 = sbr.rel (!%p13_p5) target bundleno = 4 (0x4), region = 70 }
 0x1aa   :  { %498 = vsyncpa [#allocation3], 1 }
 0x1ab   :  { %500 = vsyncpa [#allocation3 + $0x1], 1 }

// kernel: _forward_impl.3
= control target key start
LH: loop header
LB: loop body
LE: loop exit
PB: predicated region body
PF: predicated region fallthrough
CT: control target
= control target key end

     0   :  { %s3214_s12 = smov 0   ;;  %s3216_s13 = smov 0   ;;  %s4570_s0 = inlined_call_operand.vmem [shape: f32[2,18,1,18,4], index: 0, kind: input, shape index: {}]   ;;  %s4571_s1 = inlined_call_operand.vmem [shape: bf16[36,8], index: 1, kind: input, shape index: {}]   ;;  %s4572_s2 = inlined_call_operand.vmem [shape: f32[1,8], index: 2, kind: input, shape index: {}]   ;;  %s4573_s3 = inlined_call_operand.vmem [shape: f32[2,256,8], index: 3, kind: output, shape index: {}]  }
   0x1   :  { %s3218_s14 = smov 0  }
   0x2 LB: > { %s25_s15 = sadd.s32 1, %s3180_s13  ;;  %p2196_p0 = scmp.ge.s32.totalorder %s3184_s14, 1  ;;  %s3184_s14 = sphi %s3218_s14, %s13_s14   ;;  %s3180_s13 = sphi %s3216_s13, %s4658_s13   ;;  %s3176_s12 = sphi %s3214_s12, %s4657_s12  }
   0x3   : > { %p27_p1 = scmp.ge.s32.totalorder %s25_s15, 2  ;;  %p151_p2 = scmp.lt.s32.totalorder %s3184_s14, 3 }
   0x5   : > { %s4660_s15 = smov (%p27_p1, %s25_s15), 0  ;;  %p152_p3 = pnand %p2196_p0, %p151_p2 }
   0x7   : > { %155 = sbr.rel (%p152_p3) target bundleno = 616 (0x268), region = 32 }
   0xe   : > { %p179_p4 = scmp.lt.s32.totalorder %s3176_s12, 1  ;;  %s3186_s20 = smov 4   ;;  %vm1872_vm0 = vcmask 1041408   ;;  %vm1516_vm1 = vcmask 31744   ;;  %vm1549_vm2 = vcmask 64512   ;;  %vm1582_vm3 = vcmask 97280  }
   0xf   : > { %s3187_s21 = smov 8   ;;  %s3188_s22 = smov 12   ;;  %vm1615_vm4 = vcmask 130048   ;;  %vm1648_vm5 = vcmask 162816   ;;  %vm1681_vm6 = vcmask 195584   ;;  %vm1714_vm7 = vcmask 228352  }
  0x10   : > { %s4662_s12 = smov (!%p179_p4, %s3176_s12), 1  ;;  %s3189_s23 = smov 16   ;;  %vm1747_vm8 = vcmask 261120   ;;  %vm1823_vm9 = vcmask 293888  }
  0x11   : > { %s2480_s16 = smul.u32 432, %s4662_s12  ;;  %s3190_s24 = smov 20  }
  0x12   : > { %s3191_s27 = smov 24   ;;  %s3192_s5 = smov 28  }
  0x13   : > { %s3238_s19 = scalar_lea.vmem %s4570_s0, %s2480_s16  ;;  %s3193_s6 = smov 32  }
  0x14   : > { %v234_v0 = vld [vmem:[%s3238_s19 + $0x31] sm:$0xff]  ;;  %v235_v1 = vld [vmem:[%s3238_s19 + $0x39] sm:$0xff]  ;;  %v230_v2 = vld [vmem:[%s3238_s19 + $0x1] sm:$0xff]  ;;  %s2414_s9 = sshll.u32 %s4662_s12, 8 }
  0x15   : > { %v3243_v3 = vpack.i.bf16 %v235_v1, %v234_v0  ;;  %v231_v4 = vld [vmem:[%s3238_s19 + $0x9] sm:$0xff]  ;;  %v237_v6 = vld [vmem:[%s3238_s19 + $0x51] sm:$0xff]  ;;  %v232_v8 = vld [vmem:[%s3238_s19 + $0x19] sm:$0xff]  ;;  %s4464_s16 = scalar_lea.vmem %s4573_s3, %s2414_s9 }
  0x16   : > { %v236_v5 = vld [vmem:[%s3238_s19 + $0x49] sm:$0xff]  ;;  %v2513_v7 = vpack.i.bf16 %v231_v4, %v230_v2  ;;  %v233_v9 = vld [vmem:[%s3238_s19 + $0x21] sm:$0xff]  ;;  %v240_v12 = vld [vmem:[%s3238_s19 + $0x79] sm:$0xff] }
  0x17   : > { %2524 = vrot.lane.b32.xlu1 %v3243_v3, %s3186_s20  ;;  %v3252_v10 = vpack.i.bf16 %v237_v6, %v236_v5  ;;  %v3255_v11 = vpack.i.bf16 %v233_v9, %v232_v8  ;;  %v241_v13 = vld [vmem:[%s3238_s19 + $0x81] sm:$0xff]  ;;  %v239_v15 = vld [vmem:[%s3238_s19 + $0x69] sm:$0xff]  ;;  %v245_v19 = vld [vmem:[%s3238_s19 + $0xb1] sm:$0xff] }
  0x18   : > { %2514 = vrot.lane.b32.xlu0 %v2513_v7, %s3186_s20  ;;  %v238_v14 = vld [vmem:[%s3238_s19 + $0x61] sm:$0xff]  ;;  %v3263_v16 = vpack.i.bf16 %v241_v13, %v240_v12  ;;  %v244_v18 = vld [vmem:[%s3238_s19 + $0xa9] sm:$0xff]  ;;  %v242_v20 = vld [vmem:[%s3238_s19 + $0x91] sm:$0xff] }
  0x19   : > { %v3267_v17 = vpack.i.bf16 %v239_v15, %v238_v14  ;;  %v243_v21 = vld [vmem:[%s3238_s19 + $0x99] sm:$0xff]  ;;  %v2548_v22 = vpack.i.bf16 %v245_v19, %v244_v18  ;;  %v249_v25 = vld [vmem:[%s3238_s19 + $0xe1] sm:$0xff]  ;;  %v247_v27 = vld [vmem:[%s3238_s19 + $0xc9] sm:$0xff] }
  0x1a   : > { %v2543_v23 = vpack.i.bf16 %v243_v21, %v242_v20  ;;  %v248_v24 = vld [vmem:[%s3238_s19 + $0xd9] sm:$0xff]  ;;  %v246_v26 = vld [vmem:[%s3238_s19 + $0xc1] sm:$0xff]  ;;  %v252_v30 = vld [vmem:[%s3238_s19 + $0x109] sm:$0xff] }
  0x1b   : > { %2529 = vrot.lane.b32.xlu1 %v3252_v10, %s3186_s20  ;;  %v3282_v28 = vpack.i.bf16 %v249_v25, %v248_v24  ;;  %v2553_v29 = vpack.i.bf16 %v247_v27, %v246_v26  ;;  %v253_v31 = vld [vmem:[%s3238_s19 + $0x111] sm:$0xff]  ;;  %v251_v33 = vld [vmem:[%s3238_s19 + $0xf9] sm:$0xff]  ;;  %v257_v37 = vld [vmem:[%s3238_s19 + $0x141] sm:$0xff] }
  0x1c   : > { %2519 = vrot.lane.b32.xlu0 %v3255_v11, %s3186_s20  ;;  %v250_v32 = vld [vmem:[%s3238_s19 + $0xf1] sm:$0xff]  ;;  %v3291_v34 = vpack.i.bf16 %v253_v31, %v252_v30  ;;  %v256_v36 = vld [vmem:[%s3238_s19 + $0x139] sm:$0xff]  ;;  %v254_v38 = vld [vmem:[%s3238_s19 + $0x121] sm:$0xff] }
  0x1d   : > { %v3294_v35 = vpack.i.bf16 %v251_v33, %v250_v32  ;;  %v255_v39 = vld [vmem:[%s3238_s19 + $0x129] sm:$0xff]  ;;  %v3302_v40 = vpack.i.bf16 %v257_v37, %v256_v36  ;;  %v261_v43 = vld [vmem:[%s3238_s19 + $0x171] sm:$0xff]  ;;  %v259_v45 = vld [vmem:[%s3238_s19 + $0x159] sm:$0xff] }
  0x1e   : > { %v3306_v41 = vpack.i.bf16 %v255_v39, %v254_v38  ;;  %v260_v42 = vld [vmem:[%s3238_s19 + $0x169] sm:$0xff]  ;;  %v258_v44 = vld [vmem:[%s3238_s19 + $0x151] sm:$0xff]  ;;  %v264_v48 = vld [vmem:[%s3238_s19 + $0x1a] sm:$0xff] }
  0x1f   : > { %2539 = vrot.lane.b32.xlu1 %v3263_v16, %s3186_s20  ;;  %v2588_v46 = vpack.i.bf16 %v261_v43, %v260_v42  ;;  %v3316_v47 = vpack.i.bf16 %v259_v45, %v258_v44  ;;  %v265_v49 = vld [vmem:[%s3238_s19 + $0x22] sm:$0xff]  ;;  %v263_v51 = vld [vmem:[%s3238_s19 + $0xa] sm:$0xff]  ;;  %v269_v55 = vld [vmem:[%s3238_s19 + $0x52] sm:$0xff] }
  0x20   : > { %2534 = vrot.lane.b32.xlu0 %v3267_v17, %s3186_s20  ;;  %v262_v50 = vld [vmem:[%s3238_s19 + $0x2] sm:$0xff]  ;;  %v3323_v52 = vpack.i.bf16 %v265_v49, %v264_v48  ;;  %v268_v54 = vld [vmem:[%s3238_s19 + $0x4a] sm:$0xff]  ;;  %v266_v56 = vld [vmem:[%s3238_s19 + $0x32] sm:$0xff] }
  0x21   : > { %v2593_v53 = vpack.i.bf16 %v263_v51, %v262_v50  ;;  %v267_v57 = vld [vmem:[%s3238_s19 + $0x3a] sm:$0xff]  ;;  %v3333_v58 = vpack.i.bf16 %v269_v55, %v268_v54  ;;  %v273_v61 = vld [vmem:[%s3238_s19 + $0x82] sm:$0xff]  ;;  %v271_v63 = vld [vmem:[%s3238_s19 + $0x6a] sm:$0xff] }
  0x22   : > { %v3336_v59 = vpack.i.bf16 %v267_v57, %v266_v56  ;;  %v272_v60 = vld [vmem:[%s3238_s19 + $0x7a] sm:$0xff]  ;;  %v270_v62 = vld [vmem:[%s3238_s19 + $0x62] sm:$0xff]  ;;  %v276_v2 = vld [vmem:[%s3238_s19 + $0xaa] sm:$0xff] }
  0x23   : > { %2549 = vrot.lane.b32.xlu1 %v2548_v22, %s3186_s20  ;;  %v3344_v0 = vpack.i.bf16 %v273_v61, %v272_v60  ;;  %v3348_v1 = vpack.i.bf16 %v271_v63, %v270_v62  ;;  %v277_v4 = vld [vmem:[%s3238_s19 + $0xb2] sm:$0xff]  ;;  %v275_v6 = vld [vmem:[%s3238_s19 + $0x9a] sm:$0xff]  ;;  %v281_v12 = vld [vmem:[%s3238_s19 + $0xe2] sm:$0xff] }
  0x24   : > { %2544 = vrot.lane.b32.xlu0 %v2543_v23, %s3186_s20  ;;  %v274_v5 = vld [vmem:[%s3238_s19 + $0x92] sm:$0xff]  ;;  %v2628_v7 = vpack.i.bf16 %v277_v4, %v276_v2  ;;  %v280_v9 = vld [vmem:[%s3238_s19 + $0xda] sm:$0xff]  ;;  %v278_v13 = vld [vmem:[%s3238_s19 + $0xc2] sm:$0xff] }
  0x25   : > { %v2623_v8 = vpack.i.bf16 %v275_v6, %v274_v5  ;;  %v279_v14 = vld [vmem:[%s3238_s19 + $0xca] sm:$0xff]  ;;  %v3363_v15 = vpack.i.bf16 %v281_v12, %v280_v9  ;;  %v285_v20 = vld [vmem:[%s3238_s19 + $0x112] sm:$0xff]  ;;  %v283_v22 = vld [vmem:[%s3238_s19 + $0xfa] sm:$0xff] }
  0x26   : > { %v2633_v18 = vpack.i.bf16 %v279_v14, %v278_v13  ;;  %v284_v19 = vld [vmem:[%s3238_s19 + $0x10a] sm:$0xff]  ;;  %v282_v21 = vld [vmem:[%s3238_s19 + $0xf2] sm:$0xff]  ;;  %v288_v25 = vld [vmem:[%s3238_s19 + $0x13a] sm:$0xff] }
  0x27   : > { %2559 = vrot.lane.b32.xlu1 %v3282_v28, %s3186_s20  ;;  %v3372_v23 = vpack.i.bf16 %v285_v20, %v284_v19  ;;  %v3375_v24 = vpack.i.bf16 %v283_v22, %v282_v21  ;;  %v289_v26 = vld [vmem:[%s3238_s19 + $0x142] sm:$0xff]  ;;  %v292_v32 = vld [vmem:[%s3238_s19 + $0x16a] sm:$0xff]  ;;  %v293_v33 = vld [vmem:[%s3238_s19 + $0x172] sm:$0xff] }
  0x28   : > { %2554 = vrot.lane.b32.xlu0 %v2553_v29, %s3186_s20  ;;  %v286_v27 = vld [vmem:[%s3238_s19 + $0x122] sm:$0xff]  ;;  %v287_v29 = vld [vmem:[%s3238_s19 + $0x12a] sm:$0xff]  ;;  %v3383_v30 = vpack.i.bf16 %v289_v26, %v288_v25  ;;  %v290_v36 = vld [vmem:[%s3238_s19 + $0x152] sm:$0xff]  ;;  %v2668_v38 = vpack.i.bf16 %v293_v33, %v292_v32 }
  0x29   : > { %v3387_v31 = vpack.i.bf16 %v287_v29, %v286_v27  ;;  %v291_v37 = vld [vmem:[%s3238_s19 + $0x15a] sm:$0xff]  ;;  %v3400_v42 = vld [vmem:[%s3238_s19 + $0x30] sm:$0xff]  ;;  %v3424_v50 = vld [vmem:[%s3238_s19 + $0x68] sm:$0xff] }
  0x2a   : > { %v3397_v39 = vpack.i.bf16 %v291_v37, %v290_v36  ;;  %v3403_v43 = vld [vmem:[%s3238_s19 + $0x38] sm:$0xff]  ;;  %v3409_v45 = vld [vmem:[%s3238_s19 + $0x20] sm:$0xff]  ;;  %v2204_v51 = vld [vmem:[%s3238_s19 + $0x48] sm:$0xff] }
  0x2b   : > { %2569 = vrot.lane.b32.xlu1 %v3291_v34, %s3186_s20  ;;  %v3406_v44 = vld [vmem:[%s3238_s19 + $0x18] sm:$0xff]  ;;  %4590 = vst [vmem:[#allocation3_spill] sm:$0xff] %v3409_v45  ;;  %v3421_v49 = vld [vmem:[%s3238_s19 + $0x60] sm:$0xff]  ;;  %v3438_v56 = vld [vmem:[%s3238_s19 + $0x90] sm:$0xff] }
  0x2c   : > { %2564 = vrot.lane.b32.xlu0 %v3294_v35, %s3186_s20  ;;  %4589 = vst [vmem:[#allocation2_spill] sm:$0xff] %v3406_v44  ;;  %v2673_v48 = vpack.i.bf16 %v3409_v45, %v3406_v44  ;;  %v3432_v54 = vpack.i.bf16 %v3424_v50, %v3421_v49  ;;  %v3441_v57 = vld [vmem:[%s3238_s19 + $0x98] sm:$0xff]  ;;  %v3447_v61 = vld [vmem:[%s3238_s19 + $0x80] sm:$0xff]  ;;  %v3465_v4 = vld [vmem:[%s3238_s19 + $0xc8] sm:$0xff] }
  0x2d   : > { %v3444_v60 = vld [vmem:[%s3238_s19 + $0x78] sm:$0xff]  ;;  %v3453_v62 = vpack.i.bf16 %v3441_v57, %v3438_v56  ;;  %v3462_v2 = vld [vmem:[%s3238_s19 + $0xc0] sm:$0xff]  ;;  %4592 = vst [vmem:[#allocation5_spill] sm:$0xff] %v3465_v4  ;;  %v3468_v5 = vld [vmem:[%s3238_s19 + $0xa8] sm:$0xff] }
  0x2e   : > { %v3459_v63 = vpack.i.bf16 %v3447_v61, %v3444_v60  ;;  %4591 = vst [vmem:[#allocation4_spill] sm:$0xff] %v3462_v2  ;;  %v3471_v6 = vld [vmem:[%s3238_s19 + $0xb0] sm:$0xff]  ;;  %v2219_v12 = vld [vmem:[%s3238_s19 + $0xf8] sm:$0xff]  ;;  %v3489_v14 = vld [vmem:[%s3238_s19 + $0xe0] sm:$0xff] }
  0x2f   : > { %2579 = vrot.lane.b32.xlu1 %v3302_v40, %s3186_s20  ;;  %v2218_v9 = vld [vmem:[%s3238_s19 + $0xf0] sm:$0xff]  ;;  %v3486_v13 = vld [vmem:[%s3238_s19 + $0xd8] sm:$0xff]  ;;  %4594 = vst [vmem:[#allocation7_spill] sm:$0xff] %v3489_v14  ;;  %v3497_v20 = vld [vmem:[%s3238_s19 + $0x120] sm:$0xff] }
  0x30   : > { %2574 = vrot.lane.b32.xlu0 %v3306_v41, %s3186_s20  ;;  %4593 = vst [vmem:[#allocation6_spill] sm:$0xff] %v3486_v13  ;;  %v2713_v19 = vpack.i.bf16 %v3489_v14, %v3486_v13  ;;  %v3500_v21 = vld [vmem:[%s3238_s19 + $0x128] sm:$0xff]  ;;  %v2221_v25 = vld [vmem:[%s3238_s19 + $0x110] sm:$0xff]  ;;  %v3514_v32 = vld [vmem:[%s3238_s19 + $0x158] sm:$0xff] }
  0x31   : > { %v2220_v22 = vld [vmem:[%s3238_s19 + $0x108] sm:$0xff]  ;;  %v3507_v26 = vpack.i.bf16 %v3500_v21, %v3497_v20  ;;  %v3511_v29 = vld [vmem:[%s3238_s19 + $0x150] sm:$0xff]  ;;  %v3517_v33 = vld [vmem:[%s3238_s19 + $0x138] sm:$0xff] }
  0x32   : > { %v2723_v27 = vpack.i.bf16 %v2221_v25, %v2220_v22  ;;  %v3520_v36 = vld [vmem:[%s3238_s19 + $0x140] sm:$0xff]  ;;  %v3526_v37 = vpack.i.bf16 %v3514_v32, %v3511_v29  ;;  %v3155_v22 = vld [vmem:[%s4571_s1 + $0x10] ss:$0 sps:$4 sm:$0x33]  }
  0x33   : > { %2589 = vrot.lane.b32.xlu1 %v2588_v46, %s3186_s20  ;;  %v3414_v46 = vpack.i.bf16 %v3403_v43, %v3400_v42 }
  0x34   : > { %2584 = vrot.lane.b32.xlu0 %v3316_v47, %s3186_s20 }
  0x37   : > { %2599 = vrot.lane.b32.xlu1 %v3323_v52, %s3187_s21 }
  0x38   : > { %2594 = vrot.lane.b32.xlu0 %v2593_v53, %s3187_s21  ;;  %v2205_v53 = vld [vmem:[%s3238_s19 + $0x50] sm:$0xff] }
  0x39   : > { %v3435_v55 = vpack.i.bf16 %v2205_v53, %v2204_v51  ;;  %v2231_v51 = vld [vmem:[%s3238_s19 + $0x188] sm:$0xff] }
  0x3a   : > { %v3536_v53 = vld [vmem:[%s3238_s19 + $0x168] sm:$0xff] }
  0x3b   : > { %2609 = vrot.lane.b32.xlu1 %v3333_v58, %s3187_s21 }
  0x3c   : > { %2604 = vrot.lane.b32.xlu0 %v3336_v59, %s3187_s21 }
  0x3f   : > { %2619 = vrot.lane.b32.xlu1 %v3344_v0, %s3187_s21 }
  0x40   : > { %2614 = vrot.lane.b32.xlu0 %v3348_v1, %s3187_s21 }
  0x43   : > { %2629 = vrot.lane.b32.xlu1 %v2628_v7, %s3187_s21  ;;  %v2708_v7 = vpack.i.bf16 %v3465_v4, %v3462_v2 }
  0x44   : > { %2624 = vrot.lane.b32.xlu0 %v2623_v8, %s3187_s21  ;;  %v3481_v8 = vpack.i.bf16 %v3471_v6, %v3468_v5 }
  0x47   : > { %2639 = vrot.lane.b32.xlu1 %v3363_v15, %s3187_s21 }
  0x48   : > { %2634 = vrot.lane.b32.xlu0 %v2633_v18, %s3187_s21  ;;  %v2718_v18 = vpack.i.bf16 %v2219_v12, %v2218_v9 }
  0x4b   : > { %2649 = vrot.lane.b32.xlu1 %v3372_v23, %s3187_s21 }
  0x4c   : > { %2644 = vrot.lane.b32.xlu0 %v3375_v24, %s3187_s21 }
  0x4f   : > { %2659 = vrot.lane.b32.xlu1 %v3383_v30, %s3187_s21 }
  0x50   : > { %2654 = vrot.lane.b32.xlu0 %v3387_v31, %s3187_s21 }
  0x53   : > { %2669 = vrot.lane.b32.xlu1 %v2668_v38, %s3187_s21  ;;  %v3531_v38 = vpack.i.bf16 %v3520_v36, %v3517_v33 }
  0x54   : > { %2664 = vrot.lane.b32.xlu0 %v3397_v39, %s3187_s21 }
  0x57   : > { %2679 = vrot.lane.b32.xlu1 %v3414_v46, %s3188_s22 }
  0x58   : > { %2674 = vrot.lane.b32.xlu0 %v2673_v48, %s3188_s22  ;;  %v2230_v48 = vld [vmem:[%s3238_s19 + $0x180] sm:$0xff] }
  0x59   : > { %v2748_v9 = vpack.i.bf16 %v2231_v51, %v2230_v48 }
  0x5b   : > { %2689 = vrot.lane.b32.xlu1 %v3432_v54, %s3188_s22 }
  0x5c   : > { %2684 = vrot.lane.b32.xlu0 %v3435_v55, %s3188_s22 }
  0x5f   : > { %2699 = vrot.lane.b32.xlu1 %v3453_v62, %s3188_s22 }
  0x60   : > { %2694 = vrot.lane.b32.xlu0 %v3459_v63, %s3188_s22 }
  0x63   : > { %2709 = vrot.lane.b32.xlu1 %v2708_v7, %s3188_s22  ;;  %v3539_v7 = vld [vmem:[%s3238_s19 + $0x170] sm:$0xff] }
  0x64   : > { %2704 = vrot.lane.b32.xlu0 %v3481_v8, %s3188_s22  ;;  %v3547_v12 = vpack.i.bf16 %v3539_v7, %v3536_v53 }
  0x67   : > { %2719 = vrot.lane.b32.xlu1 %v2718_v18, %s3188_s22 }
  0x68   : > { %2714 = vrot.lane.b32.xlu0 %v2713_v19, %s3188_s22 }
  0x6b   : > { %2729 = vrot.lane.b32.xlu1 %v3507_v26, %s3188_s22 }
  0x6c   : > { %2724 = vrot.lane.b32.xlu0 %v2723_v27, %s3188_s22 }
  0x6f   : > { %2739 = vrot.lane.b32.xlu1 %v3526_v37, %s3188_s22 }
  0x70   : > { %2734 = vrot.lane.b32.xlu0 %v3531_v38, %s3188_s22 }
  0x73   : > { %2749 = vrot.lane.b32.xlu1 %v2748_v9, %s3188_s22 }
  0x74   : > { %2744 = vrot.lane.b32.xlu0 %v3547_v12, %s3188_s22 }
  0x77   : > { %2759 = vrot.lane.b32.xlu1 %v3243_v3, %s3189_s23 }
  0x78   : > { %2754 = vrot.lane.b32.xlu0 %v3255_v11, %s3189_s23  ;;  %v3153_v11 = vld [vmem:[%s4571_s1] sm:$0xff]  }
  0x79   : > { %2434 = vmatprep.subr.bf16.mxu0 %v3153_v11  ;;  %2472 = vmatprep.subr.bf16.mxu1 %v3153_v11 }
  0x7a   : > { %2435 = vmatpush3.bf16.msra.mxu0 %v3153_v11  ;;  %2475 = vmatpush3.bf16.msra.mxu1 %v3153_v11 }
  0x7b   : > { %2769 = vrot.lane.b32.xlu1 %v3282_v28, %s3189_s23 }
  0x7c   : > { %2764 = vrot.lane.b32.xlu0 %v3252_v10, %s3189_s23 }
  0x7f   : > { %2779 = vrot.lane.b32.xlu1 %v3323_v52, %s3190_s24 }
  0x80   : > { %2774 = vrot.lane.b32.xlu0 %v3294_v35, %s3189_s23 }
  0x83   : > { %2789 = vrot.lane.b32.xlu1 %v3336_v59, %s3190_s24 }
  0x84   : > { %2784 = vrot.lane.b32.xlu0 %v3363_v15, %s3190_s24  ;;  %v3154_v15 = vld [vmem:[%s4571_s1 + $0x8] sm:$0xff]  }
  0x85   : > { %2436 = vmatprep.subr.bf16.mxu0 %v3154_v15  ;;  %2473 = vmatprep.subr.bf16.mxu1 %v3154_v15 }
  0x86   : > { %2437 = vmatpush3.bf16.msra.mxu0 %v3154_v15  ;;  %2476 = vmatpush3.bf16.msra.mxu1 %v3154_v15 }
  0x87   : > { %2799 = vrot.lane.b32.xlu1 %v3414_v46, %s3191_s27  ;;  %2478 = vmatprep.subr.msk.bf16.mxu0 %vm1872_vm0, %v3155_v22 }
  0x88   : > { %2794 = vrot.lane.b32.xlu0 %v3375_v24, %s3190_s24  ;;  %2479 = vmatprep.subr.msk.bf16.mxu1 %vm1872_vm0, %v3155_v22 }
  0x89   : > { %v3575_v28 = vpop.permute.xlu1 %2524 }
  0x8a   : > { %v3577_v52 = vpop.permute.xlu0 %2514 }
  0x8b   : > { %2809 = vrot.lane.b32.xlu1 %v3435_v55, %s3191_s27  ;;  %v1874_v55 = vsel %vm1872_vm0, %v3155_v22, 0 }
  0x8c   : > { %2804 = vrot.lane.b32.xlu0 %v2718_v18, %s3191_s27  ;;  %2439 = vmatpush3.bf16.msra.mxu0 %v1874_v55 }
  0x8d   : > { %v3585_v46 = vpop.permute.xlu1 %2529  ;;  %2477 = vmatpush3.bf16.msra.mxu1 %v1874_v55 }
  0x8e   : > { %4595 = vst [vmem:[#allocation8_spill] sm:$0xff] %v3585_v46  ;;  %v3587_v19 = vpop.permute.xlu0 %2519 }
  0x8f   : > { %2819 = vrot.lane.b32.xlu1 %v3243_v3, %s3192_s5 }
  0x90   : > { %2814 = vrot.lane.b32.xlu0 %v2723_v27, %s3191_s27 }
  0x91   : > { %v3595_v18 = vpop.permute.xlu1 %2539 }
  0x92   : > { %v3597_v25 = vpop.permute.xlu0 %2534 }
  0x93   : > { %2829 = vrot.lane.b32.xlu1 %v3252_v10, %s3192_s5 }
  0x94   : > { %2824 = vrot.lane.b32.xlu0 %v3294_v35, %s3192_s5 }
  0x95   : > { %v3603_v48 = vpop.permute.xlu1 %2549 }
  0x96   : > { %v3605_v3 = vpop.permute.xlu0 %2544 }
  0x97   : > { %2839 = vrot.lane.b32.xlu1 %v3336_v59, %s3193_s6 }
  0x98   : > { %2834 = vrot.lane.b32.xlu0 %v3291_v34, %s3192_s5 }
  0x99   : > { %v3611_v27 = vpop.permute.xlu1 %2559 }
  0x9a   : > { %v3613_v51 = vpop.permute.xlu0 %2554 }
  0x9b   : > { %2849 = vrot.lane.b32.xlu1 %v3333_v58, %s3193_s6 }
  0x9c   : > { %2844 = vrot.lane.b32.xlu0 %v3375_v24, %s3193_s6 }
  0x9d   : > { %v3619_v10 = vpop.permute.xlu1 %2569 }
  0x9e   : > { %4596 = vst [vmem:[#allocation9_spill] sm:$0xff] %v3619_v10  ;;  %v3621_v35 = vpop.permute.xlu0 %2564  ;;  %v2241_v10 = vld [vmem:[%s3238_s19 + $0x81] sm:$0xff] }
  0x9f   : > { %4597 = vst [vmem:[#allocation10_spill] sm:$0xff] %v3621_v35  ;;  %2859 = vrot.lane.b32.xlu1 %v3291_v34, %s3189_s23 }
  0xa0   : > { %2854 = vrot.lane.b32.xlu0 %v3372_v23, %s3193_s6 }
  0xa1   : > { %v3627_v59 = vpop.permute.xlu1 %2579 }
  0xa2   : > { %v3629_v9 = vpop.permute.xlu0 %2574 }
  0xa3   : > { %2869 = vrot.lane.b32.xlu1 %v3306_v41, %s3189_s23 }
  0xa4   : > { %2864 = vrot.lane.b32.xlu0 %v3267_v17, %s3189_s23 }
  0xa5   : > { %v2590_v24 = vpop.permute.xlu1 %2589 }
  0xa6   : > { %v2585_v11 = vpop.permute.xlu0 %2584  ;;  %v2591_v4 = vunpack.i.l.bf16 %v2590_v24 }
  0xa7   : > { %2879 = vrot.lane.b32.xlu1 %v3372_v23, %s3190_s24  ;;  %v2586_v2 = vunpack.i.l.bf16 %v2585_v11 }
  0xa8   : > { %2874 = vrot.lane.b32.xlu0 %v3333_v58, %s3190_s24  ;;  %v1547_v13 = vsel %vm1516_vm1, %v3536_v53, %v2591_v4 }
  0xa9   : > { %v3639_v34 = vpop.permute.xlu1 %2599 }
  0xaa   : > { %v3641_v15 = vpop.permute.xlu0 %2594 }
  0xab   : > { %4598 = vst [vmem:[#allocation11_spill] sm:$0xff] %v3641_v15  ;;  %2889 = vrot.lane.b32.xlu1 %v3387_v31, %s3190_s24 }
  0xac   : > { %2884 = vrot.lane.b32.xlu0 %v3348_v1, %s3190_s24 }
  0xad   : > { %v3647_v22 = vpop.permute.xlu1 %2609 }
  0xae   : > { %4599 = vst [vmem:[#allocation12_spill] sm:$0xff] %v3647_v22  ;;  %v3649_v55 = vpop.permute.xlu0 %2604 }
  0xaf   : > { %2899 = vrot.lane.b32.xlu1 %v3507_v26, %s3191_s27 }
  0xb0   : > { %2894 = vrot.lane.b32.xlu0 %v3432_v54, %s3191_s27 }
  0xb1   : > { %v3655_v58 = vpop.permute.xlu1 %2619 }
  0xb2   : > { %v3657_v23 = vpop.permute.xlu0 %2614 }
  0xb3   : > { %2909 = vrot.lane.b32.xlu1 %v3531_v38, %s3191_s27 }
  0xb4   : > { %2904 = vrot.lane.b32.xlu0 %v3459_v63, %s3191_s27 }
  0xb5   : > { %v3663_v22 = vpop.permute.xlu1 %2629 }
  0xb6   : > { %v3665_v35 = vpop.permute.xlu0 %2624 }
  0xb7   : > { %2919 = vrot.lane.b32.xlu1 %v3306_v41, %s3192_s5  ;;  %v2240_v41 = vld [vmem:[%s3238_s19 + $0x79] sm:$0xff] }
  0xb8   : > { %2914 = vrot.lane.b32.xlu0 %v3267_v17, %s3192_s5 }
  0xb9   : > { %v3671_v54 = vpop.permute.xlu1 %2639 }
  0xba   : > { %4600 = vst [vmem:[#allocation13_spill] sm:$0xff] %v3671_v54  ;;  %v3673_v26 = vpop.permute.xlu0 %2634 }
  0xbb   : > { %4601 = vst [vmem:[#allocation14_spill] sm:$0xff] %v3673_v26  ;;  %2929 = vrot.lane.b32.xlu1 %v3302_v40, %s3192_s5  ;;  %v2592_v26 = vunpack.i.h.bf16 %v2590_v24 }
  0xbc   : > { %2924 = vrot.lane.b32.xlu0 %v3263_v16, %s3192_s5  ;;  %v2242_v16 = vld [vmem:[%s3238_s19 + $0x91] sm:$0xff] }
  0xbd   : > { %v3679_v63 = vpop.permute.xlu1 %2649 }
  0xbe   : > { %4602 = vst [vmem:[#allocation15_spill] sm:$0xff] %v3679_v63  ;;  %v3681_v38 = vpop.permute.xlu0 %2644  ;;  %v2243_v63 = vld [vmem:[%s3238_s19 + $0x99] sm:$0xff] }
  0xbf   : > { %4603 = vst [vmem:[#allocation16_spill] sm:$0xff] %v3681_v38  ;;  %2939 = vrot.lane.b32.xlu1 %v3387_v31, %s3193_s6  ;;  %v2587_v38 = vunpack.i.h.bf16 %v2585_v11  ;;  %v2953_v31 = vpack.i.bf16 %v2241_v10, %v2240_v41  ;;  %v3699_v24 = vpack.i.bf16 %v2243_v63, %v2242_v16  ;;  %v1548_v11 = vsel %vm1516_vm1, %v3539_v7, %v2592_v26  ;;  %v2275_v26 = vld [vmem:[%s3238_s19 + $0x9a] sm:$0xff] }
  0xc0   : > { %2934 = vrot.lane.b32.xlu0 %v3348_v1, %s3193_s6  ;;  %v2621_v41 = vunpack.i.l.bf16 %v3655_v58 }
  0xc1   : > { %v3687_v17 = vpop.permute.xlu1 %2659  ;;  %v1546_v10 = vsel %vm1516_vm1, %v3514_v32, %v2587_v38  ;;  %v2273_v32 = vld [vmem:[%s3238_s19 + $0x82] sm:$0xff]  ;;  %v2622_v38 = vunpack.i.h.bf16 %v3655_v58 }
  0xc2   : > { %v3691_v46 = vpop.permute.xlu0 %2654 }
  0xc3   : > { %2949 = vrot.lane.b32.xlu1 %v3383_v30, %s3193_s6 }
  0xc4   : > { %2944 = vrot.lane.b32.xlu0 %v3344_v0, %s3193_s6  ;;  %v1545_v0 = vsel %vm1516_vm1, %v3511_v29, %v2586_v2  ;;  %v2272_v29 = vld [vmem:[%s3238_s19 + $0x7a] sm:$0xff] }
  0xc5   : > { %v2670_v1 = vpop.permute.xlu1 %2669 }
  0xc6   : > { %v2672_v54 = vunpack.i.h.bf16 %v2670_v1  ;;  %v2671_v14 = vunpack.i.l.bf16 %v2670_v1  ;;  %v2665_v15 = vpop.permute.xlu0 %2664 }
  0xc7   : > { %v2667_v45 = vunpack.i.h.bf16 %v2665_v15  ;;  %v2666_v44 = vunpack.i.l.bf16 %v2665_v15  ;;  %2959 = vrot.lane.b32.xlu1 %v3302_v40, %s3189_s23  ;;  %v2537_v15 = vunpack.i.h.bf16 %v3597_v25 }
  0xc8   : > { %v3712_v63 = vsel %vm1549_vm2, %v1547_v13, %v2671_v14  ;;  %v3715_v4 = vsel %vm1549_vm2, %v1548_v11, %v2672_v54  ;;  %2954 = vrot.lane.b32.xlu0 %v2953_v31, %s3189_s23  ;;  %v2542_v13 = vunpack.i.h.bf16 %v3595_v18  ;;  %v2541_v14 = vunpack.i.l.bf16 %v3595_v18  ;;  %v2274_v54 = vld [vmem:[%s3238_s19 + $0x92] sm:$0xff] }
  0xc9   : > { %v3719_v53 = vsel %vm1549_vm2, %v1545_v0, %v2666_v44  ;;  %v3722_v40 = vsel %vm1549_vm2, %v1546_v10, %v2667_v45  ;;  %v3724_v2 = vpop.permute.xlu1 %2679  ;;  %v2536_v44 = vunpack.i.l.bf16 %v3597_v25  ;;  %v2973_v45 = vpack.i.bf16 %v2273_v32, %v2272_v29 }
  0xca   : > { %v3728_v7 = vpop.permute.xlu0 %2674  ;;  %v2617_v18 = vunpack.i.h.bf16 %v3657_v23  ;;  %v1527_v25 = vsel %vm1516_vm1, %v3444_v60, %v2541_v14  ;;  %v1528_v1 = vsel %vm1516_vm1, %v3447_v61, %v2542_v13  ;;  %v3754_v11 = vpack.i.bf16 %v2275_v26, %v2274_v54 }
  0xcb   : > { %2969 = vrot.lane.b32.xlu1 %v3316_v47, %s3189_s23  ;;  %v2616_v47 = vunpack.i.l.bf16 %v3657_v23  ;;  %v1525_v58 = vsel %vm1516_vm1, %v3421_v49, %v2536_v44  ;;  %v1526_v23 = vsel %vm1516_vm1, %v3424_v50, %v2537_v15  ;;  %v2552_v0 = vunpack.i.h.bf16 %v3603_v48 }
  0xcc   : > { %2964 = vrot.lane.b32.xlu0 %v3699_v24, %s3189_s23  ;;  %v2551_v10 = vunpack.i.l.bf16 %v3603_v48  ;;  %v2547_v60 = vunpack.i.h.bf16 %v3605_v3  ;;  %v2546_v61 = vunpack.i.l.bf16 %v3605_v3  ;;  %v1561_v29 = vsel %vm1549_vm2, %v1528_v1, %v2622_v38 }
  0xcd   : > { %v3742_v16 = vpop.permute.xlu1 %2689  ;;  %v1558_v49 = vsel %vm1549_vm2, %v1525_v58, %v2616_v47  ;;  %v1559_v13 = vsel %vm1549_vm2, %v1526_v23, %v2617_v18  ;;  %v2632_v48 = vunpack.i.h.bf16 %v3663_v22  ;;  %v2631_v44 = vunpack.i.l.bf16 %v3663_v22 }
  0xce   : > { %v3746_v31 = vpop.permute.xlu0 %2684  ;;  %v2627_v3 = vunpack.i.h.bf16 %v3665_v35  ;;  %v2626_v26 = vunpack.i.l.bf16 %v3665_v35  ;;  %v1531_v22 = vsel %vm1516_vm1, %v3468_v5, %v2551_v10  ;;  %v1532_v18 = vsel %vm1516_vm1, %v3471_v6, %v2552_v0 }
  0xcf   : > { %2979 = vrot.lane.b32.xlu1 %v3383_v30, %s3190_s24  ;;  %v1560_v30 = vsel %vm1549_vm2, %v1527_v25, %v2621_v41  ;;  %v1529_v25 = vsel %vm1516_vm1, %v3438_v56, %v2546_v61  ;;  %v1530_v1 = vsel %vm1516_vm1, %v3441_v57, %v2547_v60  ;;  %v1564_v6 = vsel %vm1549_vm2, %v1531_v22, %v2631_v44 }
  0xd0   : > { %2974 = vrot.lane.b32.xlu0 %v2973_v45, %s3190_s24  ;;  %v1565_v0 = vsel %vm1549_vm2, %v1532_v18, %v2632_v48  ;;  %v1562_v56 = vsel %vm1549_vm2, %v1529_v25, %v2626_v26  ;;  %v1563_v61 = vsel %vm1549_vm2, %v1530_v1, %v2627_v3  ;;  %v2582_v48 = vunpack.i.h.bf16 %v3627_v59  ;;  %v2339_v3 = vld [vmem:[%s3238_s19 + $0xb1] sm:$0xff] }
  0xd1   : > { %v2700_v32 = vpop.permute.xlu1 %2699  ;;  %v2581_v44 = vunpack.i.l.bf16 %v3627_v59  ;;  %v2577_v26 = vunpack.i.h.bf16 %v3629_v9  ;;  %v2576_v22 = vunpack.i.l.bf16 %v3629_v9  ;;  %v2661_v25 = vunpack.i.l.bf16 %v3687_v17 }
  0xd2   : > { %v2702_v50 = vunpack.i.h.bf16 %v2700_v32  ;;  %v2701_v14 = vunpack.i.l.bf16 %v2700_v32  ;;  %v2695_v15 = vpop.permute.xlu0 %2694  ;;  %v2353_v32 = vld [vmem:[%s3238_s19 + $0x159] sm:$0xff]  ;;  %v2657_v59 = vunpack.i.h.bf16 %v3691_v46 }
  0xd3   : > { %v2697_v45 = vunpack.i.h.bf16 %v2695_v15  ;;  %v2696_v54 = vunpack.i.l.bf16 %v2695_v15  ;;  %2989 = vrot.lane.b32.xlu1 %v3397_v39, %s3190_s24  ;;  %v2355_v15 = vld [vmem:[%s3238_s19 + $0x171] sm:$0xff] }
  0xd4   : > { %v3776_v38 = vsel %vm1582_vm3, %v1560_v30, %v2701_v14  ;;  %v3779_v41 = vsel %vm1582_vm3, %v1561_v29, %v2702_v50  ;;  %2984 = vrot.lane.b32.xlu0 %v3754_v11, %s3190_s24  ;;  %v2352_v29 = vld [vmem:[%s3238_s19 + $0x151] sm:$0xff] }
  0xd5   : > { %4604 = vst [vmem:[#allocation17_spill] sm:$0xff] %v3776_v38  ;;  %4605 = vst [vmem:[#allocation18_spill] sm:$0xff] %v3779_v41  ;;  %v3788_v39 = vsel %vm1582_vm3, %v1558_v49, %v2696_v54  ;;  %v3791_v35 = vsel %vm1582_vm3, %v1559_v13, %v2697_v45  ;;  %v2710_v47 = vpop.permute.xlu1 %2709  ;;  %v3018_v14 = vpack.i.bf16 %v2353_v32, %v2352_v29  ;;  %v2338_v54 = vld [vmem:[%s3238_s19 + $0xa9] sm:$0xff]  ;;  %v2602_v38 = vunpack.i.h.bf16 %v3639_v34 }
  0xd6   : > { %4606 = vst [vmem:[#allocation19_spill] sm:$0xff] %v3788_v39  ;;  %4607 = vst [vmem:[#allocation20_spill] sm:$0xff] %v3791_v35  ;;  %v2712_v58 = vunpack.i.h.bf16 %v2710_v47  ;;  %v2711_v5 = vunpack.i.l.bf16 %v2710_v47  ;;  %v2705_v23 = vpop.permute.xlu0 %2704  ;;  %v2385_v47 = vld [vmem:[%s3238_s19 + $0x15a] sm:$0xff]  ;;  %v3850_v9 = vpack.i.bf16 %v2339_v3, %v2338_v54  ;;  %v2370_v54 = vld [vmem:[%s3238_s19 + $0xaa] sm:$0xff] }
  0xd7   : > { %v2707_v10 = vunpack.i.h.bf16 %v2705_v23  ;;  %v2706_v30 = vunpack.i.l.bf16 %v2705_v23  ;;  %2999 = vrot.lane.b32.xlu1 %v3526_v37, %s3191_s27  ;;  %v1544_v23 = vsel %vm1516_vm1, %v3520_v36, %v2582_v48  ;;  %v2371_v3 = vld [vmem:[%s3238_s19 + $0xb2] sm:$0xff]  ;;  %v4627_v35 = vld [vmem:[#allocation14_spill] sm:$0xff] }
  0xd8   : > { %v3804_v57 = vsel %vm1582_vm3, %v1564_v6, %v2711_v5  ;;  %v3807_v60 = vsel %vm1582_vm3, %v1565_v0, %v2712_v58  ;;  %2994 = vrot.lane.b32.xlu0 %v3453_v62, %s3191_s27  ;;  %v2354_v62 = vld [vmem:[%s3238_s19 + $0x169] sm:$0xff]  ;;  %v2656_v58 = vunpack.i.l.bf16 %v3691_v46  ;;  %v1543_v5 = vsel %vm1516_vm1, %v3517_v33, %v2581_v44 }
  0xd9   : > { %4608 = vst [vmem:[#allocation21_spill] sm:$0xff] %v3804_v57  ;;  %4609 = vst [vmem:[#allocation22_spill] sm:$0xff] %v3807_v60  ;;  %v3814_v37 = vsel %vm1582_vm3, %v1562_v56, %v2706_v30  ;;  %v3817_v49 = vsel %vm1582_vm3, %v1563_v61, %v2707_v10  ;;  %v3819_v13 = vpop.permute.xlu1 %2719  ;;  %v3844_v1 = vpack.i.bf16 %v2355_v15, %v2354_v62  ;;  %v2387_v62 = vld [vmem:[%s3238_s19 + $0x172] sm:$0xff]  ;;  %v4016_v60 = vld [vmem:[%s3238_s19 + $0x1a2] sm:$0xff]  ;;  %v2636_v39 = vunpack.i.l.bf16 %v4627_v35 }
  0xda   : > { %4610 = vst [vmem:[#allocation23_spill] sm:$0xff] %v3814_v37  ;;  %4611 = vst [vmem:[#allocation24_spill] sm:$0xff] %v3817_v49  ;;  %v3821_v50 = vpop.permute.xlu0 %2714  ;;  %v1541_v0 = vsel %vm1516_vm1, %v3497_v20, %v2576_v22  ;;  %v1542_v46 = vsel %vm1516_vm1, %v3500_v21, %v2577_v26  ;;  %v1576_v56 = vsel %vm1549_vm2, %v1543_v5, %v2661_v25  ;;  %v4028_v57 = vld [vmem:[%s3238_s19 + $0xda] sm:$0xff]  ;;  %v2601_v49 = vunpack.i.l.bf16 %v3639_v34  ;;  %v4625_v34 = vld [vmem:[#allocation4_spill] sm:$0xff] }
  0xdb   : > { %3009 = vrot.lane.b32.xlu1 %v3547_v12, %s3191_s27  ;;  %v2384_v12 = vld [vmem:[%s3238_s19 + $0x152] sm:$0xff]  ;;  %v1574_v20 = vsel %vm1549_vm2, %v1541_v0, %v2656_v58  ;;  %v1575_v29 = vsel %vm1549_vm2, %v1542_v46, %v2657_v59  ;;  %v3897_v5 = vpack.i.bf16 %v2371_v3, %v2370_v54  ;;  %v2607_v0 = vunpack.i.h.bf16 %v3649_v55  ;;  %v2263_v46 = vld [vmem:[%s3238_s19 + $0x189] sm:$0xff]  ;;  %v3944_v54 = vld [vmem:[%s3238_s19 + $0xc0] sm:$0xff] }
  0xdc   : > { %3004 = vrot.lane.b32.xlu0 %v3481_v8, %s3191_s27  ;;  %v2662_v8 = vunpack.i.h.bf16 %v3687_v17  ;;  %v3038_v6 = vpack.i.bf16 %v2385_v47, %v2384_v12 }
  0xdd   : > { %v3831_v45 = vpop.permute.xlu1 %2729 }
  0xde   : > { %v3837_v18 = vpop.permute.xlu0 %2724  ;;  %v1577_v33 = vsel %vm1549_vm2, %v1544_v23, %v2662_v8 }
  0xdf   : > { %3019 = vrot.lane.b32.xlu1 %v3018_v14, %s3192_s5  ;;  %v2386_v14 = vld [vmem:[%s3238_s19 + $0x16a] sm:$0xff] }
  0xe0   : > { %3014 = vrot.lane.b32.xlu0 %v3699_v24, %s3192_s5  ;;  %v3885_v25 = vpack.i.bf16 %v2387_v62, %v2386_v14  ;;  %v3938_v62 = vld [vmem:[%s3238_s19 + $0x180] sm:$0xff] }
  0xe1   : > { %v2740_v17 = vpop.permute.xlu1 %2739 }
  0xe2   : > { %v2742_v10 = vunpack.i.h.bf16 %v2740_v17  ;;  %v2741_v24 = vunpack.i.l.bf16 %v2740_v17  ;;  %v2735_v30 = vpop.permute.xlu0 %2734 }
  0xe3   : > { %v2737_v36 = vunpack.i.h.bf16 %v2735_v30  ;;  %v2736_v61 = vunpack.i.l.bf16 %v2735_v30  ;;  %3029 = vrot.lane.b32.xlu1 %v3844_v1, %s3192_s5  ;;  %v2247_v30 = vld [vmem:[%s3238_s19 + $0xc9] sm:$0xff] }
  0xe4   : > { %v3867_v21 = vsel %vm1582_vm3, %v1576_v56, %v2741_v24  ;;  %v3870_v32 = vsel %vm1582_vm3, %v1577_v33, %v2742_v10  ;;  %3024 = vrot.lane.b32.xlu0 %v3850_v9, %s3192_s5  ;;  %v2687_v10 = vunpack.i.h.bf16 %v3746_v31  ;;  %v2686_v24 = vunpack.i.l.bf16 %v3746_v31  ;;  %v2294_v56 = vld [vmem:[%s3238_s19 + $0x182] sm:$0xff] }
  0xe5   : > { %4612 = vst [vmem:[#allocation25_spill] sm:$0xff] %v3867_v21  ;;  %4613 = vst [vmem:[#allocation26_spill] sm:$0xff] %v3870_v32  ;;  %v3877_v15 = vsel %vm1582_vm3, %v1574_v20, %v2736_v61  ;;  %v3880_v48 = vsel %vm1582_vm3, %v1575_v29, %v2737_v36  ;;  %v2750_v44 = vpop.permute.xlu1 %2749  ;;  %v2278_v36 = vld [vmem:[%s3238_s19 + $0xc2] sm:$0xff]  ;;  %v2279_v61 = vld [vmem:[%s3238_s19 + $0xca] sm:$0xff] }
  0xe6   : > { %4614 = vst [vmem:[#allocation27_spill] sm:$0xff] %v3880_v48  ;;  %v2752_v26 = vunpack.i.h.bf16 %v2750_v44  ;;  %v2751_v22 = vunpack.i.l.bf16 %v2750_v44  ;;  %v2745_v12 = vpop.permute.xlu0 %2744  ;;  %v3941_v44 = vld [vmem:[%s3238_s19 + $0x188] sm:$0xff] }
  0xe7   : > { %v2747_v47 = vunpack.i.h.bf16 %v2745_v12  ;;  %v2746_v8 = vunpack.i.l.bf16 %v2745_v12  ;;  %3039 = vrot.lane.b32.xlu1 %v3038_v6, %s3193_s6  ;;  %v3954_v12 = vld [vmem:[%s3238_s19 + $0x198] sm:$0xff]  ;;  %v4622_v32 = vld [vmem:[#allocation11_spill] sm:$0xff] }
  0xe8   : > { %v3889_v59 = vsel %vm1582_vm3, %v3712_v63, %v2751_v22  ;;  %v3893_v58 = vsel %vm1582_vm3, %v3715_v4, %v2752_v26  ;;  %3034 = vrot.lane.b32.xlu0 %v3754_v11, %s3193_s6  ;;  %v2527_v4 = vunpack.i.h.bf16 %v3575_v28  ;;  %v2526_v11 = vunpack.i.l.bf16 %v3575_v28  ;;  %v2246_v28 = vld [vmem:[%s3238_s19 + $0xc1] sm:$0xff] }
  0xe9   : > { %4615 = vst [vmem:[#allocation28_spill] sm:$0xff] %v3889_v59  ;;  %4616 = vst [vmem:[#allocation29_spill] sm:$0xff] %v3893_v58  ;;  %v3901_v23 = vsel %vm1582_vm3, %v3719_v53, %v2746_v8  ;;  %v3905_v63 = vsel %vm1582_vm3, %v3722_v40, %v2747_v47  ;;  %v3907_v17 = vpop.permute.xlu1 %2759  ;;  %v2606_v53 = vunpack.i.l.bf16 %v3649_v55  ;;  %v2262_v40 = vld [vmem:[%s3238_s19 + $0x181] sm:$0xff]  ;;  %v2295_v55 = vld [vmem:[%s3238_s19 + $0x18a] sm:$0xff]  ;;  %v2556_v59 = vunpack.i.l.bf16 %v3613_v51 }
  0xea   : > { %4617 = vst [vmem:[#allocation30_spill] sm:$0xff] %v3901_v23  ;;  %4618 = vst [vmem:[#allocation31_spill] sm:$0xff] %v3905_v63  ;;  %v3911_v6 = vpop.permute.xlu0 %2754  ;;  %v1521_v20 = vsel %vm1516_vm1, %v3400_v42, %v2526_v11  ;;  %v1522_v31 = vsel %vm1516_vm1, %v3403_v43, %v2527_v4  ;;  %v3935_v14 = vpack.i.bf16 %v2263_v46, %v2262_v40  ;;  %v3951_v43 = vld [vmem:[%s3238_s19 + $0xc8] sm:$0xff]  ;;  %v3957_v47 = vld [vmem:[%s3238_s19 + $0x1a0] sm:$0xff]  ;;  %v2516_v40 = vunpack.i.l.bf16 %v3577_v52 }
  0xeb   : > { %3049 = vrot.lane.b32.xlu1 %v3885_v25, %s3193_s6  ;;  %v1554_v3 = vsel %vm1549_vm2, %v1521_v20, %v2606_v53  ;;  %v1555_v26 = vsel %vm1549_vm2, %v1522_v31, %v2607_v0  ;;  %v3963_v11 = vpack.i.bf16 %v2247_v30, %v2246_v28  ;;  %v3969_v0 = vld [vmem:[%s3238_s19 + $0xe0] sm:$0xff]  ;;  %v2517_v31 = vunpack.i.h.bf16 %v3577_v52 }
  0xec   : > { %3044 = vrot.lane.b32.xlu0 %v3897_v5, %s3193_s6  ;;  %v1587_v8 = vsel %vm1582_vm3, %v1554_v3, %v2686_v24  ;;  %v1588_v4 = vsel %vm1582_vm3, %v1555_v26, %v2687_v10  ;;  %v3972_v53 = vld [vmem:[%s3238_s19 + $0x199] sm:$0xff]  ;;  %v3986_v28 = vld [vmem:[%s3238_s19 + $0x1a1] sm:$0xff]  ;;  %v2522_v3 = vunpack.i.h.bf16 %v3587_v19  ;;  %v2521_v26 = vunpack.i.l.bf16 %v3587_v19 }
  0xed   : > { %v3926_v33 = vpop.permute.xlu1 %2769  ;;  %v3989_v30 = vld [vmem:[%s3238_s19 + $0xd9] sm:$0xff]  ;;  %v3992_v20 = vld [vmem:[%s3238_s19 + $0xe1] sm:$0xff]  ;;  %v2596_v21 = vunpack.i.l.bf16 %v4622_v32 }
  0xee   : > { %v2765_v29 = vpop.permute.xlu0 %2764  ;;  %v4031_v19 = vld [vmem:[%s3238_s19 + $0xe2] sm:$0xff] }
  0xef   : > { %v2767_v42 = vunpack.i.h.bf16 %v2765_v29  ;;  %v2766_v22 = vunpack.i.l.bf16 %v2765_v29  ;;  %3059 = vrot.lane.b32.xlu1 %v3844_v1, %s3189_s23  ;;  %v3966_v1 = vld [vmem:[%s3238_s19 + $0xd8] sm:$0xff]  ;;  %v198_v29 = vld [vmem:[%s3238_s19] sm:$0xff] }
  0xf0   : > { %3054 = vrot.lane.b32.xlu0 %v3850_v9, %s3189_s23  ;;  %v3983_v9 = vpack.i.bf16 %v2295_v55, %v2294_v56  ;;  %v4000_v56 = vpack.i.bf16 %v2279_v61, %v2278_v36  ;;  %v199_v55 = vld [vmem:[%s3238_s19 + $0x8] sm:$0xff]  ;;  %v2562_v36 = vunpack.i.h.bf16 %v3611_v27  ;;  %v1517_v58 = vsel %vm1516_vm1, %v198_v29, %v2516_v40  ;;  %v4619_v52 = vld [vmem:[#allocation2_spill] sm:$0xff] }
  0xf1   : > { %v3976_v46 = vsel %vm1615_vm4, %v1587_v8, %v2766_v22  ;;  %v3979_v10 = vsel %vm1615_vm4, %v1588_v4, %v2767_v42  ;;  %v3981_v24 = vpop.permute.xlu1 %2779  ;;  %v2561_v22 = vunpack.i.l.bf16 %v3611_v27  ;;  %v4013_v4 = vld [vmem:[%s3238_s19 + $0x19a] sm:$0xff]  ;;  %v2557_v27 = vunpack.i.h.bf16 %v3613_v51  ;;  %v4620_v8 = vld [vmem:[#allocation3_spill] sm:$0xff] }
  0xf2   : > { %v3998_v42 = vpop.permute.xlu0 %2774  ;;  %v1518_v61 = vsel %vm1516_vm1, %v199_v55, %v2517_v31  ;;  %v1519_v63 = vsel %vm1516_vm1, %v4619_v52, %v2521_v26  ;;  %v1520_v23 = vsel %vm1516_vm1, %v4620_v8, %v2522_v3  ;;  %v4621_v29 = vld [vmem:[#allocation6_spill] sm:$0xff]  ;;  %v4623_v26 = vld [vmem:[#allocation7_spill] sm:$0xff]  ;;  %v2597_v55 = vunpack.i.h.bf16 %v4622_v32  ;;  %v4624_v52 = vld [vmem:[#allocation13_spill] sm:$0xff] }
  0xf3   : > { %3069 = vrot.lane.b32.xlu1 %v3935_v14, %s3189_s23  ;;  %v1535_v51 = vsel %vm1516_vm1, %v4621_v29, %v2561_v22  ;;  %v1536_v3 = vsel %vm1516_vm1, %v4623_v26, %v2562_v36  ;;  %v2642_v8 = vunpack.i.h.bf16 %v4624_v52  ;;  %v2641_v40 = vunpack.i.l.bf16 %v4624_v52  ;;  %v4626_v29 = vld [vmem:[#allocation5_spill] sm:$0xff] }
  0xf4   : > { %3064 = vrot.lane.b32.xlu0 %v3963_v11, %s3189_s23  ;;  %v1533_v22 = vsel %vm1516_vm1, %v4625_v34, %v2556_v59  ;;  %v1552_v31 = vsel %vm1549_vm2, %v1519_v63, %v2601_v49  ;;  %v2637_v32 = vunpack.i.h.bf16 %v4627_v35  ;;  %v2682_v26 = vunpack.i.h.bf16 %v3724_v2 }
  0xf5   : > { %v4037_v37 = vpop.permute.xlu1 %2789  ;;  %v2681_v52 = vunpack.i.l.bf16 %v3724_v2  ;;  %v1553_v59 = vsel %vm1549_vm2, %v1520_v23, %v2602_v38  ;;  %v2677_v49 = vunpack.i.h.bf16 %v3728_v7  ;;  %v2721_v63 = vunpack.i.l.bf16 %v3819_v13 }
  0xf6   : > { %v4044_v41 = vpop.permute.xlu0 %2784  ;;  %v1551_v35 = vsel %vm1549_vm2, %v1518_v61, %v2597_v55  ;;  %v1568_v2 = vsel %vm1549_vm2, %v1535_v51, %v2641_v40  ;;  %v1569_v34 = vsel %vm1549_vm2, %v1536_v3, %v2642_v8  ;;  %v1566_v38 = vsel %vm1549_vm2, %v1533_v22, %v2636_v39 }
  0xf7   : > { %3079 = vrot.lane.b32.xlu1 %v3885_v25, %s3190_s24  ;;  %v1534_v25 = vsel %vm1516_vm1, %v4626_v29, %v2557_v27  ;;  %v1550_v27 = vsel %vm1549_vm2, %v1517_v58, %v2596_v21  ;;  %v2722_v29 = vunpack.i.h.bf16 %v3819_v13  ;;  %v2716_v21 = vunpack.i.l.bf16 %v3821_v50 }
  0xf8   : > { %3074 = vrot.lane.b32.xlu0 %v3897_v5, %s3190_s24  ;;  %v2676_v5 = vunpack.i.l.bf16 %v3728_v7  ;;  %v2717_v7 = vunpack.i.h.bf16 %v3821_v50  ;;  %v2761_v58 = vunpack.i.l.bf16 %v3907_v17  ;;  %v1567_v61 = vsel %vm1549_vm2, %v1534_v25, %v2637_v32 }
  0xf9   : > { %v4069_v36 = vpop.permute.xlu1 %2799  ;;  %v1585_v40 = vsel %vm1582_vm3, %v1552_v31, %v2681_v52  ;;  %v1586_v51 = vsel %vm1582_vm3, %v1553_v59, %v2682_v26  ;;  %v1584_v39 = vsel %vm1582_vm3, %v1551_v35, %v2677_v49  ;;  %v1601_v55 = vsel %vm1582_vm3, %v1568_v2, %v2721_v63 }
  0xfa   : > { %v4075_v48 = vpop.permute.xlu0 %2794  ;;  %v1583_v13 = vsel %vm1582_vm3, %v1550_v27, %v2676_v5  ;;  %v2762_v50 = vunpack.i.h.bf16 %v3907_v17  ;;  %v2756_v8 = vunpack.i.l.bf16 %v3911_v6  ;;  %v4628_v22 = vpack.i.bf16 %v3941_v44, %v3938_v62 }
  0xfb   : > { %3089 = vrot.lane.b32.xlu1 %v3983_v9, %s3190_s24  ;;  %v4110_v31 = vsel %vm1582_vm3, %v1569_v34, %v2722_v29  ;;  %v2757_v25 = vunpack.i.h.bf16 %v3911_v6  ;;  %v2772_v32 = vunpack.i.h.bf16 %v3926_v33  ;;  %v2771_v26 = vunpack.i.l.bf16 %v3926_v33 }
  0xfc   : > { %3084 = vrot.lane.b32.xlu0 %v4000_v56, %s3190_s24  ;;  %v4629_v17 = vpack.i.bf16 %v3951_v43, %v3944_v54  ;;  %v1599_v52 = vsel %vm1582_vm3, %v1566_v38, %v2716_v21  ;;  %v1600_v62 = vsel %vm1582_vm3, %v1567_v61, %v2717_v7  ;;  %v1618_v44 = vsel %vm1615_vm4, %v1585_v40, %v2761_v58 }
  0xfd   : > { %v4093_v23 = vpop.permute.xlu1 %2809  ;;  %v2781_v5 = vunpack.i.l.bf16 %v3981_v24  ;;  %v2782_v6 = vunpack.i.h.bf16 %v3981_v24  ;;  %v2776_v33 = vunpack.i.l.bf16 %v3998_v42  ;;  %v2792_v27 = vunpack.i.h.bf16 %v4037_v37 }
  0xfe   : > { %v4099_v3 = vpop.permute.xlu0 %2804  ;;  %v2791_v54 = vunpack.i.l.bf16 %v4037_v37  ;;  %v1619_v49 = vsel %vm1615_vm4, %v1586_v51, %v2762_v50  ;;  %v1616_v63 = vsel %vm1615_vm4, %v1583_v13, %v2756_v8  ;;  %v2787_v35 = vunpack.i.h.bf16 %v4044_v41 }
  0xff   : > { %3099 = vrot.lane.b32.xlu1 %v4628_v22, %s3191_s27  ;;  %v2786_v2 = vunpack.i.l.bf16 %v4044_v41  ;;  %v4630_v24 = vpack.i.bf16 %v3957_v47, %v3954_v12  ;;  %v1617_v34 = vsel %vm1615_vm4, %v1584_v39, %v2757_v25  ;;  %v1632_v29 = vsel %vm1615_vm4, %v1599_v52, %v2771_v26 }
 0x100   : > { %3094 = vrot.lane.b32.xlu0 %v4629_v17, %s3191_s27  ;;  %v1633_v37 = vsel %vm1615_vm4, %v1600_v62, %v2772_v32  ;;  %v2777_v38 = vunpack.i.h.bf16 %v3998_v42  ;;  %v4631_v7 = vpack.i.bf16 %v3969_v0, %v3966_v1  ;;  %v1649_v41 = vsel %vm1648_vm5, %v1616_v63, %v2781_v5 }
 0x101   : > { %v2820_v59 = vpop.permute.xlu1 %2819  ;;  %v2802_v21 = vunpack.i.h.bf16 %v4069_v36  ;;  %v2801_v12 = vunpack.i.l.bf16 %v4069_v36  ;;  %v2811_v47 = vunpack.i.l.bf16 %v4093_v23  ;;  %v1650_v61 = vsel %vm1648_vm5, %v1617_v34, %v2782_v6 }
 0x102   : > { %v4127_v43 = vpop.permute.xlu0 %2814  ;;  %v1634_v40 = vsel %vm1615_vm4, %v1601_v55, %v2776_v33  ;;  %v1651_v51 = vsel %vm1648_vm5, %v1618_v44, %v2791_v54  ;;  %v1652_v13 = vsel %vm1648_vm5, %v1619_v49, %v2792_v27  ;;  %v1665_v0 = vsel %vm1648_vm5, %v1632_v29, %v2786_v2 }
 0x103   : > { %3109 = vrot.lane.b32.xlu1 %v4630_v24, %s3191_s27  ;;  %v1666_v39 = vsel %vm1648_vm5, %v1633_v37, %v2787_v35  ;;  %v2822_v50 = vunpack.i.h.bf16 %v2820_v59  ;;  %v2821_v8 = vunpack.i.l.bf16 %v2820_v59  ;;  %v2797_v36 = vunpack.i.h.bf16 %v4075_v48 }
 0x104   : > { %3104 = vrot.lane.b32.xlu0 %v4631_v7, %s3191_s27  ;;  %v2796_v22 = vunpack.i.l.bf16 %v4075_v48  ;;  %v2812_v55 = vunpack.i.h.bf16 %v4093_v23  ;;  %v2806_v25 = vunpack.i.l.bf16 %v4099_v3  ;;  %v1682_v32 = vsel %vm1681_vm6, %v1649_v41, %v2801_v12 }
 0x105   : > { %v2830_v58 = vpop.permute.xlu1 %2829  ;;  %v1683_v26 = vsel %vm1681_vm6, %v1650_v61, %v2802_v21  ;;  %v1684_v17 = vsel %vm1681_vm6, %v1651_v51, %v2811_v47  ;;  %v2807_v52 = vunpack.i.h.bf16 %v4099_v3  ;;  %v1715_v33 = vsel %vm1714_vm7, %v1682_v32, %v2821_v8 }
 0x106   : > { %v2825_v1 = vpop.permute.xlu0 %2824  ;;  %v2832_v62 = vunpack.i.h.bf16 %v2830_v58  ;;  %v2831_v44 = vunpack.i.l.bf16 %v2830_v58  ;;  %v1716_v27 = vsel %vm1714_vm7, %v1683_v26, %v2822_v50  ;;  %v1685_v54 = vsel %vm1681_vm6, %v1652_v13, %v2812_v55 }
 0x107   : > { %3119 = vrot.lane.b32.xlu1 %v3935_v14, %s3192_s5  ;;  %v2827_v23 = vunpack.i.h.bf16 %v2825_v1  ;;  %v2826_v6 = vunpack.i.l.bf16 %v2825_v1  ;;  %v1698_v3 = vsel %vm1681_vm6, %v1665_v0, %v2806_v25  ;;  %v4633_v49 = vpack.i.bf16 %v3992_v20, %v3989_v30 }
 0x108   : > { %3114 = vrot.lane.b32.xlu0 %v3963_v11, %s3192_s5  ;;  %v4632_v11 = vpack.i.bf16 %v3986_v28, %v3972_v53  ;;  %v1699_v53 = vsel %vm1681_vm6, %v1666_v39, %v2807_v52  ;;  %v2817_v28 = vunpack.i.h.bf16 %v4127_v43  ;;  %v2816_v2 = vunpack.i.l.bf16 %v4127_v43 }
 0x109   : > { %v2840_v14 = vpop.permute.xlu1 %2839  ;;  %v1717_v29 = vsel %vm1714_vm7, %v1684_v17, %v2831_v44  ;;  %v1718_v37 = vsel %vm1714_vm7, %v1685_v54, %v2832_v62  ;;  %v1731_v12 = vsel %vm1714_vm7, %v1698_v3, %v2826_v6  ;;  %v1732_v43 = vsel %vm1714_vm7, %v1699_v53, %v2827_v23  ;;  %v4638_v23 = vld [vmem:[#allocation10_spill] sm:$0xff] }
 0x10a   : > { %v2842_v5 = vunpack.i.h.bf16 %v2840_v14  ;;  %v2841_v48 = vunpack.i.l.bf16 %v2840_v14  ;;  %v2835_v59 = vpop.permute.xlu0 %2834  ;;  %v1667_v50 = vsel %vm1648_vm5, %v1634_v40, %v2796_v22  ;;  %v2567_v6 = vunpack.i.h.bf16 %v4638_v23 }
 0x10b   : > { %3129 = vrot.lane.b32.xlu1 %v4632_v11, %s3192_s5  ;;  %v2837_v47 = vunpack.i.h.bf16 %v2835_v59  ;;  %v2836_v58 = vunpack.i.l.bf16 %v2835_v59  ;;  %v2566_v11 = vunpack.i.l.bf16 %v4638_v23 }
 0x10c   : > { %3124 = vrot.lane.b32.xlu0 %v4633_v49, %s3192_s5  ;;  %v1748_v63 = vsel %vm1747_vm8, %v1715_v33, %v2841_v48  ;;  %v1749_v35 = vsel %vm1747_vm8, %v1716_v27, %v2842_v5  ;;  %v4637_v5 = vld [vmem:[#allocation9_spill] sm:$0xff]  ;;  %v4639_v33 = vld [vmem:[#allocation12_spill] sm:$0xff]  ;;  %v4640_v49 = vld [vmem:[#allocation15_spill] sm:$0xff] }
 0x10d   : > { %v2850_v24 = vpop.permute.xlu1 %2849  ;;  %v1780_v34 = vpack.c.bf16 %v1749_v35, %v1748_v63  ;;  %v2572_v48 = vunpack.i.h.bf16 %v4637_v5  ;;  %v2571_v59 = vunpack.i.l.bf16 %v4637_v5  ;;  %v2612_v27 = vunpack.i.h.bf16 %v4639_v33 }
 0x10e   : > { %v2852_v7 = vunpack.i.h.bf16 %v2850_v24  ;;  %v2851_v41 = vunpack.i.l.bf16 %v2850_v24  ;;  %v2845_v30 = vpop.permute.xlu0 %2844  ;;  %v2611_v54 = vunpack.i.l.bf16 %v4639_v33  ;;  %v2652_v63 = vunpack.i.h.bf16 %v4640_v49  ;;  %v3157_v24 = vld [vmem:[%s3238_s19 + $0x50] sm:$0xff] }
 0x10f   : > { %v2847_v20 = vunpack.i.h.bf16 %v2845_v30  ;;  %v2846_v21 = vunpack.i.l.bf16 %v2845_v30  ;;  %3139 = vrot.lane.b32.xlu1 %v3983_v9, %s3193_s6  ;;  %2440 = vmatprep.mubr.msk.bf16.mxu0 %vm1823_vm9, %v1780_v34  ;;  %v1635_v9 = vsel %vm1615_vm4, %v4110_v31, %v2777_v38  ;;  %v4634_v31 = vpack.i.bf16 %v4016_v60, %v4013_v4  ;;  %v4641_v30 = vld [vmem:[#allocation16_spill] sm:$0xff] }
 0x110   : > { %v1750_v61 = vsel %vm1747_vm8, %v1717_v29, %v2851_v41  ;;  %v1751_v51 = vsel %vm1747_vm8, %v1718_v37, %v2852_v7  ;;  %3134 = vrot.lane.b32.xlu0 %v4000_v56, %s3193_s6  ;;  %v1668_v8 = vsel %vm1648_vm5, %v1635_v9, %v2797_v36  ;;  %v1700_v56 = vsel %vm1681_vm6, %v1667_v50, %v2816_v2  ;;  %v3158_v29 = vld [vmem:[%s3238_s19 + $0x108] sm:$0xff]  ;;  %v3159_v7 = vld [vmem:[%s3238_s19 + $0x110] sm:$0xff] }
 0x111   : > { %v1781_v13 = vpack.c.bf16 %v1751_v51, %v1750_v61  ;;  %v4199_v1 = vpop.permute.xlu1 %2859  ;;  %v1764_v0 = vsel %vm1747_vm8, %v1731_v12, %v2846_v21  ;;  %v1765_v39 = vsel %vm1747_vm8, %v1732_v43, %v2847_v20  ;;  %v1701_v42 = vsel %vm1681_vm6, %v1668_v8, %v2817_v28  ;;  %v3156_v28 = vld [vmem:[%s3238_s19 + $0x48] sm:$0xff]  ;;  %v3160_v12 = vld [vmem:[%s3238_s19 + $0xf0] sm:$0xff] }
 0x112   : > { %v2855_v55 = vpop.permute.xlu0 %2854  ;;  %v1788_v25 = vpack.c.bf16 %v1765_v39, %v1764_v0  ;;  %v1733_v38 = vsel %vm1714_vm7, %v1700_v56, %v2836_v58  ;;  %v1734_v40 = vsel %vm1714_vm7, %v1701_v42, %v2837_v47  ;;  %v4635_v36 = vpack.i.bf16 %v4031_v19, %v4028_v57  ;;  %v4636_v57 = vld [vmem:[#allocation8_spill] sm:$0xff]  ;;  %v3161_v47 = vld [vmem:[%s3238_s19 + $0xf8] sm:$0xff] }
 0x113   : > { %v2857_v32 = vunpack.i.h.bf16 %v2855_v55  ;;  %v2856_v26 = vunpack.i.l.bf16 %v2855_v55  ;;  %3149 = vrot.lane.b32.xlu1 %v4634_v31, %s3193_s6  ;;  %2441 = vmatmul.mubr.msk.bf16.vlgmr.msra.gmra.mrb[0].mxu0 %vm1823_vm9, %v1781_v13  ;;  %v2532_v19 = vunpack.i.h.bf16 %v4636_v57  ;;  %v2531_v44 = vunpack.i.l.bf16 %v4636_v57 }
 0x114   : > { %3144 = vrot.lane.b32.xlu0 %v4635_v36, %s3193_s6  ;;  %2456 = vmatprep.mubr.msk.bf16.mxu1 %vm1823_vm9, %v1788_v25  ;;  %v2651_v35 = vunpack.i.l.bf16 %v4640_v49  ;;  %v1539_v37 = vsel %vm1516_vm1, %v3158_v29, %v2571_v59  ;;  %v1540_v41 = vsel %vm1516_vm1, %v3159_v7, %v2572_v48  ;;  %v2647_v20 = vunpack.i.h.bf16 %v4641_v30 }
 0x115   : > { %v1766_v22 = vsel %vm1747_vm8, %v1733_v38, %v2856_v26  ;;  %v1767_v17 = vsel %vm1747_vm8, %v1734_v40, %v2857_v32  ;;  %v4221_v52 = vpop.permute.xlu1 %2869  ;;  %v1523_v2 = vsel %vm1516_vm1, %v3156_v28, %v2531_v44  ;;  %v1524_v34 = vsel %vm1516_vm1, %v3157_v24, %v2532_v19 }
 0x116   : > { %v1789_v60 = vpack.c.bf16 %v1767_v17, %v1766_v22  ;;  %v4223_v4 = vpop.permute.xlu0 %2864  ;;  %v2646_v21 = vunpack.i.l.bf16 %v4641_v30  ;;  %v1537_v43 = vsel %vm1516_vm1, %v3160_v12, %v2566_v11  ;;  %v1538_v58 = vsel %vm1516_vm1, %v3161_v47, %v2567_v6 }
 0x117   : > { %v1556_v61 = vsel %vm1549_vm2, %v1523_v2, %v2611_v54  ;;  %v1557_v51 = vsel %vm1549_vm2, %v1524_v34, %v2612_v27  ;;  %v1572_v13 = vsel %vm1549_vm2, %v1539_v37, %v2651_v35  ;;  %v1573_v0 = vsel %vm1549_vm2, %v1540_v41, %v2652_v63 }
 0x118   : > { %2457 = vmatmul.mubr.msk.bf16.vlgmr.msra.gmra.mrb[0].mxu1 %vm1823_vm9, %v1789_v60  ;;  %v2692_v39 = vunpack.i.h.bf16 %v3742_v16  ;;  %v2691_v50 = vunpack.i.l.bf16 %v3742_v16  ;;  %v2732_v55 = vunpack.i.h.bf16 %v3831_v45  ;;  %v2731_v25 = vunpack.i.l.bf16 %v3831_v45 }
 0x119   : > { %v4226_v14 = vpop.permute.xlu1 %2879  ;;  %v2727_v56 = vunpack.i.h.bf16 %v3837_v18  ;;  %v2726_v42 = vunpack.i.l.bf16 %v3837_v18  ;;  %v1570_v32 = vsel %vm1549_vm2, %v1537_v43, %v2646_v21  ;;  %v1571_v26 = vsel %vm1549_vm2, %v1538_v58, %v2647_v20 }
 0x11a   : > { %v4228_v62 = vpop.permute.xlu0 %2874  ;;  %v2862_v31 = vunpack.i.h.bf16 %v4199_v1  ;;  %v2861_v38 = vunpack.i.l.bf16 %v4199_v1  ;;  %v2872_v40 = vunpack.i.h.bf16 %v4221_v52  ;;  %v2871_v16 = vunpack.i.l.bf16 %v4221_v52 }
 0x11b   : > { %v2867_v36 = vunpack.i.h.bf16 %v4223_v4  ;;  %v2866_v45 = vunpack.i.l.bf16 %v4223_v4  ;;  %v1589_v17 = vsel %vm1582_vm3, %v1556_v61, %v2691_v50  ;;  %v1590_v18 = vsel %vm1582_vm3, %v1557_v51, %v2692_v39 }
 0x11c   : > { %v2882_v60 = vunpack.i.h.bf16 %v4226_v14  ;;  %v2881_v57 = vunpack.i.l.bf16 %v4226_v14  ;;  %v1605_v1 = vsel %vm1582_vm3, %v1572_v13, %v2731_v25  ;;  %v1606_v44 = vsel %vm1582_vm3, %v1573_v0, %v2732_v55 }
 0x11d   : > { %v4238_v3 = vpop.permute.xlu1 %2889  ;;  %v1603_v52 = vsel %vm1582_vm3, %v1570_v32, %v2726_v42  ;;  %v1604_v5 = vsel %vm1582_vm3, %v1571_v26, %v2727_v56  ;;  %v2877_v59 = vunpack.i.h.bf16 %v4228_v62  ;;  %v2876_v23 = vunpack.i.l.bf16 %v4228_v62 }
 0x11e   : > { %v4242_v53 = vpop.permute.xlu0 %2884  ;;  %v1636_v4 = vsel %vm1615_vm4, %v1603_v52, %v2861_v38  ;;  %v1637_v48 = vsel %vm1615_vm4, %v1604_v5, %v2862_v31  ;;  %v1638_v14 = vsel %vm1615_vm4, %v1605_v1, %v2871_v16  ;;  %v1639_v6 = vsel %vm1615_vm4, %v1606_v44, %v2872_v40 }
 0x11f   : > { %v1622_v11 = vsel %vm1615_vm4, %v1589_v17, %v2866_v45  ;;  %v1623_v33 = vsel %vm1615_vm4, %v1590_v18, %v2867_v36  ;;  %v1669_v54 = vsel %vm1648_vm5, %v1636_v4, %v2881_v57  ;;  %v1670_v49 = vsel %vm1648_vm5, %v1637_v48, %v2882_v60 }
 0x120   : > { %v2892_v63 = vunpack.i.h.bf16 %v4238_v3  ;;  %v2891_v35 = vunpack.i.l.bf16 %v4238_v3  ;;  %v2887_v62 = vunpack.i.h.bf16 %v4242_v53  ;;  %v2886_v2 = vunpack.i.l.bf16 %v4242_v53 }
 0x121   : > { %v4260_v9 = vpop.permute.xlu1 %2899  ;;  %v1653_v29 = vsel %vm1648_vm5, %v3976_v46, %v2876_v23  ;;  %v1654_v37 = vsel %vm1648_vm5, %v3979_v10, %v2877_v59 }
 0x122   : > { %v2895_v8 = vpop.permute.xlu0 %2894  ;;  %v2902_v24 = vunpack.i.h.bf16 %v4260_v9  ;;  %v2901_v34 = vunpack.i.l.bf16 %v4260_v9  ;;  %v1671_v43 = vsel %vm1648_vm5, %v1638_v14, %v2891_v35  ;;  %v1672_v53 = vsel %vm1648_vm5, %v1639_v6, %v2892_v63 }
 0x123   : > { %v2897_v7 = vunpack.i.h.bf16 %v2895_v8  ;;  %v2896_v41 = vunpack.i.l.bf16 %v2895_v8  ;;  %v1655_v51 = vsel %vm1648_vm5, %v1622_v11, %v2886_v2  ;;  %v1656_v46 = vsel %vm1648_vm5, %v1623_v33, %v2887_v62 }
 0x124   : > { %v1702_v10 = vsel %vm1681_vm6, %v1669_v54, %v2901_v34  ;;  %v1703_v9 = vsel %vm1681_vm6, %v1670_v49, %v2902_v24 }
 0x125   : > { %v2910_v22 = vpop.permute.xlu1 %2909  ;;  %v1686_v13 = vsel %vm1681_vm6, %v1653_v29, %v2896_v41  ;;  %v1687_v0 = vsel %vm1681_vm6, %v1654_v37, %v2897_v7 }
 0x126   : > { %v4282_v19 = vpop.permute.xlu0 %2904  ;;  %v2912_v30 = vunpack.i.h.bf16 %v2910_v22  ;;  %v2911_v20 = vunpack.i.l.bf16 %v2910_v22 }
 0x127   : > { %v2907_v39 = vunpack.i.h.bf16 %v4282_v19  ;;  %v2906_v50 = vunpack.i.l.bf16 %v4282_v19 }
 0x128   : > { %v1704_v8 = vsel %vm1681_vm6, %v1671_v43, %v2911_v20  ;;  %v1705_v55 = vsel %vm1681_vm6, %v1672_v53, %v2912_v30 }
 0x129   : > { %v2920_v27 = vpop.permute.xlu1 %2919  ;;  %v1688_v19 = vsel %vm1681_vm6, %v1655_v51, %v2906_v50  ;;  %v1689_v4 = vsel %vm1681_vm6, %v1656_v46, %v2907_v39 }
 0x12a   : > { %v2915_v28 = vpop.permute.xlu0 %2914  ;;  %v2922_v3 = vunpack.i.h.bf16 %v2920_v27  ;;  %v2921_v21 = vunpack.i.l.bf16 %v2920_v27 }
 0x12b   : > { %v2917_v47 = vunpack.i.h.bf16 %v2915_v28  ;;  %v2916_v58 = vunpack.i.l.bf16 %v2915_v28 }
 0x12c   : > { %v1735_v25 = vsel %vm1714_vm7, %v1702_v10, %v2921_v21  ;;  %v1736_v56 = vsel %vm1714_vm7, %v1703_v9, %v2922_v3 }
 0x12d   : > { %v2930_v12 = vpop.permute.xlu1 %2929  ;;  %v1719_v32 = vsel %vm1714_vm7, %v1686_v13, %v2916_v58  ;;  %v1720_v26 = vsel %vm1714_vm7, %v1687_v0, %v2917_v47 }
 0x12e   : > { %v2925_v61 = vpop.permute.xlu0 %2924  ;;  %v2932_v16 = vunpack.i.h.bf16 %v2930_v12  ;;  %v2931_v36 = vunpack.i.l.bf16 %v2930_v12 }
 0x12f   : > { %v2927_v17 = vunpack.i.h.bf16 %v2925_v61  ;;  %v2926_v18 = vunpack.i.l.bf16 %v2925_v61 }
 0x130   : > { %v1737_v6 = vsel %vm1714_vm7, %v1704_v8, %v2931_v36  ;;  %v1738_v11 = vsel %vm1714_vm7, %v1705_v55, %v2932_v16  ;;  %v4642_v8 = vld [vmem:[#allocation27_spill] sm:$0xff]  ;;  %v4646_v16 = vld [vmem:[#allocation26_spill] sm:$0xff] }
 0x131   : > { %v2940_v42 = vpop.permute.xlu1 %2939  ;;  %v1721_v54 = vsel %vm1714_vm7, %v1688_v19, %v2926_v18  ;;  %v1722_v49 = vsel %vm1714_vm7, %v1689_v4, %v2927_v17 }
 0x132   : > { %v2942_v31 = vunpack.i.h.bf16 %v2940_v42  ;;  %v2941_v38 = vunpack.i.l.bf16 %v2940_v42  ;;  %v2935_v40 = vpop.permute.xlu0 %2934  ;;  %v4644_v42 = vld [vmem:[#allocation20_spill] sm:$0xff] }
 0x133   : > { %v2937_v45 = vunpack.i.h.bf16 %v2935_v40  ;;  %v2936_v22 = vunpack.i.l.bf16 %v2935_v40 }
 0x134   : > { %v1768_v60 = vsel %vm1747_vm8, %v1735_v25, %v2941_v38  ;;  %v1769_v57 = vsel %vm1747_vm8, %v1736_v56, %v2942_v31  ;;  %v4643_v25 = vld [vmem:[#allocation19_spill] sm:$0xff]  ;;  %v4645_v38 = vld [vmem:[#allocation25_spill] sm:$0xff] }
 0x135   : > { %v1790_v1 = vpack.c.bf16 %v1769_v57, %v1768_v60  ;;  %v1752_v44 = vsel %vm1747_vm8, %v1719_v32, %v2936_v22  ;;  %v1753_v52 = vsel %vm1747_vm8, %v1720_v26, %v2937_v45  ;;  %v2950_v5 = vpop.permute.xlu1 %2949  ;;  %v4647_v45 = vld [vmem:[#allocation17_spill] sm:$0xff]  ;;  %v4648_v22 = vld [vmem:[#allocation18_spill] sm:$0xff] }
 0x136   : > { %v1782_v48 = vpack.c.bf16 %v1753_v52, %v1752_v44  ;;  %v2952_v59 = vunpack.i.h.bf16 %v2950_v5  ;;  %v2951_v23 = vunpack.i.l.bf16 %v2950_v5  ;;  %v2945_v14 = vpop.permute.xlu0 %2944 }
 0x137   : > { %v2947_v33 = vunpack.i.h.bf16 %v2945_v14  ;;  %v2946_v27 = vunpack.i.l.bf16 %v2945_v14  ;;  %2460 = vmatprep.mubr.msk.bf16.mxu1 %vm1823_vm9, %v1790_v1 }
 0x138   : > { %v1770_v63 = vsel %vm1747_vm8, %v1737_v6, %v2951_v23  ;;  %v1771_v35 = vsel %vm1747_vm8, %v1738_v11, %v2952_v59  ;;  %2444 = vmatprep.mubr.msk.bf16.mxu0 %vm1823_vm9, %v1782_v48 }
 0x139   : > { %v1791_v28 = vpack.c.bf16 %v1771_v35, %v1770_v63  ;;  %v1754_v62 = vsel %vm1747_vm8, %v1721_v54, %v2946_v27  ;;  %v1755_v2 = vsel %vm1747_vm8, %v1722_v49, %v2947_v33  ;;  %v2960_v24 = vpop.permute.xlu1 %2959 }
 0x13a   : > { %v1783_v34 = vpack.c.bf16 %v1755_v2, %v1754_v62  ;;  %v2955_v29 = vpop.permute.xlu0 %2954  ;;  %v2962_v43 = vunpack.i.h.bf16 %v2960_v24  ;;  %v2961_v53 = vunpack.i.l.bf16 %v2960_v24 }
 0x13b   : > { %2461 = vmatmul.mubr.msk.bf16.gmra.mrb[4].mxu1 %vm1823_vm9, %v1791_v28  ;;  %v2957_v47 = vunpack.i.h.bf16 %v2955_v29  ;;  %v2956_v58 = vunpack.i.l.bf16 %v2955_v29 }
 0x13c   : > { %2445 = vmatmul.mubr.msk.bf16.gmra.mrb[4].mxu0 %vm1823_vm9, %v1783_v34  ;;  %v1640_v50 = vsel %vm1615_vm4, %v3877_v15, %v2961_v53  ;;  %v1641_v55 = vsel %vm1615_vm4, %v4642_v8, %v2962_v43 }
 0x13d   : > { %v2970_v37 = vpop.permute.xlu1 %2969  ;;  %v1624_v56 = vsel %vm1615_vm4, %v4643_v25, %v2956_v58  ;;  %v1625_v32 = vsel %vm1615_vm4, %v4644_v42, %v2957_v47 }
 0x13e   : > { %v2965_v7 = vpop.permute.xlu0 %2964  ;;  %v2972_v61 = vunpack.i.h.bf16 %v2970_v37  ;;  %v2971_v51 = vunpack.i.l.bf16 %v2970_v37 }
 0x13f   : > { %v2967_v46 = vunpack.i.h.bf16 %v2965_v7  ;;  %v2966_v10 = vunpack.i.l.bf16 %v2965_v7 }
 0x140   : > { %v1642_v40 = vsel %vm1615_vm4, %v4645_v38, %v2971_v51  ;;  %v1643_v36 = vsel %vm1615_vm4, %v4646_v16, %v2972_v61 }
 0x141   : > { %v2980_v41 = vpop.permute.xlu1 %2979  ;;  %v1626_v15 = vsel %vm1615_vm4, %v4647_v45, %v2966_v10  ;;  %v1627_v17 = vsel %vm1615_vm4, %v4648_v22, %v2967_v46 }
 0x142   : > { %v2975_v30 = vpop.permute.xlu0 %2974  ;;  %v2982_v13 = vunpack.i.h.bf16 %v2980_v41  ;;  %v2981_v0 = vunpack.i.l.bf16 %v2980_v41 }
 0x143   : > { %v2977_v26 = vunpack.i.h.bf16 %v2975_v30  ;;  %v2976_v31 = vunpack.i.l.bf16 %v2975_v30 }
 0x144   : > { %v1673_v60 = vsel %vm1648_vm5, %v1640_v50, %v2981_v0  ;;  %v1674_v57 = vsel %vm1648_vm5, %v1641_v55, %v2982_v13 }
 0x145   : > { %v2990_v20 = vpop.permute.xlu1 %2989  ;;  %v1657_v59 = vsel %vm1648_vm5, %v1624_v56, %v2976_v31  ;;  %v1658_v23 = vsel %vm1648_vm5, %v1625_v32, %v2977_v26 }
 0x146   : > { %v2985_v3 = vpop.permute.xlu0 %2984  ;;  %v2992_v19 = vunpack.i.h.bf16 %v2990_v20  ;;  %v2991_v1 = vunpack.i.l.bf16 %v2990_v20 }
 0x147   : > { %v2987_v52 = vunpack.i.h.bf16 %v2985_v3  ;;  %v2986_v5 = vunpack.i.l.bf16 %v2985_v3 }
 0x148   : > { %v1675_v63 = vsel %vm1648_vm5, %v1642_v40, %v2991_v1  ;;  %v1676_v35 = vsel %vm1648_vm5, %v1643_v36, %v2992_v19 }
 0x149   : > { %v3000_v21 = vpop.permute.xlu1 %2999  ;;  %v1659_v24 = vsel %vm1648_vm5, %v1626_v15, %v2986_v5  ;;  %v1660_v34 = vsel %vm1648_vm5, %v1627_v17, %v2987_v52 }
 0x14a   : > { %v2995_v12 = vpop.permute.xlu0 %2994  ;;  %v3002_v4 = vunpack.i.h.bf16 %v3000_v21  ;;  %v3001_v48 = vunpack.i.l.bf16 %v3000_v21 }
 0x14b   : > { %v2997_v14 = vunpack.i.h.bf16 %v2995_v12  ;;  %v2996_v6 = vunpack.i.l.bf16 %v2995_v12 }
 0x14c   : > { %v1706_v29 = vsel %vm1681_vm6, %v1673_v60, %v3001_v48  ;;  %v1707_v37 = vsel %vm1681_vm6, %v1674_v57, %v3002_v4 }
 0x14d   : > { %v3010_v9 = vpop.permute.xlu1 %3009  ;;  %v1690_v7 = vsel %vm1681_vm6, %v1657_v59, %v2996_v6  ;;  %v1691_v41 = vsel %vm1681_vm6, %v1658_v23, %v2997_v14 }
 0x14e   : > { %v4342_v39 = vpop.permute.xlu0 %3004  ;;  %v3012_v11 = vunpack.i.h.bf16 %v3010_v9  ;;  %v3011_v33 = vunpack.i.l.bf16 %v3010_v9 }
 0x14f   : > { %v3007_v30 = vunpack.i.h.bf16 %v4342_v39  ;;  %v3006_v20 = vunpack.i.l.bf16 %v4342_v39 }
 0x150   : > { %v1708_v3 = vsel %vm1681_vm6, %v1675_v63, %v3011_v33  ;;  %v1709_v21 = vsel %vm1681_vm6, %v1676_v35, %v3012_v11 }
 0x151   : > { %v3020_v18 = vpop.permute.xlu1 %3019  ;;  %v1692_v25 = vsel %vm1681_vm6, %v1659_v24, %v3006_v20  ;;  %v1693_v31 = vsel %vm1681_vm6, %v1660_v34, %v3007_v30  ;;  %v4649_v30 = vld [vmem:[#allocation30_spill] sm:$0xff] }
 0x152   : > { %v3015_v44 = vpop.permute.xlu0 %3014  ;;  %v3022_v27 = vunpack.i.h.bf16 %v3020_v18  ;;  %v3021_v54 = vunpack.i.l.bf16 %v3020_v18 }
 0x153   : > { %v3017_v28 = vunpack.i.h.bf16 %v3015_v44  ;;  %v3016_v62 = vunpack.i.l.bf16 %v3015_v44 }
 0x154   : > { %v1739_v12 = vsel %vm1714_vm7, %v1706_v29, %v3021_v54  ;;  %v1740_v43 = vsel %vm1714_vm7, %v1707_v37, %v3022_v27 }
 0x155   : > { %v3030_v49 = vpop.permute.xlu1 %3029  ;;  %v1723_v47 = vsel %vm1714_vm7, %v1690_v7, %v3016_v62  ;;  %v1724_v58 = vsel %vm1714_vm7, %v1691_v41, %v3017_v28 }
 0x156   : > { %v3025_v2 = vpop.permute.xlu0 %3024  ;;  %v3032_v10 = vunpack.i.h.bf16 %v3030_v49  ;;  %v3031_v9 = vunpack.i.l.bf16 %v3030_v49 }
 0x157   : > { %v3027_v39 = vunpack.i.h.bf16 %v3025_v2  ;;  %v3026_v50 = vunpack.i.l.bf16 %v3025_v2 }
 0x158   : > { %v1741_v45 = vsel %vm1714_vm7, %v1708_v3, %v3031_v9  ;;  %v1742_v15 = vsel %vm1714_vm7, %v1709_v21, %v3032_v10  ;;  %v4650_v3 = vld [vmem:[#allocation31_spill] sm:$0xff]  ;;  %v4654_v10 = vld [vmem:[#allocation29_spill] sm:$0xff] }
 0x159   : > { %v3040_v53 = vpop.permute.xlu1 %3039  ;;  %v1725_v18 = vsel %vm1714_vm7, %v1692_v25, %v3026_v50  ;;  %v1726_v60 = vsel %vm1714_vm7, %v1693_v31, %v3027_v39  ;;  %v4656_v39 = vld [vmem:[#allocation22_spill] sm:$0xff] }
 0x15a   : > { %v3042_v61 = vunpack.i.h.bf16 %v3040_v53  ;;  %v3041_v51 = vunpack.i.l.bf16 %v3040_v53  ;;  %v3035_v46 = vpop.permute.xlu0 %3034  ;;  %v4652_v53 = vld [vmem:[#allocation24_spill] sm:$0xff] }
 0x15b   : > { %v3037_v13 = vunpack.i.h.bf16 %v3035_v46  ;;  %v3036_v0 = vunpack.i.l.bf16 %v3035_v46 }
 0x15c   : > { %v1772_v8 = vsel %vm1747_vm8, %v1739_v12, %v3041_v51  ;;  %v1773_v55 = vsel %vm1747_vm8, %v1740_v43, %v3042_v61  ;;  %v4651_v12 = vld [vmem:[#allocation23_spill] sm:$0xff]  ;;  %v4653_v51 = vld [vmem:[#allocation28_spill] sm:$0xff] }
 0x15d   : > { %v1792_v56 = vpack.c.bf16 %v1773_v55, %v1772_v8  ;;  %v1756_v42 = vsel %vm1747_vm8, %v1723_v47, %v3036_v0  ;;  %v1757_v32 = vsel %vm1747_vm8, %v1724_v58, %v3037_v13  ;;  %v3050_v26 = vpop.permute.xlu1 %3049  ;;  %v4655_v13 = vld [vmem:[#allocation21_spill] sm:$0xff] }
 0x15e   : > { %v1784_v38 = vpack.c.bf16 %v1757_v32, %v1756_v42  ;;  %v3052_v40 = vunpack.i.h.bf16 %v3050_v26  ;;  %v3051_v16 = vunpack.i.l.bf16 %v3050_v26  ;;  %v3045_v36 = vpop.permute.xlu0 %3044 }
 0x15f   : > { %v3047_v22 = vunpack.i.h.bf16 %v3045_v36  ;;  %v3046_v17 = vunpack.i.l.bf16 %v3045_v36  ;;  %2464 = vmatprep.mubr.msk.bf16.mxu1 %vm1823_vm9, %v1792_v56 }
 0x160   : > { %v1774_v57 = vsel %vm1747_vm8, %v1741_v45, %v3051_v16  ;;  %v1775_v19 = vsel %vm1747_vm8, %v1742_v15, %v3052_v40  ;;  %2448 = vmatprep.mubr.msk.bf16.mxu0 %vm1823_vm9, %v1784_v38 }
 0x161   : > { %v1793_v1 = vpack.c.bf16 %v1775_v19, %v1774_v57  ;;  %v1758_v44 = vsel %vm1747_vm8, %v1725_v18, %v3046_v17  ;;  %v1759_v52 = vsel %vm1747_vm8, %v1726_v60, %v3047_v22  ;;  %v3060_v5 = vpop.permute.xlu1 %3059 }
 0x162   : > { %v1785_v4 = vpack.c.bf16 %v1759_v52, %v1758_v44  ;;  %v3055_v48 = vpop.permute.xlu0 %3054  ;;  %v3062_v49 = vunpack.i.h.bf16 %v3060_v5  ;;  %v3061_v63 = vunpack.i.l.bf16 %v3060_v5 }
 0x163   : > { %2465 = vmatmul.mubr.msk.bf16.gmra.mrb[8].mxu1 %vm1823_vm9, %v1793_v1  ;;  %v3057_v35 = vunpack.i.h.bf16 %v3055_v48  ;;  %v3056_v28 = vunpack.i.l.bf16 %v3055_v48 }
 0x164   : > { %2449 = vmatmul.mubr.msk.bf16.gmra.mrb[8].mxu0 %vm1823_vm9, %v1785_v4  ;;  %v1644_v20 = vsel %vm1615_vm4, %v4649_v30, %v3061_v63  ;;  %v1645_v21 = vsel %vm1615_vm4, %v4650_v3, %v3062_v49 }
 0x165   : > { %v3070_v59 = vpop.permute.xlu1 %3069  ;;  %v1628_v43 = vsel %vm1615_vm4, %v4651_v12, %v3056_v28  ;;  %v1629_v47 = vsel %vm1615_vm4, %v4652_v53, %v3057_v35 }
 0x166   : > { %v3065_v23 = vpop.permute.xlu0 %3064  ;;  %v3072_v62 = vunpack.i.h.bf16 %v3070_v59  ;;  %v3071_v2 = vunpack.i.l.bf16 %v3070_v59 }
 0x167   : > { %v3067_v24 = vunpack.i.h.bf16 %v3065_v23  ;;  %v3066_v34 = vunpack.i.l.bf16 %v3065_v23 }
 0x168   : > { %v1646_v46 = vsel %vm1615_vm4, %v4653_v51, %v3071_v2  ;;  %v1647_v9 = vsel %vm1615_vm4, %v4654_v10, %v3072_v62 }
 0x169   : > { %v3080_v14 = vpop.permute.xlu1 %3079  ;;  %v1630_v0 = vsel %vm1615_vm4, %v4655_v13, %v3066_v34  ;;  %v1631_v50 = vsel %vm1615_vm4, %v4656_v39, %v3067_v24 }
 0x16a   : > { %v3075_v6 = vpop.permute.xlu0 %3074  ;;  %v3082_v37 = vunpack.i.h.bf16 %v3080_v14  ;;  %v3081_v7 = vunpack.i.l.bf16 %v3080_v14 }
 0x16b   : > { %v3077_v58 = vunpack.i.h.bf16 %v3075_v6  ;;  %v3076_v61 = vunpack.i.l.bf16 %v3075_v6 }
 0x16c   : > { %v1677_v55 = vsel %vm1648_vm5, %v1644_v20, %v3081_v7  ;;  %v1678_v25 = vsel %vm1648_vm5, %v1645_v21, %v3082_v37 }
 0x16d   : > { %v3090_v11 = vpop.permute.xlu1 %3089  ;;  %v1661_v16 = vsel %vm1648_vm5, %v1628_v43, %v3076_v61  ;;  %v1662_v36 = vsel %vm1648_vm5, %v1629_v47, %v3077_v58 }
 0x16e   : > { %v3085_v33 = vpop.permute.xlu0 %3084  ;;  %v3092_v56 = vunpack.i.h.bf16 %v3090_v11  ;;  %v3091_v42 = vunpack.i.l.bf16 %v3090_v11 }
 0x16f   : > { %v3087_v26 = vunpack.i.h.bf16 %v3085_v33  ;;  %v3086_v31 = vunpack.i.l.bf16 %v3085_v33 }
 0x170   : > { %v1679_v19 = vsel %vm1648_vm5, %v1646_v46, %v3091_v42  ;;  %v1680_v1 = vsel %vm1648_vm5, %v1647_v9, %v3092_v56 }
 0x171   : > { %v3100_v27 = vpop.permute.xlu1 %3099  ;;  %v1663_v4 = vsel %vm1648_vm5, %v1630_v0, %v3086_v31  ;;  %v1664_v48 = vsel %vm1648_vm5, %v1631_v50, %v3087_v26 }
 0x172   : > { %v3095_v54 = vpop.permute.xlu0 %3094  ;;  %v3102_v38 = vunpack.i.h.bf16 %v3100_v27  ;;  %v3101_v40 = vunpack.i.l.bf16 %v3100_v27 }
 0x173   : > { %v3097_v45 = vunpack.i.h.bf16 %v3095_v54  ;;  %v3096_v15 = vunpack.i.l.bf16 %v3095_v54 }
 0x174   : > { %v1710_v59 = vsel %vm1681_vm6, %v1677_v55, %v3101_v40  ;;  %v1711_v23 = vsel %vm1681_vm6, %v1678_v25, %v3102_v38  ;;  %v4457_v38 = vld [vmem:[%s4572_s2] ss:$0 sm:$0xff] }
 0x175   : > { %v3110_v29 = vpop.permute.xlu1 %3109  ;;  %v1694_v14 = vsel %vm1681_vm6, %v1661_v16, %v3096_v15  ;;  %v1695_v6 = vsel %vm1681_vm6, %v1662_v36, %v3097_v45 }
 0x176   : > { %v4398_v41 = vpop.permute.xlu0 %3104  ;;  %v3112_v22 = vunpack.i.h.bf16 %v3110_v29  ;;  %v3111_v17 = vunpack.i.l.bf16 %v3110_v29 }
 0x177   : > { %v3107_v11 = vunpack.i.h.bf16 %v4398_v41  ;;  %v3106_v33 = vunpack.i.l.bf16 %v4398_v41 }
 0x178   : > { %v1712_v27 = vsel %vm1681_vm6, %v1679_v19, %v3111_v17  ;;  %v1713_v54 = vsel %vm1681_vm6, %v1680_v1, %v3112_v22 }
 0x179   : > { %v3120_v8 = vpop.permute.xlu1 %3119  ;;  %v1696_v12 = vsel %vm1681_vm6, %v1663_v4, %v3106_v33  ;;  %v1697_v61 = vsel %vm1681_vm6, %v1664_v48, %v3107_v11 }
 0x17a   : > { %v3115_v32 = vpop.permute.xlu0 %3114  ;;  %v3122_v18 = vunpack.i.h.bf16 %v3120_v8  ;;  %v3121_v60 = vunpack.i.l.bf16 %v3120_v8 }
 0x17b   : > { %v3117_v44 = vunpack.i.h.bf16 %v3115_v32  ;;  %v3116_v52 = vunpack.i.l.bf16 %v3115_v32 }
 0x17c   : > { %v1743_v49 = vsel %vm1714_vm7, %v1710_v59, %v3121_v60  ;;  %v1744_v63 = vsel %vm1714_vm7, %v1711_v23, %v3122_v18 }
 0x17d   : > { %v3130_v57 = vpop.permute.xlu1 %3129  ;;  %v1727_v28 = vsel %vm1714_vm7, %v1694_v14, %v3116_v52  ;;  %v1728_v62 = vsel %vm1714_vm7, %v1695_v6, %v3117_v44 }
 0x17e   : > { %v3125_v5 = vpop.permute.xlu0 %3124  ;;  %v3132_v29 = vunpack.i.h.bf16 %v3130_v57  ;;  %v3131_v37 = vunpack.i.l.bf16 %v3130_v57 }
 0x17f   : > { %v3127_v30 = vunpack.i.h.bf16 %v3125_v5  ;;  %v3126_v20 = vunpack.i.l.bf16 %v3125_v5 }
 0x180   : > { %v1745_v13 = vsel %vm1714_vm7, %v1712_v27, %v3131_v37  ;;  %v1746_v0 = vsel %vm1714_vm7, %v1713_v54, %v3132_v29 }
 0x181   : > { %v3140_v35 = vpop.permute.xlu1 %3139  ;;  %v1729_v8 = vsel %vm1714_vm7, %v1696_v12, %v3126_v20  ;;  %v1730_v55 = vsel %vm1714_vm7, %v1697_v61, %v3127_v30 }
 0x182   : > { %v3142_v2 = vunpack.i.h.bf16 %v3140_v35  ;;  %v3141_v24 = vunpack.i.l.bf16 %v3140_v35  ;;  %v3135_v34 = vpop.permute.xlu0 %3134 }
 0x183   : > { %v3137_v7 = vunpack.i.h.bf16 %v3135_v34  ;;  %v3136_v41 = vunpack.i.l.bf16 %v3135_v34 }
 0x184   : > { %v1776_v3 = vsel %vm1747_vm8, %v1743_v49, %v3141_v24  ;;  %v1777_v21 = vsel %vm1747_vm8, %v1744_v63, %v3142_v2 }
 0x185   : > { %v1794_v43 = vpack.c.bf16 %v1777_v21, %v1776_v3  ;;  %v1760_v53 = vsel %vm1747_vm8, %v1727_v28, %v3136_v41  ;;  %v1761_v47 = vsel %vm1747_vm8, %v1728_v62, %v3137_v7  ;;  %v3150_v58 = vpop.permute.xlu1 %3149 }
 0x186   : > { %v1786_v51 = vpack.c.bf16 %v1761_v47, %v1760_v53  ;;  %v3152_v46 = vunpack.i.h.bf16 %v3150_v58  ;;  %v3151_v10 = vunpack.i.l.bf16 %v3150_v58  ;;  %v3145_v9 = vpop.permute.xlu0 %3144 }
 0x187   : > { %v3147_v39 = vunpack.i.h.bf16 %v3145_v9  ;;  %v3146_v50 = vunpack.i.l.bf16 %v3145_v9  ;;  %2468 = vmatprep.mubr.msk.bf16.mxu1 %vm1823_vm9, %v1794_v43 }
 0x188   : > { %v1778_v25 = vsel %vm1747_vm8, %v1745_v13, %v3151_v10  ;;  %v1779_v56 = vsel %vm1747_vm8, %v1746_v0, %v3152_v46  ;;  %2452 = vmatprep.mubr.msk.bf16.mxu0 %vm1823_vm9, %v1786_v51 }
 0x189   : > { %v1795_v42 = vpack.c.bf16 %v1779_v56, %v1778_v25  ;;  %v1762_v32 = vsel %vm1747_vm8, %v1729_v8, %v3146_v50  ;;  %v1763_v26 = vsel %vm1747_vm8, %v1730_v55, %v3147_v39 }
 0x18a   : > { %v1787_v31 = vpack.c.bf16 %v1763_v26, %v1762_v32 }
 0x18b   : > { %2469 = vmatmul.mubr.msk.bf16.gmra.mrb[12].mxu1 %vm1823_vm9, %v1795_v42 }
 0x18c   : > { %2453 = vmatmul.mubr.msk.bf16.gmra.mrb[12].mxu0 %vm1823_vm9, %v1787_v31 }
 0x1e6   : > { %v2442_v40 = vpop.f32.mrb[0].mxu0 }
 0x1e7   : > { %v1919_v16 = vadd.f32 %v2442_v40, %v4457_v38  ;;  %v1910_v36 = vpop.f32.mrb[1].mxu0 }
 0x1e8   : > { %v1911_v45 = vadd.f32 %v4457_v38, %v1910_v36  ;;  %v2443_v15 = vpop.f32.mrb[2].mxu0 }
 0x1e9   : > { %v2039_v22 = vmax.f32 %v1919_v16, 0.0  ;;  %v1922_v17 = vadd.f32 %v2443_v15, %v4457_v38  ;;  %v1913_v18 = vpop.f32.mrb[3].mxu0 }
 0x1ea   : > { %v2037_v60 = vmax.f32 %v1911_v45, 0.0  ;;  %v1914_v57 = vadd.f32 %v4457_v38, %v1913_v18 }
 0x1eb   : > { %2071 = vst.msk [vmem:[%s4464_s16 + $0x10] sm:$0xff] %vm1549_vm2, %v2039_v22  ;;  %v2040_v19 = vmax.f32 %v1922_v17, 0.0  ;;  %v2458_v1 = vpop.f32.mrb[0].mxu1 }
 0x1ec   : > { %2069 = vst.msk [vmem:[%s4464_s16] sm:$0xff] %vm1549_vm2, %v2037_v60  ;;  %v2038_v44 = vmax.f32 %v1914_v57, 0.0  ;;  %v1983_v52 = vadd.f32 %v2458_v1, %v4457_v38  ;;  %v1974_v5 = vpop.f32.mrb[1].mxu1 }
 0x1ed   : > { %2072 = vst.msk [vmem:[%s4464_s16 + $0x18] sm:$0xff] %vm1549_vm2, %v2040_v19  ;;  %v1975_v4 = vadd.f32 %v4457_v38, %v1974_v5  ;;  %v2459_v48 = vpop.f32.mrb[2].mxu1 }
 0x1ee   : > { %2070 = vst.msk [vmem:[%s4464_s16 + $0x8] sm:$0xff] %vm1549_vm2, %v2038_v44  ;;  %v2055_v59 = vmax.f32 %v1983_v52, 0.0  ;;  %v1986_v23 = vadd.f32 %v2459_v48, %v4457_v38  ;;  %v1977_v14 = vpop.f32.mrb[3].mxu1 }
 0x1ef   : > { %v2053_v6 = vmax.f32 %v1975_v4, 0.0  ;;  %v1978_v11 = vadd.f32 %v4457_v38, %v1977_v14 }
 0x1f0   : > { %2087 = vst.msk [vmem:[%s4464_s16 + $0x90] sm:$0xff] %vm1549_vm2, %v2055_v59  ;;  %v2056_v33 = vmax.f32 %v1986_v23, 0.0 }
 0x1f1   : > { %2085 = vst.msk [vmem:[%s4464_s16 + $0x80] sm:$0xff] %vm1549_vm2, %v2053_v6  ;;  %v2054_v27 = vmax.f32 %v1978_v11, 0.0 }
 0x1f2   : > { %2088 = vst.msk [vmem:[%s4464_s16 + $0x98] sm:$0xff] %vm1549_vm2, %v2056_v33 }
 0x1f3   : > { %2086 = vst.msk [vmem:[%s4464_s16 + $0x88] sm:$0xff] %vm1549_vm2, %v2054_v27 }
 0x20e   : > { %v2462_v54 = vpop.f32.mrb[4].mxu1 }
 0x20f   : > { %v2446_v49 = vpop.f32.mrb[4].mxu0  ;;  %v1999_v63 = vadd.f32 %v2462_v54, %v4457_v38  ;;  %v1990_v35 = vpop.f32.mrb[5].mxu1 }
 0x210   : > { %v1935_v28 = vadd.f32 %v2446_v49, %v4457_v38  ;;  %v1926_v62 = vpop.f32.mrb[5].mxu0  ;;  %v1991_v2 = vadd.f32 %v4457_v38, %v1990_v35  ;;  %v2463_v24 = vpop.f32.mrb[6].mxu1 }
 0x211   : > { %v2059_v34 = vmax.f32 %v1999_v63, 0.0  ;;  %v1927_v29 = vadd.f32 %v4457_v38, %v1926_v62  ;;  %v2447_v37 = vpop.f32.mrb[6].mxu0  ;;  %v2002_v7 = vadd.f32 %v2463_v24, %v4457_v38  ;;  %v1993_v41 = vpop.f32.mrb[7].mxu1 }
 0x212   : > { %v2043_v30 = vmax.f32 %v1935_v28, 0.0  ;;  %v2057_v20 = vmax.f32 %v1991_v2, 0.0  ;;  %v1938_v3 = vadd.f32 %v2447_v37, %v4457_v38  ;;  %v1929_v21 = vpop.f32.mrb[7].mxu0  ;;  %v1994_v12 = vadd.f32 %v4457_v38, %v1993_v41 }
 0x213   : > { %2091 = vst.msk [vmem:[%s4464_s16 + $0xb0] sm:$0xff] %vm1549_vm2, %v2059_v34  ;;  %v2041_v43 = vmax.f32 %v1927_v29, 0.0  ;;  %v2060_v53 = vmax.f32 %v2002_v7, 0.0  ;;  %v1930_v47 = vadd.f32 %v4457_v38, %v1929_v21 }
 0x214   : > { %2075 = vst.msk [vmem:[%s4464_s16 + $0x30] sm:$0xff] %vm1549_vm2, %v2043_v30  ;;  %2089 = vst.msk [vmem:[%s4464_s16 + $0xa0] sm:$0xff] %vm1549_vm2, %v2057_v20  ;;  %v2044_v58 = vmax.f32 %v1938_v3, 0.0  ;;  %v2058_v61 = vmax.f32 %v1994_v12, 0.0 }
 0x215   : > { %2073 = vst.msk [vmem:[%s4464_s16 + $0x20] sm:$0xff] %vm1549_vm2, %v2041_v43  ;;  %2092 = vst.msk [vmem:[%s4464_s16 + $0xb8] sm:$0xff] %vm1549_vm2, %v2060_v53  ;;  %v2042_v51 = vmax.f32 %v1930_v47, 0.0 }
 0x216   : > { %2076 = vst.msk [vmem:[%s4464_s16 + $0x38] sm:$0xff] %vm1549_vm2, %v2044_v58  ;;  %2090 = vst.msk [vmem:[%s4464_s16 + $0xa8] sm:$0xff] %vm1549_vm2, %v2058_v61 }
 0x217   : > { %2074 = vst.msk [vmem:[%s4464_s16 + $0x28] sm:$0xff] %vm1549_vm2, %v2042_v51 }
 0x236   : > { %v2466_v46 = vpop.f32.mrb[8].mxu1 }
 0x237   : > { %v2450_v10 = vpop.f32.mrb[8].mxu0  ;;  %v2015_v9 = vadd.f32 %v2466_v46, %v4457_v38  ;;  %v2006_v13 = vpop.f32.mrb[9].mxu1 }
 0x238   : > { %v1951_v0 = vadd.f32 %v2450_v10, %v4457_v38  ;;  %v1942_v39 = vpop.f32.mrb[9].mxu0  ;;  %v2007_v50 = vadd.f32 %v4457_v38, %v2006_v13  ;;  %v2467_v8 = vpop.f32.mrb[10].mxu1 }
 0x239   : > { %v2063_v55 = vmax.f32 %v2015_v9, 0.0  ;;  %v1943_v25 = vadd.f32 %v4457_v38, %v1942_v39  ;;  %v2451_v56 = vpop.f32.mrb[10].mxu0  ;;  %v2018_v42 = vadd.f32 %v2467_v8, %v4457_v38  ;;  %v2009_v32 = vpop.f32.mrb[11].mxu1 }
 0x23a   : > { %v2047_v26 = vmax.f32 %v1951_v0, 0.0  ;;  %v2061_v31 = vmax.f32 %v2007_v50, 0.0  ;;  %v1954_v40 = vadd.f32 %v2451_v56, %v4457_v38  ;;  %v1945_v16 = vpop.f32.mrb[11].mxu0  ;;  %v2010_v36 = vadd.f32 %v4457_v38, %v2009_v32 }
 0x23b   : > { %2095 = vst.msk [vmem:[%s4464_s16 + $0xd0] sm:$0xff] %vm1549_vm2, %v2063_v55  ;;  %v2045_v45 = vmax.f32 %v1943_v25, 0.0  ;;  %v2064_v15 = vmax.f32 %v2018_v42, 0.0  ;;  %v1946_v22 = vadd.f32 %v4457_v38, %v1945_v16 }
 0x23c   : > { %2079 = vst.msk [vmem:[%s4464_s16 + $0x50] sm:$0xff] %vm1549_vm2, %v2047_v26  ;;  %2093 = vst.msk [vmem:[%s4464_s16 + $0xc0] sm:$0xff] %vm1549_vm2, %v2061_v31  ;;  %v2048_v17 = vmax.f32 %v1954_v40, 0.0  ;;  %v2062_v18 = vmax.f32 %v2010_v36, 0.0 }
 0x23d   : > { %2077 = vst.msk [vmem:[%s4464_s16 + $0x40] sm:$0xff] %vm1549_vm2, %v2045_v45  ;;  %2096 = vst.msk [vmem:[%s4464_s16 + $0xd8] sm:$0xff] %vm1549_vm2, %v2064_v15  ;;  %v2046_v60 = vmax.f32 %v1946_v22, 0.0 }
 0x23e   : > { %2080 = vst.msk [vmem:[%s4464_s16 + $0x58] sm:$0xff] %vm1549_vm2, %v2048_v17  ;;  %2094 = vst.msk [vmem:[%s4464_s16 + $0xc8] sm:$0xff] %vm1549_vm2, %v2062_v18 }
 0x23f   : > { %2078 = vst.msk [vmem:[%s4464_s16 + $0x48] sm:$0xff] %vm1549_vm2, %v2046_v60 }
 0x25e   : > { %v2470_v57 = vpop.f32.mrb[12].mxu1 }
 0x25f   : > { %v2454_v19 = vpop.f32.mrb[12].mxu0  ;;  %v2031_v1 = vadd.f32 %v2470_v57, %v4457_v38  ;;  %v2022_v44 = vpop.f32.mrb[13].mxu1 }
 0x260   : > { %v1967_v52 = vadd.f32 %v2454_v19, %v4457_v38  ;;  %v1958_v5 = vpop.f32.mrb[13].mxu0  ;;  %v2023_v4 = vadd.f32 %v4457_v38, %v2022_v44  ;;  %v2471_v48 = vpop.f32.mrb[14].mxu1 }
 0x261   : > { %v2067_v59 = vmax.f32 %v2031_v1, 0.0  ;;  %v1959_v23 = vadd.f32 %v4457_v38, %v1958_v5  ;;  %v2455_v14 = vpop.f32.mrb[14].mxu0  ;;  %v2034_v6 = vadd.f32 %v2471_v48, %v4457_v38  ;;  %v2025_v11 = vpop.f32.mrb[15].mxu1 }
 0x262   : > { %v2051_v33 = vmax.f32 %v1967_v52, 0.0  ;;  %v2065_v27 = vmax.f32 %v2023_v4, 0.0  ;;  %v1970_v54 = vadd.f32 %v2455_v14, %v4457_v38  ;;  %v1961_v49 = vpop.f32.mrb[15].mxu0  ;;  %v2026_v63 = vadd.f32 %v4457_v38, %v2025_v11 }
 0x263   : > { %2099 = vst.msk [vmem:[%s4464_s16 + $0xf0] sm:$0xff] %vm1549_vm2, %v2067_v59  ;;  %v2049_v35 = vmax.f32 %v1959_v23, 0.0  ;;  %v2068_v28 = vmax.f32 %v2034_v6, 0.0  ;;  %v1962_v62 = vadd.f32 %v4457_v38, %v1961_v49 }
 0x264   : > { %2083 = vst.msk [vmem:[%s4464_s16 + $0x70] sm:$0xff] %vm1549_vm2, %v2051_v33  ;;  %2097 = vst.msk [vmem:[%s4464_s16 + $0xe0] sm:$0xff] %vm1549_vm2, %v2065_v27  ;;  %v2052_v2 = vmax.f32 %v1970_v54, 0.0  ;;  %v2066_v24 = vmax.f32 %v2026_v63, 0.0 }
 0x265   : > { %2081 = vst.msk [vmem:[%s4464_s16 + $0x60] sm:$0xff] %vm1549_vm2, %v2049_v35  ;;  %2100 = vst.msk [vmem:[%s4464_s16 + $0xf8] sm:$0xff] %vm1549_vm2, %v2068_v28  ;;  %v2050_v34 = vmax.f32 %v1962_v62, 0.0 }
 0x266   : > { %2084 = vst.msk [vmem:[%s4464_s16 + $0x78] sm:$0xff] %vm1549_vm2, %v2052_v2  ;;  %2098 = vst.msk [vmem:[%s4464_s16 + $0xe8] sm:$0xff] %vm1549_vm2, %v2066_v24 }
 0x267   : > { %2082 = vst.msk [vmem:[%s4464_s16 + $0x68] sm:$0xff] %vm1549_vm2, %v2050_v34 }
 0x268 PF: > { %s13_s14 = sadd.s32 1, %s3184_s14   ;;  %s4657_s12 = smov %s3180_s13 }
 0x269   : > { %p10_p5 = scmp.ge.s32.totalorder %s13_s14, 4   ;;  %s4658_s13 = smov %s4660_s15 }
 0x26b   :  { %12 = sbr.rel (!%p10_p5) target bundleno = 2 (0x2), region = 65 }

</bundles_post_ra>
